<compile_context>
chip_gen: v5e
topology: v5e:2x2
jax: 0.10.0
libtpu: 0.0.40
codegen_flags: <defaults>
</compile_context>

<pallas_src>
import functools

import jax
import jax.numpy as jnp
from jax.experimental import pallas as pl
from jax.experimental.pallas import tpu as pltpu

# ----------------------------- configuration -------------------------------
N_VIEWS = 2
NUM_BODY_JOINTS = 23
JOINT_REP_DIM = 6                                  # '6d'
NPOSE = JOINT_REP_DIM * NUM_BODY_JOINTS            # 138
NUM_TOKENS = 1 + N_VIEWS                           # 3
TOKEN_DIM = 1                                      # TRANSFORMER_INPUT == 'zero'
DIM = 64
HEADS = 2
DIM_HEAD = 16
INNER = HEADS * DIM_HEAD                           # 32
MLP_DIM = 128
DEPTH = 2
CONTEXT_DIM = 32                                   # backbone feature channels C
IEF_ITERS = 1                                      # kernel realizes 1 IEF iter (zero token)
LN_EPS = 1e-5
T1_OUT = NPOSE + 10                                # 148 (body pose ++ betas)
TC_OUT = 6 + 3                                     # 9   (global orientation ++ cam)

# ------------------------- packed-slab row layout ---------------------------
LAYER_VEC_ROWS = 10
VEC_ROWS = ((NUM_TOKENS + DEPTH * LAYER_VEC_ROWS + 7) // 8) * 8        # 24
# per-layer weight block (all slabs 128 lanes wide, weights stored as (K, N)):
QKV_OFF, SA_OUT_OFF, CAQ_OFF, CA_OUT_OFF, FF1_OFF, FF2_OFF = 0, 64, 96, 160, 192, 256
LAYER_W_ROWS = 384
KV_W_BASE = DEPTH * LAYER_W_ROWS                                       # 768
W_ROWS = KV_W_BASE + DEPTH * 2 * INNER                                 # 896
HEAD_ROWS = ((2 * DIM + 1 + 7) // 8) * 8                               # 136
OUT_COLS = 256
TC_COL = 160                                       # column offset of the (go ++ cam) region


# --------------------------- in-kernel helpers ------------------------------
def _ln(x, g, b):
    mu = jnp.mean(x, axis=-1, keepdims=True)
    xc = x - mu
    var = jnp.mean(xc * xc, axis=-1, keepdims=True)
    return xc * jax.lax.rsqrt(var + LN_EPS) * g + b


def _softmax(s):
    m = jnp.max(s, axis=-1, keepdims=True)
    e = jnp.exp(s - m)
    return e * pl.reciprocal(jnp.sum(e, axis=-1, keepdims=True), approx=True)


def _erf(x):
    # Abramowitz & Stegun 7.1.26, |abs err| <= 1.5e-7 (~f32 eps): keeps the exact
    # (erf-based) torch.nn.GELU semantics without relying on an erf lowering.
    p = 0.3275911
    a1, a2, a3, a4, a5 = 0.254829592, -0.284496736, 1.421413741, -1.453152027, 1.061405429
    ax = jnp.abs(x)
    t = 1.0 / (1.0 + p * ax)
    poly = ((((a5 * t + a4) * t + a3) * t + a2) * t + a1) * t
    y = 1.0 - poly * jnp.exp(-ax * ax)
    return jnp.where(x < 0.0, -y, y)


def _gelu(x):
    return 0.5 * x * (1.0 + _erf(x * 0.7071067811865476))


def _block_diag_mask(n_groups, rows_per_group, cols_per_group):
    """Additive block-diagonal mask built from iota compares only (no vector
    integer div/mod): 0 within a sample's block, -1e30 elsewhere."""
    rows = n_groups * rows_per_group
    cols = n_groups * cols_per_group
    ri = jax.lax.broadcasted_iota(jnp.int32, (rows, cols), 0)
    ci = jax.lax.broadcasted_iota(jnp.int32, (rows, cols), 1)
    keep = ri < 0
    for g in range(n_groups):
        keep = keep | ((ri >= g * rows_per_group) & (ri < (g + 1) * rows_per_group)
                       & (ci >= g * cols_per_group) & (ci < (g + 1) * cols_per_group))
    return jnp.where(keep, 0.0, -1e30).astype(jnp.float32)


# ------------------------------ fused kernel --------------------------------
def _fused_head_kernel(feats_ref, vec_ref, w_ref, head_ref, out_ref, *, batch):
    """Whole 2-layer decoder + merged regression heads, fully resident in VMEM.
    batch / depth / heads are tiny compile-time constants -> static Python loops
    only where they do NOT multiply matmul count (heads, layers)."""
    f32 = jnp.float32
    n_sample, _, hw = feats_ref.shape
    T = NUM_TOKENS
    BT = batch * T
    S = N_VIEWS * hw                                    # keys per sample
    out_rows = out_ref.shape[0]
    scale = DIM_HEAD ** -0.5
    tb = (((1,), (1,)), ((), ()))                       # A @ B.T (contract last dims)

    # ---- constant block-diagonal attention masks (per-sample attention) ----
    self_mask = _block_diag_mask(batch, T, T)           # (BT, BT)
    cross_mask = _block_diag_mask(batch, T, S)          # (BT, batch*S)

    # ---- cross-attn K/V for ALL layers/heads: one lane-dense matmul --------
    # features come in untransposed as (n_sample, C, HW); the 'b n c h w ->
    # b (n h w) c' rearrange is folded into this contraction over C.
    ctx_cols = jnp.concatenate(
        [feats_ref[n * batch + b] for b in range(batch) for n in range(N_VIEWS)],
        axis=1)                                          # (C, batch*S), keys sample-major
    kvT = jnp.dot(w_ref[KV_W_BASE:KV_W_BASE + DEPTH * 2 * INNER, 0:CONTEXT_DIM],
                  ctx_cols, preferred_element_type=f32)  # (DEPTH*2*INNER, batch*S)

    # ---- batch-stacked residual stream (zero-token emb bias + pos emb) -----
    x0 = vec_ref[0:T, 0:DIM]
    x = jnp.concatenate([x0] * batch, axis=0)            # (BT, DIM)

    for l in range(DEPTH):
        vb = NUM_TOKENS + l * LAYER_VEC_ROWS
        wb = l * LAYER_W_ROWS
        kb = l * 2 * INNER

        # ---- self-attention (pre-norm, residual), block-diag over samples ----
        xn = _ln(x, vec_ref[vb + 0:vb + 1, 0:DIM], vec_ref[vb + 1:vb + 2, 0:DIM])
        qkv = jnp.dot(xn, w_ref[wb + QKV_OFF:wb + QKV_OFF + DIM, 0:3 * INNER],
                      preferred_element_type=f32)         # (BT, 96) = [q|k|v], heads h-major
        heads = []
        for h in range(HEADS):
            c0 = h * DIM_HEAD
            q = qkv[:, c0:c0 + DIM_HEAD]
            k = qkv[:, INNER + c0:INNER + c0 + DIM_HEAD]
            v = qkv[:, 2 * INNER + c0:2 * INNER + c0 + DIM_HEAD]
            sc = jax.lax.dot_general(q, k, tb, preferred_element_type=f32) * scale
            heads.append(jnp.dot(_softmax(sc + self_mask), v,
                                 preferred_element_type=f32))
        a = jnp.concatenate(heads, axis=1)                # (BT, INNER)
        x = (x
             + jnp.dot(a, w_ref[wb + SA_OUT_OFF:wb + SA_OUT_OFF + INNER, 0:DIM],
                       preferred_element_type=f32)
             + vec_ref[vb + 2:vb + 3, 0:DIM])

        # ---- cross-attention over the per-sample context (K/V hoisted) -------
        xn = _ln(x, vec_ref[vb + 3:vb + 4, 0:DIM], vec_ref[vb + 4:vb + 5, 0:DIM])
        qa = jnp.dot(xn, w_ref[wb + CAQ_OFF:wb + CAQ_OFF + DIM, 0:INNER],
                     preferred_element_type=f32)          # (BT, INNER)
        heads = []
        for h in range(HEADS):
            c0 = h * DIM_HEAD
            kT = kvT[kb + c0:kb + c0 + DIM_HEAD, :]                   # (dh, batch*S)
            vT = kvT[kb + INNER + c0:kb + INNER + c0 + DIM_HEAD, :]   # (dh, batch*S)
            sc = jnp.dot(qa[:, c0:c0 + DIM_HEAD], kT,
                         preferred_element_type=f32) * scale          # (BT, batch*S)
            p = _softmax(sc + cross_mask)
            heads.append(jax.lax.dot_general(p, vT, tb,
                                             preferred_element_type=f32))
        a = jnp.concatenate(heads, axis=1)                # (BT, INNER)
        x = (x
             + jnp.dot(a, w_ref[wb + CA_OUT_OFF:wb + CA_OUT_OFF + INNER, 0:DIM],
                       preferred_element_type=f32)
             + vec_ref[vb + 5:vb + 6, 0:DIM])

        # ---- feed-forward: Linear -> GELU -> Linear (batch-stacked) ----------
        xn = _ln(x, vec_ref[vb + 6:vb + 7, 0:DIM], vec_ref[vb + 7:vb + 8, 0:DIM])
        h1 = _gelu(jnp.dot(xn, w_ref[wb + FF1_OFF:wb + FF1_OFF + DIM, 0:MLP_DIM],
                           preferred_element_type=f32)
                   + vec_ref[vb + 8:vb + 9, 0:MLP_DIM])
        x = (x
             + jnp.dot(h1, w_ref[wb + FF2_OFF:wb + FF2_OFF + MLP_DIM, 0:DIM],
                       preferred_element_type=f32)
             + vec_ref[vb + 9:vb + 10, 0:DIM])

    # ---- merged regression heads -> one lane-dense (out_rows, 256) block ----
    # token gathers as tiny selection matmuls (iota-built constants, no scatter):
    #   rows [0, batch)     of g1 pick token 1 of each sample     -> pose ++ betas
    #   rows [0, n_sample)  of gc pick tokens 1.. in '(n b)' order -> go ++ cam
    ri = jax.lax.broadcasted_iota(jnp.int32, (out_rows, BT), 0)
    ci = jax.lax.broadcasted_iota(jnp.int32, (out_rows, BT), 1)
    g1_keep = ri < 0
    gc_keep = ri < 0
    for b in range(batch):
        g1_keep = g1_keep | ((ri == b) & (ci == b * T + 1))
        for n in range(N_VIEWS):
            gc_keep = gc_keep | ((ri == n * batch + b) & (ci == b * T + 1 + n))
    g1 = jnp.where(g1_keep, 1.0, 0.0).astype(f32)
    gc = jnp.where(gc_keep, 1.0, 0.0).astype(f32)
    xg1 = jnp.dot(g1, x, preferred_element_type=f32)      # (out_rows, DIM)
    xgc = jnp.dot(gc, x, preferred_element_type=f32)      # (out_rows, DIM)
    # decoder bias + mean-param init folded into the single broadcast bias row.
    out_ref[...] = (jnp.dot(xg1, head_ref[0:DIM, :], preferred_element_type=f32)
                    + jnp.dot(xgc, head_ref[DIM:2 * DIM, :], preferred_element_type=f32)
                    + head_ref[2 * DIM:2 * DIM + 1, :])


def fused_decode(features, packed):
    """features: (n_views*batch, C, H, W) -> (pose++betas, go++cam), pre-rot6d."""
    n_sample, C, H, W = features.shape
    batch = n_sample // N_VIEWS
    # free reshape only — no wrapper transpose / extra HBM round trip; the
    # layout change is folded into the in-kernel K/V contraction.
    feats = features.astype(jnp.float32).reshape(n_sample, C, H * W)
    out_rows = max(8, ((n_sample + 7) // 8) * 8)

    out = pl.pallas_call(
        functools.partial(_fused_head_kernel, batch=batch),
        out_shape=jax.ShapeDtypeStruct((out_rows, OUT_COLS), jnp.float32),
        grid=(1,),
        in_specs=[
            pl.BlockSpec(feats.shape, lambda i: (0, 0, 0)),
            pl.BlockSpec(packed["vec"].shape, lambda i: (0, 0)),
            pl.BlockSpec(packed["wslab"].shape, lambda i: (0, 0)),
            pl.BlockSpec(packed["head"].shape, lambda i: (0, 0)),
        ],
        out_specs=pl.BlockSpec((out_rows, OUT_COLS), lambda i: (0, 0)),
        compiler_params=pltpu.CompilerParams(dimension_semantics=("arbitrary",)),
    )(feats, packed["vec"], packed["wslab"], packed["head"])

    out_t1 = out[:batch, :T1_OUT]                      # pred_body_pose ++ pred_betas
    out_tc = out[:n_sample, TC_COL:TC_COL + TC_OUT]    # pred_go ++ pred_cam, '(n b)' order
    return out_t1, out_tc


# ------------------------------- rot6d -> R ---------------------------------
def rot6d_to_rotmat(x):
    # ProHMR / HMR2 convention: reshape(-1, 2, 3).permute(0, 2, 1)
    # TODO(synk): if the original repo uses the SPIN x.view(-1, 3, 2) convention, adjust here.
    x = x.reshape(-1, 2, 3).transpose(0, 2, 1)               # (N, 3, 2)
    a1, a2 = x[:, :, 0], x[:, :, 1]
    b1 = a1 / jnp.maximum(jnp.linalg.norm(a1, axis=-1, keepdims=True), 1e-12)
    a2p = a2 - jnp.sum(b1 * a2, axis=-1, keepdims=True) * b1
    b2 = a2p / jnp.maximum(jnp.linalg.norm(a2p, axis=-1, keepdims=True), 1e-12)
    b3 = jnp.cross(b1, b2)
    return jnp.stack([b1, b2, b3], axis=-1)                  # (N, 3, 3)


# ------------------------------- head forward -------------------------------
def smpl_head_forward(features, packed):
    n_sample = features.shape[0]
    batch = n_sample // N_VIEWS
    out_t1, out_tc = fused_decode(features, packed)
    pred_body_pose = out_t1[:, :NPOSE]
    pred_betas = out_t1[:, NPOSE:]
    pred_go = out_tc[:, :6]
    pred_cam = out_tc[:, 6:]
    body_rotmat = rot6d_to_rotmat(pred_body_pose).reshape(batch, NUM_BODY_JOINTS, 3, 3)
    go_rotmat = rot6d_to_rotmat(pred_go).reshape(n_sample, 1, 3, 3)
    return body_rotmat, pred_betas, go_rotmat, pred_cam


# ----------------------------- parameter setup ------------------------------
def init_params(key):
    keys = iter(jax.random.split(key, 256))

    def nxt():
        return next(keys)

    def lin(out_dim, in_dim, bias=True, scale=0.02):
        w = jax.random.normal(nxt(), (out_dim, in_dim), jnp.float32) * scale
        b = jax.random.normal(nxt(), (out_dim,), jnp.float32) * 0.01 if bias else None
        return w, b

    layers = []
    for _ in range(DEPTH):
        qkv_w, _ = lin(3 * INNER, DIM, bias=False)
        sa_out_w, sa_out_b = lin(DIM, INNER)
        q_w, _ = lin(INNER, DIM, bias=False)
        kv_w, _ = lin(2 * INNER, CONTEXT_DIM, bias=False)
        ca_out_w, ca_out_b = lin(DIM, INNER)
        w1, b1 = lin(MLP_DIM, DIM)
        w2, b2 = lin(DIM, MLP_DIM)
        layers.append({
            "sa": {"ln_g": jnp.ones((DIM,), jnp.float32),
                   "ln_b": jnp.zeros((DIM,), jnp.float32),
                   "qkv_w": qkv_w, "out_w": sa_out_w, "out_b": sa_out_b},
            "ca": {"ln_g": jnp.ones((DIM,), jnp.float32),
                   "ln_b": jnp.zeros((DIM,), jnp.float32),
                   "q_w": q_w, "kv_w": kv_w, "out_w": ca_out_w, "out_b": ca_out_b},
            "ff": {"ln_g": jnp.ones((DIM,), jnp.float32),
                   "ln_b": jnp.zeros((DIM,), jnp.float32),
                   "w1": w1, "b1": b1, "w2": w2, "b2": b2},
        })

    emb_w, emb_b = lin(DIM, TOKEN_DIM)        # emb_w is dead under the zero-token input
    pos_emb = jax.random.normal(nxt(), (1, NUM_TOKENS, DIM), jnp.float32) * 0.02

    decpose_w, decpose_b = lin(NPOSE, DIM, scale=0.01)
    decgo_w, decgo_b = lin(6, DIM, scale=0.01)
    decshape_w, decshape_b = lin(10, DIM, scale=0.01)
    deccam_w, deccam_b = lin(3, DIM, scale=0.01)

    # synthetic "mean params" buffers (deterministic; stand-in for the .npz load)
    init_pose = jax.random.normal(nxt(), (1, 6 + NPOSE), jnp.float32) * 0.1
    init_betas = jax.random.normal(nxt(), (1, 10), jnp.float32) * 0.1
    init_cam = jnp.array([[0.9, 0.0, 0.0]], jnp.float32)

    return {
        "transformer": {"emb_w": emb_w, "emb_b": emb_b,
                        "pos_emb": pos_emb, "layers": layers},
        "decpose_w": decpose_w, "decpose_b": decpose_b,
        "decgo_w": decgo_w, "decgo_b": decgo_b,
        "decshape_w": decshape_w, "decshape_b": decshape_b,
        "deccam_w": deccam_w, "deccam_b": deccam_b,
        "init_global_orientation": init_pose[:, :6],
        "init_body_pose": init_pose[:, 6:],
        "init_betas": init_betas,
        "init_cam": init_cam,
    }


def prepare_packed_params(params):
    """One-time packing into 3 lane-aligned f32 slabs:
      vec   (24, 128):  x0 (zero-token emb bias + pos emb) + all LN gains/biases
                        and residual biases, one row each.
      wslab (896, 128): all projection weights, transposed to (K, N) with heads
                        h-major; the cross-attn K/V weights of every layer are
                        stored untransposed at the tail so one matmul against
                        the raw (C, HW) feature tiles yields kT/vT for all layers.
      head  (136, 256): merged regression-head weights (pose++betas in cols
                        0:148, go++cam in cols 160:169) + one bias row with the
                        decoder bias and mean-param init folded in (IEF_ITERS==1)."""
    tr = params["transformer"]
    f32 = jnp.float32

    vec = jnp.zeros((VEC_ROWS, 128), f32)
    x0 = (tr["pos_emb"][0, :NUM_TOKENS] + tr["emb_b"][None, :]).astype(f32)
    vec = vec.at[0:NUM_TOKENS, 0:DIM].set(x0)

    wslab = jnp.zeros((W_ROWS, 128), f32)
    for l, lp in enumerate(tr["layers"]):
        sa, ca, ff = lp["sa"], lp["ca"], lp["ff"]
        vb = NUM_TOKENS + l * LAYER_VEC_ROWS
        vec = vec.at[vb + 0, 0:DIM].set(sa["ln_g"])
        vec = vec.at[vb + 1, 0:DIM].set(sa["ln_b"])
        vec = vec.at[vb + 2, 0:DIM].set(sa["out_b"])
        vec = vec.at[vb + 3, 0:DIM].set(ca["ln_g"])
        vec = vec.at[vb + 4, 0:DIM].set(ca["ln_b"])
        vec = vec.at[vb + 5, 0:DIM].set(ca["out_b"])
        vec = vec.at[vb + 6, 0:DIM].set(ff["ln_g"])
        vec = vec.at[vb + 7, 0:DIM].set(ff["ln_b"])
        vec = vec.at[vb + 8, 0:MLP_DIM].set(ff["b1"])
        vec = vec.at[vb + 9, 0:DIM].set(ff["b2"])

        wb = l * LAYER_W_ROWS
        wslab = wslab.at[wb + QKV_OFF:wb + QKV_OFF + DIM, 0:3 * INNER].set(sa["qkv_w"].T)
        wslab = wslab.at[wb + SA_OUT_OFF:wb + SA_OUT_OFF + INNER, 0:DIM].set(sa["out_w"].T)
        wslab = wslab.at[wb + CAQ_OFF:wb + CAQ_OFF + DIM, 0:INNER].set(ca["q_w"].T)
        wslab = wslab.at[wb + CA_OUT_OFF:wb + CA_OUT_OFF + INNER, 0:DIM].set(ca["out_w"].T)
        wslab = wslab.at[wb + FF1_OFF:wb + FF1_OFF + DIM, 0:MLP_DIM].set(ff["w1"].T)
        wslab = wslab.at[wb + FF2_OFF:wb + FF2_OFF + MLP_DIM, 0:DIM].set(ff["w2"].T)
        # hoisted K/V weights: torch (2*inner, C) rows are already ordered
        # [k_h0, k_h1, v_h0, v_h1]; used untransposed as the kT/vT producer.
        kvb = KV_W_BASE + l * 2 * INNER
        wslab = wslab.at[kvb:kvb + 2 * INNER, 0:CONTEXT_DIM].set(ca["kv_w"])

    head = jnp.zeros((HEAD_ROWS, OUT_COLS), f32)
    head = head.at[0:DIM, 0:NPOSE].set(params["decpose_w"].T)
    head = head.at[0:DIM, NPOSE:T1_OUT].set(params["decshape_w"].T)
    head = head.at[DIM:2 * DIM, TC_COL:TC_COL + 6].set(params["decgo_w"].T)
    head = head.at[DIM:2 * DIM, TC_COL + 6:TC_COL + TC_OUT].set(params["deccam_w"].T)
    b_t1 = (jnp.concatenate([params["decpose_b"], params["decshape_b"]])
            + jnp.concatenate([params["init_body_pose"][0], params["init_betas"][0]]))
    b_tc = (jnp.concatenate([params["decgo_b"], params["deccam_b"]])
            + jnp.concatenate([params["init_global_orientation"][0],
                               params["init_cam"][0]]))
    head = head.at[2 * DIM, 0:T1_OUT].set(b_t1)
    head = head.at[2 * DIM, TC_COL:TC_COL + TC_OUT].set(b_tc)

    return {"vec": vec.astype(f32), "wslab": wslab.astype(f32), "head": head.astype(f32)}


# -------------------- pure-JAX reference (cross-check only) ------------------
def reference_pre_rot6d(features, params):
    n_sample, C, H, W = features.shape
    batch = n_sample // N_VIEWS
    f = features.reshape(N_VIEWS, batch, C, H, W)
    ctx = f.transpose(1, 0, 3, 4, 2).reshape(batch, N_VIEWS * H * W, C)
    tr = params["transformer"]

    def ln(x, g, b):
        mu = x.mean(-1, keepdims=True)
        var = ((x - mu) ** 2).mean(-1, keepdims=True)
        return (x - mu) / jnp.sqrt(var + LN_EPS) * g + b

    def split_heads(t):
        B, T, _ = t.shape
        return t.reshape(B, T, HEADS, DIM_HEAD).transpose(0, 2, 1, 3)

    def merge_heads(t):
        B, Hh, T, dh = t.shape
        return t.transpose(0, 2, 1, 3).reshape(B, T, Hh * dh)

    def attn(q, k, v):
        s = jnp.einsum('bhtd,bhsd->bhts', q, k) * DIM_HEAD ** -0.5
        return jnp.einsum('bhts,bhsd->bhtd', jax.nn.softmax(s, axis=-1), v)

    token = jnp.zeros((batch, NUM_TOKENS, TOKEN_DIM), jnp.float32)
    x = token @ tr["emb_w"].T + tr["emb_b"] + tr["pos_emb"][:, :NUM_TOKENS]
    for lp in tr["layers"]:
        p = lp["sa"]
        xn = ln(x, p["ln_g"], p["ln_b"])
        q, k, v = jnp.split(xn @ p["qkv_w"].T, 3, axis=-1)
        o = merge_heads(attn(split_heads(q), split_heads(k), split_heads(v)))
        x = o @ p["out_w"].T + p["out_b"] + x
        p = lp["ca"]
        xn = ln(x, p["ln_g"], p["ln_b"])
        q = xn @ p["q_w"].T
        k, v = jnp.split(ctx @ p["kv_w"].T, 2, axis=-1)
        o = merge_heads(attn(split_heads(q), split_heads(k), split_heads(v)))
        x = o @ p["out_w"].T + p["out_b"] + x
        p = lp["ff"]
        xn = ln(x, p["ln_g"], p["ln_b"])
        h1 = jax.nn.gelu(xn @ p["w1"].T + p["b1"], approximate=False)
        x = h1 @ p["w2"].T + p["b2"] + x
    t1 = x[:, 1]
    pose = t1 @ params["decpose_w"].T + params["decpose_b"] + params["init_body_pose"]
    betas = t1 @ params["decshape_w"].T + params["decshape_b"] + params["init_betas"]
    tcam = x[:, 1:].transpose(1, 0, 2).reshape(n_sample, DIM)
    go = tcam @ params["decgo_w"].T + params["decgo_b"] + params["init_global_orientation"]
    cam = tcam @ params["deccam_w"].T + params["deccam_b"] + params["init_cam"]
    return pose, betas, go, cam


# ---------------------------------- main ------------------------------------
if __name__ == "__main__":
    root = jax.random.PRNGKey(0)
    pkey, fkey = jax.random.split(root)
    params = init_params(pkey)
    packed = prepare_packed_params(params)      # one-time transpose / slab packing

    batch = 2
    n_sample = N_VIEWS * batch
    H = W = 8
    features = jax.random.normal(fkey, (n_sample, CONTEXT_DIM, H, W), jnp.float32)

    fwd = jax.jit(smpl_head_forward)
    body_rotmat, betas, go_rotmat, cam = fwd(features, packed)
    jax.block_until_ready((body_rotmat, betas, go_rotmat, cam))

    assert body_rotmat.shape == (batch, NUM_BODY_JOINTS, 3, 3)
    assert betas.shape == (batch, 10)
    assert go_rotmat.shape == (n_sample, 1, 3, 3)
    assert cam.shape == (n_sample, 3)
    assert bool(jnp.all(jnp.isfinite(body_rotmat)))

    # numerical cross-check of the fused kernel against a pure-JAX reference
    out_t1, out_tc = jax.jit(fused_decode)(features, packed)
    r_pose, r_betas, r_go, r_cam = reference_pre_rot6d(features, params)
    err = max(
        float(jnp.max(jnp.abs(out_t1 - jnp.concatenate([r_pose, r_betas], axis=-1)))),
        float(jnp.max(jnp.abs(out_tc - jnp.concatenate([r_go, r_cam], axis=-1)))),
    )
    assert err < 1e-3, f"fused kernel mismatch vs reference: max|diff|={err}"

    print("KERNEL_OK")
</pallas_src>

<mosaic_0001>
module attributes {stable_mosaic.version = 11 : i64} {
  func.func @_fused_head_kernel(%arg0: i32, %arg1: memref<4x32x64xf32, #tpu.memory_space<vmem>>, %arg2: memref<24x128xf32, #tpu.memory_space<vmem>>, %arg3: memref<896x128xf32, #tpu.memory_space<vmem>>, %arg4: memref<136x256xf32, #tpu.memory_space<vmem>>, %arg5: memref<8x256xf32, #tpu.memory_space<vmem>>) attributes {dimension_semantics = [#tpu.dimension_semantics<arbitrary>], iteration_bounds = array<i64: 1>, scalar_prefetch = 0 : i64, scratch_operands = 0 : i64, tpu.core_type = #tpu.core_type<tc>, window_params = [{pipeline_mode = #tpu.pipeline_mode<synchronous>, transform_indices = @transform_0, window_bounds = array<i64: 4, 32, 64>}, {pipeline_mode = #tpu.pipeline_mode<synchronous>, transform_indices = @transform_1, window_bounds = array<i64: 24, 128>}, {pipeline_mode = #tpu.pipeline_mode<synchronous>, transform_indices = @transform_2, window_bounds = array<i64: 896, 128>}, {pipeline_mode = #tpu.pipeline_mode<synchronous>, transform_indices = @transform_3, window_bounds = array<i64: 136, 256>}, {pipeline_mode = #tpu.pipeline_mode<synchronous>, transform_indices = @transform_4, window_bounds = array<i64: 8, 256>}]} {
    %0 = tpu.iota {dimensions = array<i32: 0>} : vector<6x6xi32>
    %1 = tpu.iota {dimensions = array<i32: 1>} : vector<6x6xi32>
    %c0_i32 = arith.constant 0 : i32
    %2 = vector.broadcast %c0_i32 : i32 to vector<6x6xi32>
    %3 = arith.cmpi slt, %0, %2 : vector<6x6xi32>
    %c0_i32_0 = arith.constant 0 : i32
    %4 = vector.broadcast %c0_i32_0 : i32 to vector<6x6xi32>
    %5 = arith.cmpi sge, %0, %4 : vector<6x6xi32>
    %c3_i32 = arith.constant 3 : i32
    %6 = vector.broadcast %c3_i32 : i32 to vector<6x6xi32>
    %7 = arith.cmpi slt, %0, %6 : vector<6x6xi32>
    %8 = arith.andi %5, %7 : vector<6x6xi1>
    %c0_i32_1 = arith.constant 0 : i32
    %9 = vector.broadcast %c0_i32_1 : i32 to vector<6x6xi32>
    %10 = arith.cmpi sge, %1, %9 : vector<6x6xi32>
    %11 = arith.andi %8, %10 : vector<6x6xi1>
    %c3_i32_2 = arith.constant 3 : i32
    %12 = vector.broadcast %c3_i32_2 : i32 to vector<6x6xi32>
    %13 = arith.cmpi slt, %1, %12 : vector<6x6xi32>
    %14 = arith.andi %11, %13 : vector<6x6xi1>
    %15 = arith.ori %3, %14 : vector<6x6xi1>
    %c3_i32_3 = arith.constant 3 : i32
    %16 = vector.broadcast %c3_i32_3 : i32 to vector<6x6xi32>
    %17 = arith.cmpi sge, %0, %16 : vector<6x6xi32>
    %c6_i32 = arith.constant 6 : i32
    %18 = vector.broadcast %c6_i32 : i32 to vector<6x6xi32>
    %19 = arith.cmpi slt, %0, %18 : vector<6x6xi32>
    %20 = arith.andi %17, %19 : vector<6x6xi1>
    %c3_i32_4 = arith.constant 3 : i32
    %21 = vector.broadcast %c3_i32_4 : i32 to vector<6x6xi32>
    %22 = arith.cmpi sge, %1, %21 : vector<6x6xi32>
    %23 = arith.andi %20, %22 : vector<6x6xi1>
    %c6_i32_5 = arith.constant 6 : i32
    %24 = vector.broadcast %c6_i32_5 : i32 to vector<6x6xi32>
    %25 = arith.cmpi slt, %1, %24 : vector<6x6xi32>
    %26 = arith.andi %23, %25 : vector<6x6xi1>
    %27 = arith.ori %15, %26 : vector<6x6xi1>
    %cst = arith.constant 0.000000e+00 : f32
    %cst_6 = arith.constant -1.000000e+30 : f32
    %28 = vector.broadcast %cst : f32 to vector<6x6xf32>
    %29 = vector.broadcast %cst_6 : f32 to vector<6x6xf32>
    %30 = arith.select %27, %28, %29 : vector<6x6xi1>, vector<6x6xf32>
    %31 = tpu.iota {dimensions = array<i32: 0>} : vector<6x256xi32>
    %32 = tpu.iota {dimensions = array<i32: 1>} : vector<6x256xi32>
    %c0_i32_7 = arith.constant 0 : i32
    %33 = vector.broadcast %c0_i32_7 : i32 to vector<6x256xi32>
    %34 = arith.cmpi slt, %31, %33 : vector<6x256xi32>
    %c0_i32_8 = arith.constant 0 : i32
    %35 = vector.broadcast %c0_i32_8 : i32 to vector<6x256xi32>
    %36 = arith.cmpi sge, %31, %35 : vector<6x256xi32>
    %c3_i32_9 = arith.constant 3 : i32
    %37 = vector.broadcast %c3_i32_9 : i32 to vector<6x256xi32>
    %38 = arith.cmpi slt, %31, %37 : vector<6x256xi32>
    %39 = arith.andi %36, %38 : vector<6x256xi1>
    %c0_i32_10 = arith.constant 0 : i32
    %40 = vector.broadcast %c0_i32_10 : i32 to vector<6x256xi32>
    %41 = arith.cmpi sge, %32, %40 : vector<6x256xi32>
    %42 = arith.andi %39, %41 : vector<6x256xi1>
    %c128_i32 = arith.constant 128 : i32
    %43 = vector.broadcast %c128_i32 : i32 to vector<6x256xi32>
    %44 = arith.cmpi slt, %32, %43 : vector<6x256xi32>
    %45 = arith.andi %42, %44 : vector<6x256xi1>
    %46 = arith.ori %34, %45 : vector<6x256xi1>
    %c3_i32_11 = arith.constant 3 : i32
    %47 = vector.broadcast %c3_i32_11 : i32 to vector<6x256xi32>
    %48 = arith.cmpi sge, %31, %47 : vector<6x256xi32>
    %c6_i32_12 = arith.constant 6 : i32
    %49 = vector.broadcast %c6_i32_12 : i32 to vector<6x256xi32>
    %50 = arith.cmpi slt, %31, %49 : vector<6x256xi32>
    %51 = arith.andi %48, %50 : vector<6x256xi1>
    %c128_i32_13 = arith.constant 128 : i32
    %52 = vector.broadcast %c128_i32_13 : i32 to vector<6x256xi32>
    %53 = arith.cmpi sge, %32, %52 : vector<6x256xi32>
    %54 = arith.andi %51, %53 : vector<6x256xi1>
    %c256_i32 = arith.constant 256 : i32
    %55 = vector.broadcast %c256_i32 : i32 to vector<6x256xi32>
    %56 = arith.cmpi slt, %32, %55 : vector<6x256xi32>
    %57 = arith.andi %54, %56 : vector<6x256xi1>
    %58 = arith.ori %46, %57 : vector<6x256xi1>
    %cst_14 = arith.constant 0.000000e+00 : f32
    %cst_15 = arith.constant -1.000000e+30 : f32
    %59 = vector.broadcast %cst_14 : f32 to vector<6x256xf32>
    %60 = vector.broadcast %cst_15 : f32 to vector<6x256xf32>
    %61 = arith.select %58, %59, %60 : vector<6x256xi1>, vector<6x256xf32>
    %c0 = arith.constant 0 : index
    %c0_16 = arith.constant 0 : index
    %c0_17 = arith.constant 0 : index
    %62 = vector.load %arg1[%c0, %c0_16, %c0_17] : memref<4x32x64xf32, #tpu.memory_space<vmem>>, vector<1x32x64xf32>
    %63 = vector.shape_cast %62 : vector<1x32x64xf32> to vector<32x64xf32>
    %c2 = arith.constant 2 : index
    %c0_18 = arith.constant 0 : index
    %c0_19 = arith.constant 0 : index
    %64 = vector.load %arg1[%c2, %c0_18, %c0_19] : memref<4x32x64xf32, #tpu.memory_space<vmem>>, vector<1x32x64xf32>
    %65 = vector.shape_cast %64 : vector<1x32x64xf32> to vector<32x64xf32>
    %c1 = arith.constant 1 : index
    %c0_20 = arith.constant 0 : index
    %c0_21 = arith.constant 0 : index
    %66 = vector.load %arg1[%c1, %c0_20, %c0_21] : memref<4x32x64xf32, #tpu.memory_space<vmem>>, vector<1x32x64xf32>
    %67 = vector.shape_cast %66 : vector<1x32x64xf32> to vector<32x64xf32>
    %c3 = arith.constant 3 : index
    %c0_22 = arith.constant 0 : index
    %c0_23 = arith.constant 0 : index
    %68 = vector.load %arg1[%c3, %c0_22, %c0_23] : memref<4x32x64xf32, #tpu.memory_space<vmem>>, vector<1x32x64xf32>
    %69 = vector.shape_cast %68 : vector<1x32x64xf32> to vector<32x64xf32>
    %70 = tpu.concatenate %63, %65, %67, %69 in 1 : vector<32x64xf32>, vector<32x64xf32>, vector<32x64xf32>, vector<32x64xf32> -> vector<32x256xf32>
    %c768 = arith.constant 768 : index
    %c0_24 = arith.constant 0 : index
    %71 = vector.load %arg3[%c768, %c0_24] : memref<896x128xf32, #tpu.memory_space<vmem>>, vector<128x32xf32>
    %cst_25 = arith.constant dense<0.000000e+00> : vector<128x256xf32>
    %72 = tpu.matmul %71, %70, %cst_25 {dimension_numbers = #tpu.dot_dimension_numbers<[1], [0], [0], [1], [0, 0, 1, 1], [], []>} : vector<128x32xf32>, vector<32x256xf32>, vector<128x256xf32> -> vector<128x256xf32>
    %c0_26 = arith.constant 0 : index
    %c0_27 = arith.constant 0 : index
    %73 = vector.load %arg2[%c0_26, %c0_27] : memref<24x128xf32, #tpu.memory_space<vmem>>, vector<3x64xf32>
    %74 = tpu.concatenate %73, %73 in 0 : vector<3x64xf32>, vector<3x64xf32> -> vector<6x64xf32>
    %c3_28 = arith.constant 3 : index
    %c0_29 = arith.constant 0 : index
    %75 = vector.load %arg2[%c3_28, %c0_29] : memref<24x128xf32, #tpu.memory_space<vmem>>, vector<1x64xf32>
    %c4 = arith.constant 4 : index
    %c0_30 = arith.constant 0 : index
    %76 = vector.load %arg2[%c4, %c0_30] : memref<24x128xf32, #tpu.memory_space<vmem>>, vector<1x64xf32>
    %cst_31 = arith.constant dense<0.000000e+00> : vector<6xf32>
    %77 = vector.multi_reduction <add>, %74, %cst_31 [1] : vector<6x64xf32> to vector<6xf32>
    %78 = vector.shape_cast %77 : vector<6xf32> to vector<6x1xf32>
    %cst_32 = arith.constant 6.400000e+01 : f32
    %79 = vector.broadcast %cst_32 : f32 to vector<6x1xf32>
    %80 = arith.divf %78, %79 : vector<6x1xf32>
    %81 = vector.broadcast %80 : vector<6x1xf32> to vector<6x64xf32>
    %82 = arith.subf %74, %81 : vector<6x64xf32>
    %83 = arith.mulf %82, %82 : vector<6x64xf32>
    %cst_33 = arith.constant dense<0.000000e+00> : vector<6xf32>
    %84 = vector.multi_reduction <add>, %83, %cst_33 [1] : vector<6x64xf32> to vector<6xf32>
    %85 = vector.shape_cast %84 : vector<6xf32> to vector<6x1xf32>
    %cst_34 = arith.constant 6.400000e+01 : f32
    %86 = vector.broadcast %cst_34 : f32 to vector<6x1xf32>
    %87 = arith.divf %85, %86 : vector<6x1xf32>
    %cst_35 = arith.constant 9.99999974E-6 : f32
    %88 = vector.broadcast %cst_35 : f32 to vector<6x1xf32>
    %89 = arith.addf %87, %88 : vector<6x1xf32>
    %90 = math.rsqrt %89 : vector<6x1xf32>
    %91 = vector.broadcast %90 : vector<6x1xf32> to vector<6x64xf32>
    %92 = arith.mulf %82, %91 : vector<6x64xf32>
    %93 = vector.broadcast %75 : vector<1x64xf32> to vector<6x64xf32>
    %94 = arith.mulf %92, %93 : vector<6x64xf32>
    %95 = vector.broadcast %76 : vector<1x64xf32> to vector<6x64xf32>
    %96 = arith.addf %94, %95 : vector<6x64xf32>
    %c0_36 = arith.constant 0 : index
    %c0_37 = arith.constant 0 : index
    %97 = vector.load %arg3[%c0_36, %c0_37] : memref<896x128xf32, #tpu.memory_space<vmem>>, vector<64x96xf32>
    %cst_38 = arith.constant dense<0.000000e+00> : vector<6x96xf32>
    %98 = tpu.matmul %96, %97, %cst_38 {dimension_numbers = #tpu.dot_dimension_numbers<[1], [0], [0], [1], [0, 0, 1, 1], [], []>} : vector<6x64xf32>, vector<64x96xf32>, vector<6x96xf32> -> vector<6x96xf32>
    %99 = vector.extract_strided_slice %98 {offsets = [0, 0], sizes = [6, 16], strides = [1, 1]} : vector<6x96xf32> to vector<6x16xf32>
    %100 = vector.extract_strided_slice %98 {offsets = [0, 32], sizes = [6, 16], strides = [1, 1]} : vector<6x96xf32> to vector<6x16xf32>
    %101 = vector.extract_strided_slice %98 {offsets = [0, 64], sizes = [6, 16], strides = [1, 1]} : vector<6x96xf32> to vector<6x16xf32>
    %cst_39 = arith.constant dense<0.000000e+00> : vector<6x6xf32>
    %102 = tpu.matmul %99, %100, %cst_39 {dimension_numbers = #tpu.dot_dimension_numbers<[1], [1], [0], [0], [0, 0, 1, 0], [], []>} : vector<6x16xf32>, vector<6x16xf32>, vector<6x6xf32> -> vector<6x6xf32>
    %cst_40 = arith.constant 2.500000e-01 : f32
    %103 = vector.broadcast %cst_40 : f32 to vector<6x6xf32>
    %104 = arith.mulf %102, %103 : vector<6x6xf32>
    %105 = arith.addf %104, %30 : vector<6x6xf32>
    %cst_41 = arith.constant dense<0xFF800000> : vector<6xf32>
    %106 = vector.multi_reduction <maximumf>, %105, %cst_41 [1] : vector<6x6xf32> to vector<6xf32>
    %107 = vector.shape_cast %106 : vector<6xf32> to vector<6x1xf32>
    %108 = vector.broadcast %107 : vector<6x1xf32> to vector<6x6xf32>
    %109 = arith.subf %105, %108 : vector<6x6xf32>
    %110 = math.exp %109 : vector<6x6xf32>
    %cst_42 = arith.constant dense<0.000000e+00> : vector<6xf32>
    %111 = vector.multi_reduction <add>, %110, %cst_42 [1] : vector<6x6xf32> to vector<6xf32>
    %112 = vector.shape_cast %111 : vector<6xf32> to vector<6x1xf32>
    %113 = tpu.reciprocal %112 {approx = true} : vector<6x1xf32> -> vector<6x1xf32>
    %114 = vector.broadcast %113 : vector<6x1xf32> to vector<6x6xf32>
    %115 = arith.mulf %110, %114 : vector<6x6xf32>
    %cst_43 = arith.constant dense<0.000000e+00> : vector<6x16xf32>
    %116 = tpu.matmul %115, %101, %cst_43 {dimension_numbers = #tpu.dot_dimension_numbers<[1], [0], [0], [1], [0, 0, 1, 1], [], []>} : vector<6x6xf32>, vector<6x16xf32>, vector<6x16xf32> -> vector<6x16xf32>
    %117 = vector.extract_strided_slice %98 {offsets = [0, 16], sizes = [6, 16], strides = [1, 1]} : vector<6x96xf32> to vector<6x16xf32>
    %118 = vector.extract_strided_slice %98 {offsets = [0, 48], sizes = [6, 16], strides = [1, 1]} : vector<6x96xf32> to vector<6x16xf32>
    %119 = vector.extract_strided_slice %98 {offsets = [0, 80], sizes = [6, 16], strides = [1, 1]} : vector<6x96xf32> to vector<6x16xf32>
    %cst_44 = arith.constant dense<0.000000e+00> : vector<6x6xf32>
    %120 = tpu.matmul %117, %118, %cst_44 {dimension_numbers = #tpu.dot_dimension_numbers<[1], [1], [0], [0], [0, 0, 1, 0], [], []>} : vector<6x16xf32>, vector<6x16xf32>, vector<6x6xf32> -> vector<6x6xf32>
    %cst_45 = arith.constant 2.500000e-01 : f32
    %121 = vector.broadcast %cst_45 : f32 to vector<6x6xf32>
    %122 = arith.mulf %120, %121 : vector<6x6xf32>
    %123 = arith.addf %122, %30 : vector<6x6xf32>
    %cst_46 = arith.constant dense<0xFF800000> : vector<6xf32>
    %124 = vector.multi_reduction <maximumf>, %123, %cst_46 [1] : vector<6x6xf32> to vector<6xf32>
    %125 = vector.shape_cast %124 : vector<6xf32> to vector<6x1xf32>
    %126 = vector.broadcast %125 : vector<6x1xf32> to vector<6x6xf32>
    %127 = arith.subf %123, %126 : vector<6x6xf32>
    %128 = math.exp %127 : vector<6x6xf32>
    %cst_47 = arith.constant dense<0.000000e+00> : vector<6xf32>
    %129 = vector.multi_reduction <add>, %128, %cst_47 [1] : vector<6x6xf32> to vector<6xf32>
    %130 = vector.shape_cast %129 : vector<6xf32> to vector<6x1xf32>
    %131 = tpu.reciprocal %130 {approx = true} : vector<6x1xf32> -> vector<6x1xf32>
    %132 = vector.broadcast %131 : vector<6x1xf32> to vector<6x6xf32>
    %133 = arith.mulf %128, %132 : vector<6x6xf32>
    %cst_48 = arith.constant dense<0.000000e+00> : vector<6x16xf32>
    %134 = tpu.matmul %133, %119, %cst_48 {dimension_numbers = #tpu.dot_dimension_numbers<[1], [0], [0], [1], [0, 0, 1, 1], [], []>} : vector<6x6xf32>, vector<6x16xf32>, vector<6x16xf32> -> vector<6x16xf32>
    %135 = tpu.concatenate %116, %134 in 1 : vector<6x16xf32>, vector<6x16xf32> -> vector<6x32xf32>
    %c64 = arith.constant 64 : index
    %c0_49 = arith.constant 0 : index
    %136 = vector.load %arg3[%c64, %c0_49] : memref<896x128xf32, #tpu.memory_space<vmem>>, vector<32x64xf32>
    %cst_50 = arith.constant dense<0.000000e+00> : vector<6x64xf32>
    %137 = tpu.matmul %135, %136, %cst_50 {dimension_numbers = #tpu.dot_dimension_numbers<[1], [0], [0], [1], [0, 0, 1, 1], [], []>} : vector<6x32xf32>, vector<32x64xf32>, vector<6x64xf32> -> vector<6x64xf32>
    %138 = arith.addf %74, %137 : vector<6x64xf32>
    %c5 = arith.constant 5 : index
    %c0_51 = arith.constant 0 : index
    %139 = vector.load %arg2[%c5, %c0_51] : memref<24x128xf32, #tpu.memory_space<vmem>>, vector<1x64xf32>
    %140 = vector.broadcast %139 : vector<1x64xf32> to vector<6x64xf32>
    %141 = arith.addf %138, %140 : vector<6x64xf32>
    %c6 = arith.constant 6 : index
    %c0_52 = arith.constant 0 : index
    %142 = vector.load %arg2[%c6, %c0_52] : memref<24x128xf32, #tpu.memory_space<vmem>>, vector<1x64xf32>
    %c7 = arith.constant 7 : index
    %c0_53 = arith.constant 0 : index
    %143 = vector.load %arg2[%c7, %c0_53] : memref<24x128xf32, #tpu.memory_space<vmem>>, vector<1x64xf32>
    %cst_54 = arith.constant dense<0.000000e+00> : vector<6xf32>
    %144 = vector.multi_reduction <add>, %141, %cst_54 [1] : vector<6x64xf32> to vector<6xf32>
    %145 = vector.shape_cast %144 : vector<6xf32> to vector<6x1xf32>
    %cst_55 = arith.constant 6.400000e+01 : f32
    %146 = vector.broadcast %cst_55 : f32 to vector<6x1xf32>
    %147 = arith.divf %145, %146 : vector<6x1xf32>
    %148 = vector.broadcast %147 : vector<6x1xf32> to vector<6x64xf32>
    %149 = arith.subf %141, %148 : vector<6x64xf32>
    %150 = arith.mulf %149, %149 : vector<6x64xf32>
    %cst_56 = arith.constant dense<0.000000e+00> : vector<6xf32>
    %151 = vector.multi_reduction <add>, %150, %cst_56 [1] : vector<6x64xf32> to vector<6xf32>
    %152 = vector.shape_cast %151 : vector<6xf32> to vector<6x1xf32>
    %cst_57 = arith.constant 6.400000e+01 : f32
    %153 = vector.broadcast %cst_57 : f32 to vector<6x1xf32>
    %154 = arith.divf %152, %153 : vector<6x1xf32>
    %cst_58 = arith.constant 9.99999974E-6 : f32
    %155 = vector.broadcast %cst_58 : f32 to vector<6x1xf32>
    %156 = arith.addf %154, %155 : vector<6x1xf32>
    %157 = math.rsqrt %156 : vector<6x1xf32>
    %158 = vector.broadcast %157 : vector<6x1xf32> to vector<6x64xf32>
    %159 = arith.mulf %149, %158 : vector<6x64xf32>
    %160 = vector.broadcast %142 : vector<1x64xf32> to vector<6x64xf32>
    %161 = arith.mulf %159, %160 : vector<6x64xf32>
    %162 = vector.broadcast %143 : vector<1x64xf32> to vector<6x64xf32>
    %163 = arith.addf %161, %162 : vector<6x64xf32>
    %c96 = arith.constant 96 : index
    %c0_59 = arith.constant 0 : index
    %164 = vector.load %arg3[%c96, %c0_59] : memref<896x128xf32, #tpu.memory_space<vmem>>, vector<64x32xf32>
    %cst_60 = arith.constant dense<0.000000e+00> : vector<6x32xf32>
    %165 = tpu.matmul %163, %164, %cst_60 {dimension_numbers = #tpu.dot_dimension_numbers<[1], [0], [0], [1], [0, 0, 1, 1], [], []>} : vector<6x64xf32>, vector<64x32xf32>, vector<6x32xf32> -> vector<6x32xf32>
    %166 = vector.extract_strided_slice %72 {offsets = [0, 0], sizes = [16, 256], strides = [1, 1]} : vector<128x256xf32> to vector<16x256xf32>
    %167 = vector.extract_strided_slice %72 {offsets = [32, 0], sizes = [16, 256], strides = [1, 1]} : vector<128x256xf32> to vector<16x256xf32>
    %168 = vector.extract_strided_slice %165 {offsets = [0, 0], sizes = [6, 16], strides = [1, 1]} : vector<6x32xf32> to vector<6x16xf32>
    %cst_61 = arith.constant dense<0.000000e+00> : vector<6x256xf32>
    %169 = tpu.matmul %168, %166, %cst_61 {dimension_numbers = #tpu.dot_dimension_numbers<[1], [0], [0], [1], [0, 0, 1, 1], [], []>} : vector<6x16xf32>, vector<16x256xf32>, vector<6x256xf32> -> vector<6x256xf32>
    %cst_62 = arith.constant 2.500000e-01 : f32
    %170 = vector.broadcast %cst_62 : f32 to vector<6x256xf32>
    %171 = arith.mulf %169, %170 : vector<6x256xf32>
    %172 = arith.addf %171, %61 : vector<6x256xf32>
    %cst_63 = arith.constant dense<0xFF800000> : vector<6xf32>
    %173 = vector.multi_reduction <maximumf>, %172, %cst_63 [1] : vector<6x256xf32> to vector<6xf32>
    %174 = vector.shape_cast %173 : vector<6xf32> to vector<6x1xf32>
    %175 = vector.broadcast %174 : vector<6x1xf32> to vector<6x256xf32>
    %176 = arith.subf %172, %175 : vector<6x256xf32>
    %177 = math.exp %176 : vector<6x256xf32>
    %cst_64 = arith.constant dense<0.000000e+00> : vector<6xf32>
    %178 = vector.multi_reduction <add>, %177, %cst_64 [1] : vector<6x256xf32> to vector<6xf32>
    %179 = vector.shape_cast %178 : vector<6xf32> to vector<6x1xf32>
    %180 = tpu.reciprocal %179 {approx = true} : vector<6x1xf32> -> vector<6x1xf32>
    %181 = vector.broadcast %180 : vector<6x1xf32> to vector<6x256xf32>
    %182 = arith.mulf %177, %181 : vector<6x256xf32>
    %cst_65 = arith.constant dense<0.000000e+00> : vector<6x16xf32>
    %183 = tpu.matmul %182, %167, %cst_65 {dimension_numbers = #tpu.dot_dimension_numbers<[1], [1], [0], [0], [0, 0, 1, 0], [], []>} : vector<6x256xf32>, vector<16x256xf32>, vector<6x16xf32> -> vector<6x16xf32>
    %184 = vector.extract_strided_slice %72 {offsets = [16, 0], sizes = [16, 256], strides = [1, 1]} : vector<128x256xf32> to vector<16x256xf32>
    %185 = vector.extract_strided_slice %72 {offsets = [48, 0], sizes = [16, 256], strides = [1, 1]} : vector<128x256xf32> to vector<16x256xf32>
    %186 = vector.extract_strided_slice %165 {offsets = [0, 16], sizes = [6, 16], strides = [1, 1]} : vector<6x32xf32> to vector<6x16xf32>
    %cst_66 = arith.constant dense<0.000000e+00> : vector<6x256xf32>
    %187 = tpu.matmul %186, %184, %cst_66 {dimension_numbers = #tpu.dot_dimension_numbers<[1], [0], [0], [1], [0, 0, 1, 1], [], []>} : vector<6x16xf32>, vector<16x256xf32>, vector<6x256xf32> -> vector<6x256xf32>
    %cst_67 = arith.constant 2.500000e-01 : f32
    %188 = vector.broadcast %cst_67 : f32 to vector<6x256xf32>
    %189 = arith.mulf %187, %188 : vector<6x256xf32>
    %190 = arith.addf %189, %61 : vector<6x256xf32>
    %cst_68 = arith.constant dense<0xFF800000> : vector<6xf32>
    %191 = vector.multi_reduction <maximumf>, %190, %cst_68 [1] : vector<6x256xf32> to vector<6xf32>
    %192 = vector.shape_cast %191 : vector<6xf32> to vector<6x1xf32>
    %193 = vector.broadcast %192 : vector<6x1xf32> to vector<6x256xf32>
    %194 = arith.subf %190, %193 : vector<6x256xf32>
    %195 = math.exp %194 : vector<6x256xf32>
    %cst_69 = arith.constant dense<0.000000e+00> : vector<6xf32>
    %196 = vector.multi_reduction <add>, %195, %cst_69 [1] : vector<6x256xf32> to vector<6xf32>
    %197 = vector.shape_cast %196 : vector<6xf32> to vector<6x1xf32>
    %198 = tpu.reciprocal %197 {approx = true} : vector<6x1xf32> -> vector<6x1xf32>
    %199 = vector.broadcast %198 : vector<6x1xf32> to vector<6x256xf32>
    %200 = arith.mulf %195, %199 : vector<6x256xf32>
    %cst_70 = arith.constant dense<0.000000e+00> : vector<6x16xf32>
    %201 = tpu.matmul %200, %185, %cst_70 {dimension_numbers = #tpu.dot_dimension_numbers<[1], [1], [0], [0], [0, 0, 1, 0], [], []>} : vector<6x256xf32>, vector<16x256xf32>, vector<6x16xf32> -> vector<6x16xf32>
    %202 = tpu.concatenate %183, %201 in 1 : vector<6x16xf32>, vector<6x16xf32> -> vector<6x32xf32>
    %c160 = arith.constant 160 : index
    %c0_71 = arith.constant 0 : index
    %203 = vector.load %arg3[%c160, %c0_71] : memref<896x128xf32, #tpu.memory_space<vmem>>, vector<32x64xf32>
    %cst_72 = arith.constant dense<0.000000e+00> : vector<6x64xf32>
    %204 = tpu.matmul %202, %203, %cst_72 {dimension_numbers = #tpu.dot_dimension_numbers<[1], [0], [0], [1], [0, 0, 1, 1], [], []>} : vector<6x32xf32>, vector<32x64xf32>, vector<6x64xf32> -> vector<6x64xf32>
    %205 = arith.addf %141, %204 : vector<6x64xf32>
    %c8 = arith.constant 8 : index
    %c0_73 = arith.constant 0 : index
    %206 = vector.load %arg2[%c8, %c0_73] : memref<24x128xf32, #tpu.memory_space<vmem>>, vector<1x64xf32>
    %207 = vector.broadcast %206 : vector<1x64xf32> to vector<6x64xf32>
    %208 = arith.addf %205, %207 : vector<6x64xf32>
    %c9 = arith.constant 9 : index
    %c0_74 = arith.constant 0 : index
    %209 = vector.load %arg2[%c9, %c0_74] : memref<24x128xf32, #tpu.memory_space<vmem>>, vector<1x64xf32>
    %c10 = arith.constant 10 : index
    %c0_75 = arith.constant 0 : index
    %210 = vector.load %arg2[%c10, %c0_75] : memref<24x128xf32, #tpu.memory_space<vmem>>, vector<1x64xf32>
    %cst_76 = arith.constant dense<0.000000e+00> : vector<6xf32>
    %211 = vector.multi_reduction <add>, %208, %cst_76 [1] : vector<6x64xf32> to vector<6xf32>
    %212 = vector.shape_cast %211 : vector<6xf32> to vector<6x1xf32>
    %cst_77 = arith.constant 6.400000e+01 : f32
    %213 = vector.broadcast %cst_77 : f32 to vector<6x1xf32>
    %214 = arith.divf %212, %213 : vector<6x1xf32>
    %215 = vector.broadcast %214 : vector<6x1xf32> to vector<6x64xf32>
    %216 = arith.subf %208, %215 : vector<6x64xf32>
    %217 = arith.mulf %216, %216 : vector<6x64xf32>
    %cst_78 = arith.constant dense<0.000000e+00> : vector<6xf32>
    %218 = vector.multi_reduction <add>, %217, %cst_78 [1] : vector<6x64xf32> to vector<6xf32>
    %219 = vector.shape_cast %218 : vector<6xf32> to vector<6x1xf32>
    %cst_79 = arith.constant 6.400000e+01 : f32
    %220 = vector.broadcast %cst_79 : f32 to vector<6x1xf32>
    %221 = arith.divf %219, %220 : vector<6x1xf32>
    %cst_80 = arith.constant 9.99999974E-6 : f32
    %222 = vector.broadcast %cst_80 : f32 to vector<6x1xf32>
    %223 = arith.addf %221, %222 : vector<6x1xf32>
    %224 = math.rsqrt %223 : vector<6x1xf32>
    %225 = vector.broadcast %224 : vector<6x1xf32> to vector<6x64xf32>
    %226 = arith.mulf %216, %225 : vector<6x64xf32>
    %227 = vector.broadcast %209 : vector<1x64xf32> to vector<6x64xf32>
    %228 = arith.mulf %226, %227 : vector<6x64xf32>
    %229 = vector.broadcast %210 : vector<1x64xf32> to vector<6x64xf32>
    %230 = arith.addf %228, %229 : vector<6x64xf32>
    %c192 = arith.constant 192 : index
    %c0_81 = arith.constant 0 : index
    %231 = vector.load %arg3[%c192, %c0_81] : memref<896x128xf32, #tpu.memory_space<vmem>>, vector<64x128xf32>
    %cst_82 = arith.constant dense<0.000000e+00> : vector<6x128xf32>
    %232 = tpu.matmul %230, %231, %cst_82 {dimension_numbers = #tpu.dot_dimension_numbers<[1], [0], [0], [1], [0, 0, 1, 1], [], []>} : vector<6x64xf32>, vector<64x128xf32>, vector<6x128xf32> -> vector<6x128xf32>
    %c11 = arith.constant 11 : index
    %c0_83 = arith.constant 0 : index
    %233 = vector.load %arg2[%c11, %c0_83] : memref<24x128xf32, #tpu.memory_space<vmem>>, vector<1x128xf32>
    %234 = vector.broadcast %233 : vector<1x128xf32> to vector<6x128xf32>
    %235 = arith.addf %232, %234 : vector<6x128xf32>
    %cst_84 = arith.constant 5.000000e-01 : f32
    %236 = vector.broadcast %cst_84 : f32 to vector<6x128xf32>
    %237 = arith.mulf %236, %235 : vector<6x128xf32>
    %cst_85 = arith.constant 0.707106769 : f32
    %238 = vector.broadcast %cst_85 : f32 to vector<6x128xf32>
    %239 = arith.mulf %235, %238 : vector<6x128xf32>
    %240 = math.absf %239 : vector<6x128xf32>
    %cst_86 = arith.constant 0.327591091 : f32
    %241 = vector.broadcast %cst_86 : f32 to vector<6x128xf32>
    %242 = arith.mulf %241, %240 : vector<6x128xf32>
    %cst_87 = arith.constant 1.000000e+00 : f32
    %243 = vector.broadcast %cst_87 : f32 to vector<6x128xf32>
    %244 = arith.addf %243, %242 : vector<6x128xf32>
    %cst_88 = arith.constant 1.000000e+00 : f32
    %245 = vector.broadcast %cst_88 : f32 to vector<6x128xf32>
    %246 = arith.divf %245, %244 : vector<6x128xf32>
    %cst_89 = arith.constant 1.06140542 : f32
    %247 = vector.broadcast %cst_89 : f32 to vector<6x128xf32>
    %248 = arith.mulf %247, %246 : vector<6x128xf32>
    %cst_90 = arith.constant -1.45315206 : f32
    %249 = vector.broadcast %cst_90 : f32 to vector<6x128xf32>
    %250 = arith.addf %248, %249 : vector<6x128xf32>
    %251 = arith.mulf %250, %246 : vector<6x128xf32>
    %cst_91 = arith.constant 1.42141378 : f32
    %252 = vector.broadcast %cst_91 : f32 to vector<6x128xf32>
    %253 = arith.addf %251, %252 : vector<6x128xf32>
    %254 = arith.mulf %253, %246 : vector<6x128xf32>
    %cst_92 = arith.constant -0.284496725 : f32
    %255 = vector.broadcast %cst_92 : f32 to vector<6x128xf32>
    %256 = arith.addf %254, %255 : vector<6x128xf32>
    %257 = arith.mulf %256, %246 : vector<6x128xf32>
    %cst_93 = arith.constant 0.254829586 : f32
    %258 = vector.broadcast %cst_93 : f32 to vector<6x128xf32>
    %259 = arith.addf %257, %258 : vector<6x128xf32>
    %260 = arith.mulf %259, %246 : vector<6x128xf32>
    %cst_94 = arith.constant 0.000000e+00 : f32
    %261 = vector.broadcast %cst_94 : f32 to vector<6x128xf32>
    %262 = arith.subf %261, %240 : vector<6x128xf32>
    %263 = arith.mulf %262, %240 : vector<6x128xf32>
    %264 = math.exp %263 : vector<6x128xf32>
    %265 = arith.mulf %260, %264 : vector<6x128xf32>
    %cst_95 = arith.constant 1.000000e+00 : f32
    %266 = vector.broadcast %cst_95 : f32 to vector<6x128xf32>
    %267 = arith.subf %266, %265 : vector<6x128xf32>
    %cst_96 = arith.constant 0.000000e+00 : f32
    %268 = vector.broadcast %cst_96 : f32 to vector<6x128xf32>
    %269 = arith.cmpf olt, %239, %268 : vector<6x128xf32>
    %cst_97 = arith.constant 0.000000e+00 : f32
    %270 = vector.broadcast %cst_97 : f32 to vector<6x128xf32>
    %271 = arith.subf %270, %267 : vector<6x128xf32>
    %272 = arith.select %269, %271, %267 : vector<6x128xi1>, vector<6x128xf32>
    %cst_98 = arith.constant 1.000000e+00 : f32
    %273 = vector.broadcast %cst_98 : f32 to vector<6x128xf32>
    %274 = arith.addf %273, %272 : vector<6x128xf32>
    %275 = arith.mulf %237, %274 : vector<6x128xf32>
    %c256 = arith.constant 256 : index
    %c0_99 = arith.constant 0 : index
    %276 = vector.load %arg3[%c256, %c0_99] : memref<896x128xf32, #tpu.memory_space<vmem>>, vector<128x64xf32>
    %cst_100 = arith.constant dense<0.000000e+00> : vector<6x64xf32>
    %277 = tpu.matmul %275, %276, %cst_100 {dimension_numbers = #tpu.dot_dimension_numbers<[1], [0], [0], [1], [0, 0, 1, 1], [], []>} : vector<6x128xf32>, vector<128x64xf32>, vector<6x64xf32> -> vector<6x64xf32>
    %278 = arith.addf %208, %277 : vector<6x64xf32>
    %c12 = arith.constant 12 : index
    %c0_101 = arith.constant 0 : index
    %279 = vector.load %arg2[%c12, %c0_101] : memref<24x128xf32, #tpu.memory_space<vmem>>, vector<1x64xf32>
    %280 = vector.broadcast %279 : vector<1x64xf32> to vector<6x64xf32>
    %281 = arith.addf %278, %280 : vector<6x64xf32>
    %c13 = arith.constant 13 : index
    %c0_102 = arith.constant 0 : index
    %282 = vector.load %arg2[%c13, %c0_102] : memref<24x128xf32, #tpu.memory_space<vmem>>, vector<1x64xf32>
    %c14 = arith.constant 14 : index
    %c0_103 = arith.constant 0 : index
    %283 = vector.load %arg2[%c14, %c0_103] : memref<24x128xf32, #tpu.memory_space<vmem>>, vector<1x64xf32>
    %cst_104 = arith.constant dense<0.000000e+00> : vector<6xf32>
    %284 = vector.multi_reduction <add>, %281, %cst_104 [1] : vector<6x64xf32> to vector<6xf32>
    %285 = vector.shape_cast %284 : vector<6xf32> to vector<6x1xf32>
    %cst_105 = arith.constant 6.400000e+01 : f32
    %286 = vector.broadcast %cst_105 : f32 to vector<6x1xf32>
    %287 = arith.divf %285, %286 : vector<6x1xf32>
    %288 = vector.broadcast %287 : vector<6x1xf32> to vector<6x64xf32>
    %289 = arith.subf %281, %288 : vector<6x64xf32>
    %290 = arith.mulf %289, %289 : vector<6x64xf32>
    %cst_106 = arith.constant dense<0.000000e+00> : vector<6xf32>
    %291 = vector.multi_reduction <add>, %290, %cst_106 [1] : vector<6x64xf32> to vector<6xf32>
    %292 = vector.shape_cast %291 : vector<6xf32> to vector<6x1xf32>
    %cst_107 = arith.constant 6.400000e+01 : f32
    %293 = vector.broadcast %cst_107 : f32 to vector<6x1xf32>
    %294 = arith.divf %292, %293 : vector<6x1xf32>
    %cst_108 = arith.constant 9.99999974E-6 : f32
    %295 = vector.broadcast %cst_108 : f32 to vector<6x1xf32>
    %296 = arith.addf %294, %295 : vector<6x1xf32>
    %297 = math.rsqrt %296 : vector<6x1xf32>
    %298 = vector.broadcast %297 : vector<6x1xf32> to vector<6x64xf32>
    %299 = arith.mulf %289, %298 : vector<6x64xf32>
    %300 = vector.broadcast %282 : vector<1x64xf32> to vector<6x64xf32>
    %301 = arith.mulf %299, %300 : vector<6x64xf32>
    %302 = vector.broadcast %283 : vector<1x64xf32> to vector<6x64xf32>
    %303 = arith.addf %301, %302 : vector<6x64xf32>
    %c384 = arith.constant 384 : index
    %c0_109 = arith.constant 0 : index
    %304 = vector.load %arg3[%c384, %c0_109] : memref<896x128xf32, #tpu.memory_space<vmem>>, vector<64x96xf32>
    %cst_110 = arith.constant dense<0.000000e+00> : vector<6x96xf32>
    %305 = tpu.matmul %303, %304, %cst_110 {dimension_numbers = #tpu.dot_dimension_numbers<[1], [0], [0], [1], [0, 0, 1, 1], [], []>} : vector<6x64xf32>, vector<64x96xf32>, vector<6x96xf32> -> vector<6x96xf32>
    %306 = vector.extract_strided_slice %305 {offsets = [0, 0], sizes = [6, 16], strides = [1, 1]} : vector<6x96xf32> to vector<6x16xf32>
    %307 = vector.extract_strided_slice %305 {offsets = [0, 32], sizes = [6, 16], strides = [1, 1]} : vector<6x96xf32> to vector<6x16xf32>
    %308 = vector.extract_strided_slice %305 {offsets = [0, 64], sizes = [6, 16], strides = [1, 1]} : vector<6x96xf32> to vector<6x16xf32>
    %cst_111 = arith.constant dense<0.000000e+00> : vector<6x6xf32>
    %309 = tpu.matmul %306, %307, %cst_111 {dimension_numbers = #tpu.dot_dimension_numbers<[1], [1], [0], [0], [0, 0, 1, 0], [], []>} : vector<6x16xf32>, vector<6x16xf32>, vector<6x6xf32> -> vector<6x6xf32>
    %cst_112 = arith.constant 2.500000e-01 : f32
    %310 = vector.broadcast %cst_112 : f32 to vector<6x6xf32>
    %311 = arith.mulf %309, %310 : vector<6x6xf32>
    %312 = arith.addf %311, %30 : vector<6x6xf32>
    %cst_113 = arith.constant dense<0xFF800000> : vector<6xf32>
    %313 = vector.multi_reduction <maximumf>, %312, %cst_113 [1] : vector<6x6xf32> to vector<6xf32>
    %314 = vector.shape_cast %313 : vector<6xf32> to vector<6x1xf32>
    %315 = vector.broadcast %314 : vector<6x1xf32> to vector<6x6xf32>
    %316 = arith.subf %312, %315 : vector<6x6xf32>
    %317 = math.exp %316 : vector<6x6xf32>
    %cst_114 = arith.constant dense<0.000000e+00> : vector<6xf32>
    %318 = vector.multi_reduction <add>, %317, %cst_114 [1] : vector<6x6xf32> to vector<6xf32>
    %319 = vector.shape_cast %318 : vector<6xf32> to vector<6x1xf32>
    %320 = tpu.reciprocal %319 {approx = true} : vector<6x1xf32> -> vector<6x1xf32>
    %321 = vector.broadcast %320 : vector<6x1xf32> to vector<6x6xf32>
    %322 = arith.mulf %317, %321 : vector<6x6xf32>
    %cst_115 = arith.constant dense<0.000000e+00> : vector<6x16xf32>
    %323 = tpu.matmul %322, %308, %cst_115 {dimension_numbers = #tpu.dot_dimension_numbers<[1], [0], [0], [1], [0, 0, 1, 1], [], []>} : vector<6x6xf32>, vector<6x16xf32>, vector<6x16xf32> -> vector<6x16xf32>
    %324 = vector.extract_strided_slice %305 {offsets = [0, 16], sizes = [6, 16], strides = [1, 1]} : vector<6x96xf32> to vector<6x16xf32>
    %325 = vector.extract_strided_slice %305 {offsets = [0, 48], sizes = [6, 16], strides = [1, 1]} : vector<6x96xf32> to vector<6x16xf32>
    %326 = vector.extract_strided_slice %305 {offsets = [0, 80], sizes = [6, 16], strides = [1, 1]} : vector<6x96xf32> to vector<6x16xf32>
    %cst_116 = arith.constant dense<0.000000e+00> : vector<6x6xf32>
    %327 = tpu.matmul %324, %325, %cst_116 {dimension_numbers = #tpu.dot_dimension_numbers<[1], [1], [0], [0], [0, 0, 1, 0], [], []>} : vector<6x16xf32>, vector<6x16xf32>, vector<6x6xf32> -> vector<6x6xf32>
    %cst_117 = arith.constant 2.500000e-01 : f32
    %328 = vector.broadcast %cst_117 : f32 to vector<6x6xf32>
    %329 = arith.mulf %327, %328 : vector<6x6xf32>
    %330 = arith.addf %329, %30 : vector<6x6xf32>
    %cst_118 = arith.constant dense<0xFF800000> : vector<6xf32>
    %331 = vector.multi_reduction <maximumf>, %330, %cst_118 [1] : vector<6x6xf32> to vector<6xf32>
    %332 = vector.shape_cast %331 : vector<6xf32> to vector<6x1xf32>
    %333 = vector.broadcast %332 : vector<6x1xf32> to vector<6x6xf32>
    %334 = arith.subf %330, %333 : vector<6x6xf32>
    %335 = math.exp %334 : vector<6x6xf32>
    %cst_119 = arith.constant dense<0.000000e+00> : vector<6xf32>
    %336 = vector.multi_reduction <add>, %335, %cst_119 [1] : vector<6x6xf32> to vector<6xf32>
    %337 = vector.shape_cast %336 : vector<6xf32> to vector<6x1xf32>
    %338 = tpu.reciprocal %337 {approx = true} : vector<6x1xf32> -> vector<6x1xf32>
    %339 = vector.broadcast %338 : vector<6x1xf32> to vector<6x6xf32>
    %340 = arith.mulf %335, %339 : vector<6x6xf32>
    %cst_120 = arith.constant dense<0.000000e+00> : vector<6x16xf32>
    %341 = tpu.matmul %340, %326, %cst_120 {dimension_numbers = #tpu.dot_dimension_numbers<[1], [0], [0], [1], [0, 0, 1, 1], [], []>} : vector<6x6xf32>, vector<6x16xf32>, vector<6x16xf32> -> vector<6x16xf32>
    %342 = tpu.concatenate %323, %341 in 1 : vector<6x16xf32>, vector<6x16xf32> -> vector<6x32xf32>
    %c448 = arith.constant 448 : index
    %c0_121 = arith.constant 0 : index
    %343 = vector.load %arg3[%c448, %c0_121] : memref<896x128xf32, #tpu.memory_space<vmem>>, vector<32x64xf32>
    %cst_122 = arith.constant dense<0.000000e+00> : vector<6x64xf32>
    %344 = tpu.matmul %342, %343, %cst_122 {dimension_numbers = #tpu.dot_dimension_numbers<[1], [0], [0], [1], [0, 0, 1, 1], [], []>} : vector<6x32xf32>, vector<32x64xf32>, vector<6x64xf32> -> vector<6x64xf32>
    %345 = arith.addf %281, %344 : vector<6x64xf32>
    %c15 = arith.constant 15 : index
    %c0_123 = arith.constant 0 : index
    %346 = vector.load %arg2[%c15, %c0_123] : memref<24x128xf32, #tpu.memory_space<vmem>>, vector<1x64xf32>
    %347 = vector.broadcast %346 : vector<1x64xf32> to vector<6x64xf32>
    %348 = arith.addf %345, %347 : vector<6x64xf32>
    %c16 = arith.constant 16 : index
    %c0_124 = arith.constant 0 : index
    %349 = vector.load %arg2[%c16, %c0_124] : memref<24x128xf32, #tpu.memory_space<vmem>>, vector<1x64xf32>
    %c17 = arith.constant 17 : index
    %c0_125 = arith.constant 0 : index
    %350 = vector.load %arg2[%c17, %c0_125] : memref<24x128xf32, #tpu.memory_space<vmem>>, vector<1x64xf32>
    %cst_126 = arith.constant dense<0.000000e+00> : vector<6xf32>
    %351 = vector.multi_reduction <add>, %348, %cst_126 [1] : vector<6x64xf32> to vector<6xf32>
    %352 = vector.shape_cast %351 : vector<6xf32> to vector<6x1xf32>
    %cst_127 = arith.constant 6.400000e+01 : f32
    %353 = vector.broadcast %cst_127 : f32 to vector<6x1xf32>
    %354 = arith.divf %352, %353 : vector<6x1xf32>
    %355 = vector.broadcast %354 : vector<6x1xf32> to vector<6x64xf32>
    %356 = arith.subf %348, %355 : vector<6x64xf32>
    %357 = arith.mulf %356, %356 : vector<6x64xf32>
    %cst_128 = arith.constant dense<0.000000e+00> : vector<6xf32>
    %358 = vector.multi_reduction <add>, %357, %cst_128 [1] : vector<6x64xf32> to vector<6xf32>
    %359 = vector.shape_cast %358 : vector<6xf32> to vector<6x1xf32>
    %cst_129 = arith.constant 6.400000e+01 : f32
    %360 = vector.broadcast %cst_129 : f32 to vector<6x1xf32>
    %361 = arith.divf %359, %360 : vector<6x1xf32>
    %cst_130 = arith.constant 9.99999974E-6 : f32
    %362 = vector.broadcast %cst_130 : f32 to vector<6x1xf32>
    %363 = arith.addf %361, %362 : vector<6x1xf32>
    %364 = math.rsqrt %363 : vector<6x1xf32>
    %365 = vector.broadcast %364 : vector<6x1xf32> to vector<6x64xf32>
    %366 = arith.mulf %356, %365 : vector<6x64xf32>
    %367 = vector.broadcast %349 : vector<1x64xf32> to vector<6x64xf32>
    %368 = arith.mulf %366, %367 : vector<6x64xf32>
    %369 = vector.broadcast %350 : vector<1x64xf32> to vector<6x64xf32>
    %370 = arith.addf %368, %369 : vector<6x64xf32>
    %c480 = arith.constant 480 : index
    %c0_131 = arith.constant 0 : index
    %371 = vector.load %arg3[%c480, %c0_131] : memref<896x128xf32, #tpu.memory_space<vmem>>, vector<64x32xf32>
    %cst_132 = arith.constant dense<0.000000e+00> : vector<6x32xf32>
    %372 = tpu.matmul %370, %371, %cst_132 {dimension_numbers = #tpu.dot_dimension_numbers<[1], [0], [0], [1], [0, 0, 1, 1], [], []>} : vector<6x64xf32>, vector<64x32xf32>, vector<6x32xf32> -> vector<6x32xf32>
    %373 = vector.extract_strided_slice %72 {offsets = [64, 0], sizes = [16, 256], strides = [1, 1]} : vector<128x256xf32> to vector<16x256xf32>
    %374 = vector.extract_strided_slice %72 {offsets = [96, 0], sizes = [16, 256], strides = [1, 1]} : vector<128x256xf32> to vector<16x256xf32>
    %375 = vector.extract_strided_slice %372 {offsets = [0, 0], sizes = [6, 16], strides = [1, 1]} : vector<6x32xf32> to vector<6x16xf32>
    %cst_133 = arith.constant dense<0.000000e+00> : vector<6x256xf32>
    %376 = tpu.matmul %375, %373, %cst_133 {dimension_numbers = #tpu.dot_dimension_numbers<[1], [0], [0], [1], [0, 0, 1, 1], [], []>} : vector<6x16xf32>, vector<16x256xf32>, vector<6x256xf32> -> vector<6x256xf32>
    %cst_134 = arith.constant 2.500000e-01 : f32
    %377 = vector.broadcast %cst_134 : f32 to vector<6x256xf32>
    %378 = arith.mulf %376, %377 : vector<6x256xf32>
    %379 = arith.addf %378, %61 : vector<6x256xf32>
    %cst_135 = arith.constant dense<0xFF800000> : vector<6xf32>
    %380 = vector.multi_reduction <maximumf>, %379, %cst_135 [1] : vector<6x256xf32> to vector<6xf32>
    %381 = vector.shape_cast %380 : vector<6xf32> to vector<6x1xf32>
    %382 = vector.broadcast %381 : vector<6x1xf32> to vector<6x256xf32>
    %383 = arith.subf %379, %382 : vector<6x256xf32>
    %384 = math.exp %383 : vector<6x256xf32>
    %cst_136 = arith.constant dense<0.000000e+00> : vector<6xf32>
    %385 = vector.multi_reduction <add>, %384, %cst_136 [1] : vector<6x256xf32> to vector<6xf32>
    %386 = vector.shape_cast %385 : vector<6xf32> to vector<6x1xf32>
    %387 = tpu.reciprocal %386 {approx = true} : vector<6x1xf32> -> vector<6x1xf32>
    %388 = vector.broadcast %387 : vector<6x1xf32> to vector<6x256xf32>
    %389 = arith.mulf %384, %388 : vector<6x256xf32>
    %cst_137 = arith.constant dense<0.000000e+00> : vector<6x16xf32>
    %390 = tpu.matmul %389, %374, %cst_137 {dimension_numbers = #tpu.dot_dimension_numbers<[1], [1], [0], [0], [0, 0, 1, 0], [], []>} : vector<6x256xf32>, vector<16x256xf32>, vector<6x16xf32> -> vector<6x16xf32>
    %391 = vector.extract_strided_slice %72 {offsets = [80, 0], sizes = [16, 256], strides = [1, 1]} : vector<128x256xf32> to vector<16x256xf32>
    %392 = vector.extract_strided_slice %72 {offsets = [112, 0], sizes = [16, 256], strides = [1, 1]} : vector<128x256xf32> to vector<16x256xf32>
    %393 = vector.extract_strided_slice %372 {offsets = [0, 16], sizes = [6, 16], strides = [1, 1]} : vector<6x32xf32> to vector<6x16xf32>
    %cst_138 = arith.constant dense<0.000000e+00> : vector<6x256xf32>
    %394 = tpu.matmul %393, %391, %cst_138 {dimension_numbers = #tpu.dot_dimension_numbers<[1], [0], [0], [1], [0, 0, 1, 1], [], []>} : vector<6x16xf32>, vector<16x256xf32>, vector<6x256xf32> -> vector<6x256xf32>
    %cst_139 = arith.constant 2.500000e-01 : f32
    %395 = vector.broadcast %cst_139 : f32 to vector<6x256xf32>
    %396 = arith.mulf %394, %395 : vector<6x256xf32>
    %397 = arith.addf %396, %61 : vector<6x256xf32>
    %cst_140 = arith.constant dense<0xFF800000> : vector<6xf32>
    %398 = vector.multi_reduction <maximumf>, %397, %cst_140 [1] : vector<6x256xf32> to vector<6xf32>
    %399 = vector.shape_cast %398 : vector<6xf32> to vector<6x1xf32>
    %400 = vector.broadcast %399 : vector<6x1xf32> to vector<6x256xf32>
    %401 = arith.subf %397, %400 : vector<6x256xf32>
    %402 = math.exp %401 : vector<6x256xf32>
    %cst_141 = arith.constant dense<0.000000e+00> : vector<6xf32>
    %403 = vector.multi_reduction <add>, %402, %cst_141 [1] : vector<6x256xf32> to vector<6xf32>
    %404 = vector.shape_cast %403 : vector<6xf32> to vector<6x1xf32>
    %405 = tpu.reciprocal %404 {approx = true} : vector<6x1xf32> -> vector<6x1xf32>
    %406 = vector.broadcast %405 : vector<6x1xf32> to vector<6x256xf32>
    %407 = arith.mulf %402, %406 : vector<6x256xf32>
    %cst_142 = arith.constant dense<0.000000e+00> : vector<6x16xf32>
    %408 = tpu.matmul %407, %392, %cst_142 {dimension_numbers = #tpu.dot_dimension_numbers<[1], [1], [0], [0], [0, 0, 1, 0], [], []>} : vector<6x256xf32>, vector<16x256xf32>, vector<6x16xf32> -> vector<6x16xf32>
    %409 = tpu.concatenate %390, %408 in 1 : vector<6x16xf32>, vector<6x16xf32> -> vector<6x32xf32>
    %c544 = arith.constant 544 : index
    %c0_143 = arith.constant 0 : index
    %410 = vector.load %arg3[%c544, %c0_143] : memref<896x128xf32, #tpu.memory_space<vmem>>, vector<32x64xf32>
    %cst_144 = arith.constant dense<0.000000e+00> : vector<6x64xf32>
    %411 = tpu.matmul %409, %410, %cst_144 {dimension_numbers = #tpu.dot_dimension_numbers<[1], [0], [0], [1], [0, 0, 1, 1], [], []>} : vector<6x32xf32>, vector<32x64xf32>, vector<6x64xf32> -> vector<6x64xf32>
    %412 = arith.addf %348, %411 : vector<6x64xf32>
    %c18 = arith.constant 18 : index
    %c0_145 = arith.constant 0 : index
    %413 = vector.load %arg2[%c18, %c0_145] : memref<24x128xf32, #tpu.memory_space<vmem>>, vector<1x64xf32>
    %414 = vector.broadcast %413 : vector<1x64xf32> to vector<6x64xf32>
    %415 = arith.addf %412, %414 : vector<6x64xf32>
    %c19 = arith.constant 19 : index
    %c0_146 = arith.constant 0 : index
    %416 = vector.load %arg2[%c19, %c0_146] : memref<24x128xf32, #tpu.memory_space<vmem>>, vector<1x64xf32>
    %c20 = arith.constant 20 : index
    %c0_147 = arith.constant 0 : index
    %417 = vector.load %arg2[%c20, %c0_147] : memref<24x128xf32, #tpu.memory_space<vmem>>, vector<1x64xf32>
    %cst_148 = arith.constant dense<0.000000e+00> : vector<6xf32>
    %418 = vector.multi_reduction <add>, %415, %cst_148 [1] : vector<6x64xf32> to vector<6xf32>
    %419 = vector.shape_cast %418 : vector<6xf32> to vector<6x1xf32>
    %cst_149 = arith.constant 6.400000e+01 : f32
    %420 = vector.broadcast %cst_149 : f32 to vector<6x1xf32>
    %421 = arith.divf %419, %420 : vector<6x1xf32>
    %422 = vector.broadcast %421 : vector<6x1xf32> to vector<6x64xf32>
    %423 = arith.subf %415, %422 : vector<6x64xf32>
    %424 = arith.mulf %423, %423 : vector<6x64xf32>
    %cst_150 = arith.constant dense<0.000000e+00> : vector<6xf32>
    %425 = vector.multi_reduction <add>, %424, %cst_150 [1] : vector<6x64xf32> to vector<6xf32>
    %426 = vector.shape_cast %425 : vector<6xf32> to vector<6x1xf32>
    %cst_151 = arith.constant 6.400000e+01 : f32
    %427 = vector.broadcast %cst_151 : f32 to vector<6x1xf32>
    %428 = arith.divf %426, %427 : vector<6x1xf32>
    %cst_152 = arith.constant 9.99999974E-6 : f32
    %429 = vector.broadcast %cst_152 : f32 to vector<6x1xf32>
    %430 = arith.addf %428, %429 : vector<6x1xf32>
    %431 = math.rsqrt %430 : vector<6x1xf32>
    %432 = vector.broadcast %431 : vector<6x1xf32> to vector<6x64xf32>
    %433 = arith.mulf %423, %432 : vector<6x64xf32>
    %434 = vector.broadcast %416 : vector<1x64xf32> to vector<6x64xf32>
    %435 = arith.mulf %433, %434 : vector<6x64xf32>
    %436 = vector.broadcast %417 : vector<1x64xf32> to vector<6x64xf32>
    %437 = arith.addf %435, %436 : vector<6x64xf32>
    %c576 = arith.constant 576 : index
    %c0_153 = arith.constant 0 : index
    %438 = vector.load %arg3[%c576, %c0_153] : memref<896x128xf32, #tpu.memory_space<vmem>>, vector<64x128xf32>
    %cst_154 = arith.constant dense<0.000000e+00> : vector<6x128xf32>
    %439 = tpu.matmul %437, %438, %cst_154 {dimension_numbers = #tpu.dot_dimension_numbers<[1], [0], [0], [1], [0, 0, 1, 1], [], []>} : vector<6x64xf32>, vector<64x128xf32>, vector<6x128xf32> -> vector<6x128xf32>
    %c21 = arith.constant 21 : index
    %c0_155 = arith.constant 0 : index
    %440 = vector.load %arg2[%c21, %c0_155] : memref<24x128xf32, #tpu.memory_space<vmem>>, vector<1x128xf32>
    %441 = vector.broadcast %440 : vector<1x128xf32> to vector<6x128xf32>
    %442 = arith.addf %439, %441 : vector<6x128xf32>
    %cst_156 = arith.constant 5.000000e-01 : f32
    %443 = vector.broadcast %cst_156 : f32 to vector<6x128xf32>
    %444 = arith.mulf %443, %442 : vector<6x128xf32>
    %cst_157 = arith.constant 0.707106769 : f32
    %445 = vector.broadcast %cst_157 : f32 to vector<6x128xf32>
    %446 = arith.mulf %442, %445 : vector<6x128xf32>
    %447 = math.absf %446 : vector<6x128xf32>
    %cst_158 = arith.constant 0.327591091 : f32
    %448 = vector.broadcast %cst_158 : f32 to vector<6x128xf32>
    %449 = arith.mulf %448, %447 : vector<6x128xf32>
    %cst_159 = arith.constant 1.000000e+00 : f32
    %450 = vector.broadcast %cst_159 : f32 to vector<6x128xf32>
    %451 = arith.addf %450, %449 : vector<6x128xf32>
    %cst_160 = arith.constant 1.000000e+00 : f32
    %452 = vector.broadcast %cst_160 : f32 to vector<6x128xf32>
    %453 = arith.divf %452, %451 : vector<6x128xf32>
    %cst_161 = arith.constant 1.06140542 : f32
    %454 = vector.broadcast %cst_161 : f32 to vector<6x128xf32>
    %455 = arith.mulf %454, %453 : vector<6x128xf32>
    %cst_162 = arith.constant -1.45315206 : f32
    %456 = vector.broadcast %cst_162 : f32 to vector<6x128xf32>
    %457 = arith.addf %455, %456 : vector<6x128xf32>
    %458 = arith.mulf %457, %453 : vector<6x128xf32>
    %cst_163 = arith.constant 1.42141378 : f32
    %459 = vector.broadcast %cst_163 : f32 to vector<6x128xf32>
    %460 = arith.addf %458, %459 : vector<6x128xf32>
    %461 = arith.mulf %460, %453 : vector<6x128xf32>
    %cst_164 = arith.constant -0.284496725 : f32
    %462 = vector.broadcast %cst_164 : f32 to vector<6x128xf32>
    %463 = arith.addf %461, %462 : vector<6x128xf32>
    %464 = arith.mulf %463, %453 : vector<6x128xf32>
    %cst_165 = arith.constant 0.254829586 : f32
    %465 = vector.broadcast %cst_165 : f32 to vector<6x128xf32>
    %466 = arith.addf %464, %465 : vector<6x128xf32>
    %467 = arith.mulf %466, %453 : vector<6x128xf32>
    %cst_166 = arith.constant 0.000000e+00 : f32
    %468 = vector.broadcast %cst_166 : f32 to vector<6x128xf32>
    %469 = arith.subf %468, %447 : vector<6x128xf32>
    %470 = arith.mulf %469, %447 : vector<6x128xf32>
    %471 = math.exp %470 : vector<6x128xf32>
    %472 = arith.mulf %467, %471 : vector<6x128xf32>
    %cst_167 = arith.constant 1.000000e+00 : f32
    %473 = vector.broadcast %cst_167 : f32 to vector<6x128xf32>
    %474 = arith.subf %473, %472 : vector<6x128xf32>
    %cst_168 = arith.constant 0.000000e+00 : f32
    %475 = vector.broadcast %cst_168 : f32 to vector<6x128xf32>
    %476 = arith.cmpf olt, %446, %475 : vector<6x128xf32>
    %cst_169 = arith.constant 0.000000e+00 : f32
    %477 = vector.broadcast %cst_169 : f32 to vector<6x128xf32>
    %478 = arith.subf %477, %474 : vector<6x128xf32>
    %479 = arith.select %476, %478, %474 : vector<6x128xi1>, vector<6x128xf32>
    %cst_170 = arith.constant 1.000000e+00 : f32
    %480 = vector.broadcast %cst_170 : f32 to vector<6x128xf32>
    %481 = arith.addf %480, %479 : vector<6x128xf32>
    %482 = arith.mulf %444, %481 : vector<6x128xf32>
    %c640 = arith.constant 640 : index
    %c0_171 = arith.constant 0 : index
    %483 = vector.load %arg3[%c640, %c0_171] : memref<896x128xf32, #tpu.memory_space<vmem>>, vector<128x64xf32>
    %cst_172 = arith.constant dense<0.000000e+00> : vector<6x64xf32>
    %484 = tpu.matmul %482, %483, %cst_172 {dimension_numbers = #tpu.dot_dimension_numbers<[1], [0], [0], [1], [0, 0, 1, 1], [], []>} : vector<6x128xf32>, vector<128x64xf32>, vector<6x64xf32> -> vector<6x64xf32>
    %485 = arith.addf %415, %484 : vector<6x64xf32>
    %c22 = arith.constant 22 : index
    %c0_173 = arith.constant 0 : index
    %486 = vector.load %arg2[%c22, %c0_173] : memref<24x128xf32, #tpu.memory_space<vmem>>, vector<1x64xf32>
    %487 = vector.broadcast %486 : vector<1x64xf32> to vector<6x64xf32>
    %488 = arith.addf %485, %487 : vector<6x64xf32>
    %489 = tpu.iota {dimensions = array<i32: 0>} : vector<8x6xi32>
    %490 = tpu.iota {dimensions = array<i32: 1>} : vector<8x6xi32>
    %c0_i32_174 = arith.constant 0 : i32
    %491 = vector.broadcast %c0_i32_174 : i32 to vector<8x6xi32>
    %492 = arith.cmpi slt, %489, %491 : vector<8x6xi32>
    %c0_i32_175 = arith.constant 0 : i32
    %493 = vector.broadcast %c0_i32_175 : i32 to vector<8x6xi32>
    %494 = arith.cmpi slt, %489, %493 : vector<8x6xi32>
    %c0_i32_176 = arith.constant 0 : i32
    %495 = vector.broadcast %c0_i32_176 : i32 to vector<8x6xi32>
    %496 = arith.cmpi eq, %489, %495 : vector<8x6xi32>
    %c1_i32 = arith.constant 1 : i32
    %497 = vector.broadcast %c1_i32 : i32 to vector<8x6xi32>
    %498 = arith.cmpi eq, %490, %497 : vector<8x6xi32>
    %499 = arith.andi %496, %498 : vector<8x6xi1>
    %500 = arith.ori %492, %499 : vector<8x6xi1>
    %c0_i32_177 = arith.constant 0 : i32
    %501 = vector.broadcast %c0_i32_177 : i32 to vector<8x6xi32>
    %502 = arith.cmpi eq, %489, %501 : vector<8x6xi32>
    %c1_i32_178 = arith.constant 1 : i32
    %503 = vector.broadcast %c1_i32_178 : i32 to vector<8x6xi32>
    %504 = arith.cmpi eq, %490, %503 : vector<8x6xi32>
    %505 = arith.andi %502, %504 : vector<8x6xi1>
    %506 = arith.ori %494, %505 : vector<8x6xi1>
    %c2_i32 = arith.constant 2 : i32
    %507 = vector.broadcast %c2_i32 : i32 to vector<8x6xi32>
    %508 = arith.cmpi eq, %489, %507 : vector<8x6xi32>
    %c2_i32_179 = arith.constant 2 : i32
    %509 = vector.broadcast %c2_i32_179 : i32 to vector<8x6xi32>
    %510 = arith.cmpi eq, %490, %509 : vector<8x6xi32>
    %511 = arith.andi %508, %510 : vector<8x6xi1>
    %512 = arith.ori %506, %511 : vector<8x6xi1>
    %c1_i32_180 = arith.constant 1 : i32
    %513 = vector.broadcast %c1_i32_180 : i32 to vector<8x6xi32>
    %514 = arith.cmpi eq, %489, %513 : vector<8x6xi32>
    %c4_i32 = arith.constant 4 : i32
    %515 = vector.broadcast %c4_i32 : i32 to vector<8x6xi32>
    %516 = arith.cmpi eq, %490, %515 : vector<8x6xi32>
    %517 = arith.andi %514, %516 : vector<8x6xi1>
    %518 = arith.ori %500, %517 : vector<8x6xi1>
    %c1_i32_181 = arith.constant 1 : i32
    %519 = vector.broadcast %c1_i32_181 : i32 to vector<8x6xi32>
    %520 = arith.cmpi eq, %489, %519 : vector<8x6xi32>
    %c4_i32_182 = arith.constant 4 : i32
    %521 = vector.broadcast %c4_i32_182 : i32 to vector<8x6xi32>
    %522 = arith.cmpi eq, %490, %521 : vector<8x6xi32>
    %523 = arith.andi %520, %522 : vector<8x6xi1>
    %524 = arith.ori %512, %523 : vector<8x6xi1>
    %c3_i32_183 = arith.constant 3 : i32
    %525 = vector.broadcast %c3_i32_183 : i32 to vector<8x6xi32>
    %526 = arith.cmpi eq, %489, %525 : vector<8x6xi32>
    %c5_i32 = arith.constant 5 : i32
    %527 = vector.broadcast %c5_i32 : i32 to vector<8x6xi32>
    %528 = arith.cmpi eq, %490, %527 : vector<8x6xi32>
    %529 = arith.andi %526, %528 : vector<8x6xi1>
    %530 = arith.ori %524, %529 : vector<8x6xi1>
    %cst_184 = arith.constant 1.000000e+00 : f32
    %cst_185 = arith.constant 0.000000e+00 : f32
    %531 = vector.broadcast %cst_184 : f32 to vector<8x6xf32>
    %532 = vector.broadcast %cst_185 : f32 to vector<8x6xf32>
    %533 = arith.select %518, %531, %532 : vector<8x6xi1>, vector<8x6xf32>
    %cst_186 = arith.constant 1.000000e+00 : f32
    %cst_187 = arith.constant 0.000000e+00 : f32
    %534 = vector.broadcast %cst_186 : f32 to vector<8x6xf32>
    %535 = vector.broadcast %cst_187 : f32 to vector<8x6xf32>
    %536 = arith.select %530, %534, %535 : vector<8x6xi1>, vector<8x6xf32>
    %cst_188 = arith.constant dense<0.000000e+00> : vector<8x64xf32>
    %537 = tpu.matmul %533, %488, %cst_188 {dimension_numbers = #tpu.dot_dimension_numbers<[1], [0], [0], [1], [0, 0, 1, 1], [], []>} : vector<8x6xf32>, vector<6x64xf32>, vector<8x64xf32> -> vector<8x64xf32>
    %cst_189 = arith.constant dense<0.000000e+00> : vector<8x64xf32>
    %538 = tpu.matmul %536, %488, %cst_189 {dimension_numbers = #tpu.dot_dimension_numbers<[1], [0], [0], [1], [0, 0, 1, 1], [], []>} : vector<8x6xf32>, vector<6x64xf32>, vector<8x64xf32> -> vector<8x64xf32>
    %c0_190 = arith.constant 0 : index
    %c0_191 = arith.constant 0 : index
    %539 = vector.load %arg4[%c0_190, %c0_191] : memref<136x256xf32, #tpu.memory_space<vmem>>, vector<64x256xf32>
    %cst_192 = arith.constant dense<0.000000e+00> : vector<8x256xf32>
    %540 = tpu.matmul %537, %539, %cst_192 {dimension_numbers = #tpu.dot_dimension_numbers<[1], [0], [0], [1], [0, 0, 1, 1], [], []>} : vector<8x64xf32>, vector<64x256xf32>, vector<8x256xf32> -> vector<8x256xf32>
    %c64_193 = arith.constant 64 : index
    %c0_194 = arith.constant 0 : index
    %541 = vector.load %arg4[%c64_193, %c0_194] : memref<136x256xf32, #tpu.memory_space<vmem>>, vector<64x256xf32>
    %cst_195 = arith.constant dense<0.000000e+00> : vector<8x256xf32>
    %542 = tpu.matmul %538, %541, %cst_195 {dimension_numbers = #tpu.dot_dimension_numbers<[1], [0], [0], [1], [0, 0, 1, 1], [], []>} : vector<8x64xf32>, vector<64x256xf32>, vector<8x256xf32> -> vector<8x256xf32>
    %543 = arith.addf %540, %542 : vector<8x256xf32>
    %c128 = arith.constant 128 : index
    %c0_196 = arith.constant 0 : index
    %544 = vector.load %arg4[%c128, %c0_196] : memref<136x256xf32, #tpu.memory_space<vmem>>, vector<1x256xf32>
    %545 = vector.broadcast %544 : vector<1x256xf32> to vector<8x256xf32>
    %546 = arith.addf %543, %545 : vector<8x256xf32>
    %c0_197 = arith.constant 0 : index
    %c0_198 = arith.constant 0 : index
    %547 = vector.load %arg5[%c0_197, %c0_198] : memref<8x256xf32, #tpu.memory_space<vmem>>, vector<8x256xf32>
    tpu.vector_store %arg5[%c0_197, %c0_198], %546 {strides = array<i32>} : memref<8x256xf32, #tpu.memory_space<vmem>>, vector<8x256xf32>,
    return
  }
  func.func @transform_0(%arg0: i32) -> (i32, i32, i32) {
    %c0_i32 = arith.constant 0 : i32
    %c0_i32_0 = arith.constant 0 : i32
    %c0_i32_1 = arith.constant 0 : i32
    %c0_i32_2 = arith.constant 0 : i32
    return %c0_i32, %c0_i32_0, %c0_i32_1 : i32, i32, i32
  }
  func.func @transform_1(%arg0: i32) -> (i32, i32) {
    %c0_i32 = arith.constant 0 : i32
    %c0_i32_0 = arith.constant 0 : i32
    %c0_i32_1 = arith.constant 0 : i32
    return %c0_i32, %c0_i32_0 : i32, i32
  }
  func.func @transform_2(%arg0: i32) -> (i32, i32) {
    %c0_i32 = arith.constant 0 : i32
    %c0_i32_0 = arith.constant 0 : i32
    %c0_i32_1 = arith.constant 0 : i32
    return %c0_i32, %c0_i32_0 : i32, i32
  }
  func.func @transform_3(%arg0: i32) -> (i32, i32) {
    %c0_i32 = arith.constant 0 : i32
    %c0_i32_0 = arith.constant 0 : i32
    %c0_i32_1 = arith.constant 0 : i32
    return %c0_i32, %c0_i32_0 : i32, i32
  }
  func.func @transform_4(%arg0: i32) -> (i32, i32) {
    %c0_i32 = arith.constant 0 : i32
    %c0_i32_0 = arith.constant 0 : i32
    %c0_i32_1 = arith.constant 0 : i32
    return %c0_i32, %c0_i32_0 : i32, i32
  }
}

</mosaic_0001>

<bundles_post_ra>
// kernel: smpl_head_forward.1
= control target key start
LH: loop header
LB: loop body
LE: loop exit
PB: predicated region body
PF: predicated region fallthrough
CT: control target
= control target key end

     0   :  { %9 = vsyncpa [#allocation3], 0  ;;  %s2136_s18 = smov [#allocation2]   ;;  %s2137_s20 = smov 128   ;;  %s2658_s0 = inlined_call_operand.vmem [shape: f32[4,32,64], index: 0, kind: input, shape index: {}]   ;;  %s2659_s1 = inlined_call_operand.vmem [shape: f32[24,128], index: 1, kind: input, shape index: {}]   ;;  %s2660_s2 = inlined_call_operand.hbm [shape: f32[896,128], index: 2, kind: input, shape index: {}]   ;;  %s2661_s3 = inlined_call_operand.vmem [shape: f32[136,256], index: 3, kind: input, shape index: {}]   ;;  %s2662_s4 = inlined_call_operand.vmem [shape: f32[8,256], index: 4, kind: output, shape index: {}]  }
   0x1   :  { %s18_s17 = sshll.u32 %s2660_s2, 4  ;;  %s20_s19 = sshll.u32 %s2136_s18, 4  ;;  %s19_s17 = int_to_ptr.hbm [resolvable:$true] %s18_s17  ;;  %s21_s19 = int_to_ptr.vmem [resolvable:$true] %s20_s19 }
   0x2   :  { %s2138_s21 = smov 8  }
   0x3   :  { %26 = dma.hbm_to_vmem [thread:$0]  %s19_s17, 14336, %s21_s19, [#allocation3], %s2137_s20, %s2137_s20, %s2138_s21  }
   0x4   :  { %2134 = dma.done.wait [#allocation3], 14336  }
   0x5   :  { %2135 = vsyncadd [#allocation3], 4294952960  ;;  %vm335_vm0 = vcmask 1042432   ;;  %v331_v0 = vld [vmem:[%s2659_s1] sm:$0x7]  ;;  %vm339_vm1 = vcmask 521216   ;;  %v33_v43 = vlaneseq }
   0x6   :  { %v333_v1 = vrot.slane %v331_v0, 5  ;;  %v2139_v4 = vmov 64.0   ;;  %v380_v16 = vld [vmem:[#allocation2 + $0x38] sm:$0xff]  ;;  %v379_v17 = vld [vmem:[#allocation2 + $0x30] sm:$0xff]  ;;  %v378_v18 = vld [vmem:[#allocation2 + $0x28] sm:$0xff]  ;;  %vm127_vm6 = vcmask 523264  }
   0x7   :  { %2048 = vrcp.f32 %v2139_v4  ;;  %392 = vmatpush.msra.mxu2 %v380_v16  ;;  %v377_v19 = vld [vmem:[#allocation2 + $0x20] sm:$0xff]  ;;  %v376_v20 = vld [vmem:[#allocation2 + $0x18] sm:$0xff]  ;;  %v375_v21 = vld [vmem:[#allocation2 + $0x10] sm:$0xff]  ;;  %s2140_s27 = smov 80   ;;  %s2141_s28 = smov 64   ;;  %vm407_vm7 = vcmask 130048  }
   0x8   :  { %v2179_v2 = vsel %vm335_vm0, %v331_v0, %v333_v1  ;;  %v374_v22 = vld [vmem:[#allocation2 + $0x8] sm:$0xff]  ;;  %v373_v23 = vld [vmem:[#allocation2] sm:$0xff]  ;;  %s2142_s29 = smov 96   ;;  %vm452_vm8 = vcmask 1045504   ;;  %v2203_v44 = vshrl.u32 %v33_v43, 7  ;;  %v2205_v45 = vand.u32 127, %v33_v43 }
   0x9   :  { %v340_v3 = vsel %vm339_vm1, %v2179_v2, 0.0  ;;  %393 = vmatpush.msra.mxu2 %v379_v17  ;;  %v2028_v33 = vld [vmem:[%s2659_s1 + $0x3] ss:$0 sm:$0xff]  ;;  %v2029_v36 = vld [vmem:[%s2659_s1 + $0x4] ss:$0 sm:$0xff]  ;;  %s2144_s30 = smov 48  }
   0xa   :  { %341 = vadd.xlane.f32.xlu0 %v340_v3  ;;  %vm46_vm9 = vcmp.ge.s32.totalorder %v2203_v44, 3  ;;  %vm47_vm10 = vcmp.lt.s32.totalorder %v2203_v44, 6  ;;  %vm49_vm12 = vcmp.ge.s32.totalorder %v2205_v45, 3  ;;  %vm39_vm13 = vcmp.lt.s32.totalorder %v2203_v44, 3  ;;  %s2145_s5 = smov 112   ;;  %v549_v16 = vld [vmem:[#allocation2 + $0x48] sm:$0xff] }
   0xb   :  { %394 = vmatpush.msra.mxu2 %v378_v18  ;;  %vm2209_vm11 = vmand %vm46_vm9, %vm47_vm10  ;;  %vm43_vm14 = vcmp.lt.s32.totalorder %v2205_v45, 3  ;;  %vm51_vm0 = vcmp.lt.s32.totalorder %v2205_v45, 6  ;;  %v2143_v48 = vmov -1e+30   ;;  %vm448_vm9 = vcmask 48128   ;;  %s2146_s6 = smov 16  }
   0xc   :  { %vm50_vm15 = vmand %vm2209_vm11, %vm49_vm12  ;;  %v548_v18 = vld [vmem:[#allocation2 + $0x40] sm:$0xff]  ;;  %vm152_vm10 = vcmask 261120  }
   0xd   :  { %v2049_v5 = vpop.eup %2048  ;;  %395 = vmatpush.msra.mxu2 %v377_v19 }
   0xe   :  { %v344_v6 = vmul.f32 64.0, %v2049_v5  ;;  %vm348_vm2 = vweird.f32 %v2049_v5 }
   0xf   :  { %396 = vmatpush.msra.mxu2 %v376_v20 }
  0x10   :  { %v345_v7 = vsub.f32 1.0, %v344_v6 }
  0x11   :  { %397 = vmatpush.msra.mxu2 %v375_v21  ;;  %v2030_v21 = vld [vmem:[%s2659_s1 + $0x5] ss:$0 sm:$0xff] }
  0x12   :  { %v346_v8 = vmul.f32 %v2049_v5, %v345_v7 }
  0x13   :  { %398 = vmatpush.msra.mxu2 %v374_v22 }
  0x14   :  { %v347_v9 = vadd.f32 %v2049_v5, %v346_v8 }
  0x15   :  { %399 = vmatpush.msra.mxu2 %v373_v23 }
  0x16   :  { %v2183_v10 = vsel %vm348_vm2, %v2049_v5, %v347_v9  ;;  %vm44_vm2 = vmand %vm39_vm13, %vm43_vm14 }
  0x7d   :  { %v342_v11 = vpop.xlane.xlu0 %341 }
  0x7e   :  { %v350_v12 = vmul.f32 %v2183_v10, %v342_v11 }
  0x80   :  { %v351_v13 = vsub.f32 %v2179_v2, %v350_v12 }
  0x82   :  { %v352_v14 = vmul.f32 %v351_v13, %v351_v13 }
  0x84   :  { %v353_v15 = vsel %vm339_vm1, %v352_v14, 0.0  ;;  %v551_v14 = vld [vmem:[#allocation2 + $0x58] sm:$0xff] }
  0x85   :  { %354 = vadd.xlane.f32.xlu0 %v353_v15  ;;  %v550_v15 = vld [vmem:[#allocation2 + $0x50] sm:$0xff] }
  0xf8   :  { %v355_v24 = vpop.xlane.xlu0 %354 }
  0xf9   :  { %v356_v25 = vmul.f32 %v355_v24, %v2183_v10 }
  0xfb   :  { %v357_v26 = vadd.f32 1e-05, %v356_v25 }
  0xfd   :  { %2050 = vrsqrt.f32 %v357_v26  ;;  %vm364_vm4 = vweird.f32 %v357_v26 }
 0x103   :  { %v2051_v27 = vpop.eup %2050 }
 0x104   :  { %v359_v28 = vmul.f32 %v2051_v27, %v357_v26  ;;  %vm365_vm3 = vweird.f32 %v2051_v27  ;;  %v1911_v26 = vld [vmem:[%s2658_s0 + $0x50] sm:$0xff] }
 0x105   :  { %vm366_vm5 = vmor %vm364_vm4, %vm365_vm3 }
 0x106   :  { %v360_v29 = vmul.f32 %v2051_v27, %v359_v28  ;;  %vm52_vm3 = vmand %vm50_vm15, %vm51_vm0  ;;  %v1909_v28 = vld [vmem:[%s2658_s0 + $0x40] sm:$0xff] }
 0x107   :  { %vm53_vm4 = vmor %vm44_vm2, %vm52_vm3 }
 0x108   :  { %v361_v30 = vmul.f32 0.5, %v360_v29  ;;  %v2222_v49 = vsel %vm53_vm4, 0.0, %v2143_v48 }
 0x10a   :  { %v362_v31 = vsub.f32 1.5, %v361_v30 }
 0x10c   :  { %v363_v32 = vmul.f32 %v2051_v27, %v362_v31  ;;  %v1917_v31 = vld [vmem:[%s2658_s0 + $0x60] sm:$0xff] }
 0x10e   :  { %v367_v34 = vsel %vm366_vm5, %v2051_v27, %v363_v32  ;;  %vm434_vm5 = vcmask 46080   ;;  %v1912_v27 = vld [vmem:[%s2658_s0 + $0x58] sm:$0xff]  ;;  %v1918_v32 = vld [vmem:[%s2658_s0 + $0x68] sm:$0xff] }
 0x10f   :  { %v368_v35 = vmul.f32 %v367_v34, %v351_v13  ;;  %v2008_v29 = vpack.i.bf16 %v1911_v26, %v1912_v27  ;;  %v1913_v26 = vld [vmem:[%s2658_s0 + $0x20] sm:$0xff] }
 0x111   :  { %v370_v37 = vmul.f32 %v2028_v33, %v368_v35  ;;  %v2023_v33 = vpack.i.bf16 %v1917_v31, %v1918_v32  ;;  %v2031_v32 = vld [vmem:[%s2659_s1 + $0x6] ss:$0 sm:$0xff] }
 0x113   :  { %v372_v38 = vadd.f32 %v2029_v36, %v370_v37 }
 0x115   :  { %1953 = vmatmul.msk.f32.vlgmr.msra.gmra.mxu2 %vm127_vm6, %v372_v38 }
 0x198   :  { %v401_v39 = vpop.f32.mrf.mxu2 }
 0x199   :  { %477 = vrot.lane.b32.xlu0 %v401_v39, %s2140_s27  ;;  %446 = vrot.lane.b32.xlu2 %v401_v39, %s2141_s28 }
 0x19a   :  { %405 = vrot.lane.b32.xlu1 %v401_v39, %s2142_s29 }
 0x1f3   :  { %v447_v41 = vpop.permute.xlu2 %446 }
 0x20b   :  { %v478_v42 = vpop.permute.xlu0 %477 }
 0x20c   :  { %v406_v40 = vpop.permute.xlu1 %405 }
 0x20d   :  { %1954 = vmatpush.xpose.msk.msra.mxu3 %vm407_vm7, %v406_v40  ;;  %v1920_v40 = vld [vmem:[%s2658_s0 + $0x78] sm:$0xff] }
 0x210   :  { %1955 = vmatmul.msk.f32.vlgmr.msra.gmra.mxu3 %vm407_vm7, %v401_v39 }
 0x211   :  { %1956 = vmatpush.msk.msrb.mxu3 %vm452_vm8, %v447_v41 }
 0x213   :  { %1958 = vmatpush.xpose.msk.msra.mxu3 %vm407_vm7, %v478_v42 }
 0x293   :  { %v429_v47 = vpop.f32.mrf.mxu3 }
 0x294   :  { %v432_v50 = vmul.f32 0.25, %v429_v47  ;;  %v79_v47 = vld [vmem:[%s2658_s0 + $0x18] sm:$0xff] }
 0x296   :  { %v433_v51 = vadd.f32 %v432_v50, %v2222_v49 }
 0x298   :  { %v435_v52 = vsel %vm434_vm5, %v433_v51, -inf }
 0x299   :  { %436 = vmax.xlane.f32.xlu1 %v435_v52 }
 0x2b2   :  { %516 = vrot.lane.b32.xlu1 %v401_v39, %s2144_s30 }
 0x30c   :  { %v437_v53 = vpop.xlane.xlu1 %436 }
 0x30d   :  { %v438_v54 = vsub.f32 %v433_v51, %v437_v53  ;;  %v78_v53 = vld [vmem:[%s2658_s0 + $0x10] sm:$0xff] }
 0x30f   :  { %v439_v55 = vmul.f32 1.442695, %v438_v54 }
 0x311   :  { %2052 = vpow2.f32 %v439_v55 }
 0x317   :  { %v2053_v56 = vpop.eup %2052 }
 0x318   :  { %v441_v57 = vsel %vm434_vm5, %v2053_v56, 0.0 }
 0x319   :  { %442 = vadd.xlane.f32.xlu2 %v441_v57 }
 0x324   :  { %v517_v61 = vpop.permute.xlu1 %516 }
 0x331   :  { %475 = vrot.lane.b32.xlu2 %v401_v39, %s2145_s5  ;;  %v1919_v39 = vld [vmem:[%s2658_s0 + $0x70] sm:$0xff] }
 0x332   :  { %v2018_v41 = vpack.i.bf16 %v1919_v39, %v1920_v40 }
 0x38c   :  { %v443_v58 = vpop.xlane.xlu2 %442 }
 0x38d   :  { %2054 = vrcp.f32 %v443_v58 }
 0x393   :  { %v2055_v59 = vpop.eup %2054 }
 0x394   :  { %v445_v60 = vmul.f32 %v2055_v59, %v2053_v56  ;;  %v476_v62 = vpop.permute.xlu2 %475  ;;  %v77_v56 = vld [vmem:[%s2658_s0 + $0x8] sm:$0xff]  ;;  %v76_v59 = vld [vmem:[%s2658_s0] sm:$0xff] }
 0x396   :  { %1957 = vmatmul.msk.f32.vlgmr.msrb.gmra.mxu3 %vm448_vm9, %v445_v60 }
 0x397   :  { %1960 = vmatpush.msk.msrb.mxu3 %vm452_vm8, %v517_v61  ;;  %v136_v61 = vld [vmem:[#allocation2 + $0x300] sm:$0xff] }
 0x39e   :  { %1959 = vmatmul.msk.f32.vlgmr.msra.gmra.mxu3 %vm407_vm7, %v476_v62  ;;  %v614_v62 = vld [vmem:[#allocation2 + $0x98] sm:$0xff] }
 0x39f   :  { %567 = vmatpush.msra.mxu3 %v551_v14  ;;  %626 = vmatpush.msrb.mxu2 %v614_v62  ;;  %v1916_v14 = vld [vmem:[%s2658_s0 + $0x38] sm:$0xff] }
 0x3a1   :  { %568 = vmatpush.msra.mxu3 %v550_v15  ;;  %v1915_v15 = vld [vmem:[%s2658_s0 + $0x30] sm:$0xff] }
 0x3a3   :  { %569 = vmatpush.msra.mxu3 %v549_v16 }
 0x3a5   :  { %570 = vmatpush.msra.mxu3 %v548_v18 }
 0x419   :  { %v472_v63 = vpop.f32.mrf.mxu3 }
 0x421   :  { %v500_v0 = vpop.f32.mrf.mxu3 }
 0x422   :  { %v503_v1 = vmul.f32 0.25, %v500_v0  ;;  %v612_v0 = vld [vmem:[#allocation2 + $0x88] sm:$0xff] }
 0x424   :  { %v504_v3 = vadd.f32 %v503_v1, %v2222_v49  ;;  %v611_v1 = vld [vmem:[#allocation2 + $0x80] sm:$0xff] }
 0x426   :  { %v505_v4 = vsel %vm434_vm5, %v504_v3, -inf }
 0x427   :  { %506 = vmax.xlane.f32.xlu0 %v505_v4  ;;  %v610_v4 = vld [vmem:[#allocation2 + $0x78] sm:$0xff] }
 0x49a   :  { %v507_v5 = vpop.xlane.xlu0 %506 }
 0x49b   :  { %v508_v6 = vsub.f32 %v504_v3, %v507_v5  ;;  %v137_v3 = vld [vmem:[#allocation2 + $0x308] sm:$0xff]  ;;  %v609_v5 = vld [vmem:[#allocation2 + $0x70] sm:$0xff] }
 0x49d   :  { %v509_v7 = vmul.f32 1.442695, %v508_v6  ;;  %v608_v6 = vld [vmem:[#allocation2 + $0x68] sm:$0xff] }
 0x49f   :  { %2056 = vpow2.f32 %v509_v7  ;;  %v607_v7 = vld [vmem:[#allocation2 + $0x60] sm:$0xff] }
 0x4a5   :  { %v2057_v8 = vpop.eup %2056 }
 0x4a6   :  { %v511_v9 = vsel %vm434_vm5, %v2057_v8, 0.0 }
 0x4a7   :  { %512 = vadd.xlane.f32.xlu2 %v511_v9 }
 0x51a   :  { %v513_v11 = vpop.xlane.xlu2 %512 }
 0x51b   :  { %2058 = vrcp.f32 %v513_v11 }
 0x521   :  { %v2059_v12 = vpop.eup %2058 }
 0x522   :  { %v515_v13 = vmul.f32 %v2059_v12, %v2057_v8 }
 0x524   :  { %1961 = vmatmul.msk.f32.vlgmr.msrb.gmra.mxu3 %vm448_vm9, %v515_v13 }
 0x5a7   :  { %v540_v17 = vpop.f32.mrf.mxu3 }
 0x5a8   :  { %544 = vrot.lane.b32.xlu1 %v540_v17, %s2146_s6 }
 0x5b0   :  { %2009 = vrot.lane.b32.xlu1 %v2008_v29, %s2141_s28 }
 0x5b8   :  { %2024 = vrot.lane.b32.xlu1 %v2023_v33, %s2141_s28 }
 0x61a   :  { %v545_v19 = vpop.permute.xlu1 %544 }
 0x61b   :  { %v547_v20 = vsel %vm407_vm7, %v472_v63, %v545_v19  ;;  %v613_v63 = vld [vmem:[#allocation2 + $0x90] sm:$0xff]  ;;  %v1914_v19 = vld [vmem:[%s2658_s0 + $0x28] sm:$0xff] }
 0x61c   :  { %1962 = vmatmul.msk.f32.vlgmr.msra.gmra.mxu3 %vm152_vm10, %v547_v20  ;;  %627 = vmatpush.msrb.mxu2 %v613_v63 }
 0x61e   :  { %628 = vmatpush.msrb.mxu2 %v612_v0 }
 0x620   :  { %629 = vmatpush.msrb.mxu2 %v611_v1 }
 0x622   :  { %v2010_v42 = vpop.permute.xlu1 %2009  ;;  %630 = vmatpush.msrb.mxu2 %v610_v4 }
 0x623   :  { %v2011_v43 = vunpack.i.l.bf16 %v2010_v42  ;;  %v2012_v50 = vunpack.i.h.bf16 %v2010_v42 }
 0x624   :  { %631 = vmatpush.msrb.mxu2 %v609_v5 }
 0x625   :  { %v131_v51 = vsel %vm127_vm6, %v79_v47, %v2011_v43  ;;  %v130_v55 = vsel %vm127_vm6, %v78_v53, %v2012_v50  ;;  %v139_v47 = vld [vmem:[#allocation2 + $0x318] sm:$0xff]  ;;  %v140_v50 = vld [vmem:[#allocation2 + $0x320] sm:$0xff]  ;;  %v2339_v53 = vsel %vm39_vm13, 0.0, %v2143_v48 }
 0x626   :  { %213 = vmatpush.msra.mxu0 %v131_v51  ;;  %632 = vmatpush.msrb.mxu2 %v608_v6 }
 0x628   :  { %214 = vmatpush.msra.mxu0 %v130_v55  ;;  %633 = vmatpush.msrb.mxu2 %v607_v7  ;;  %v2344_v55 = vsel %vm2209_vm11, 0.0, %v2143_v48 }
 0x62a   :  { %v2025_v12 = vpop.permute.xlu1 %2024 }
 0x62b   :  { %v2026_v18 = vunpack.i.l.bf16 %v2025_v12 }
 0x62d   :  { %v133_v27 = vsel %vm127_vm6, %v1914_v19, %v2026_v18 }
 0x69f   :  { %v572_v22 = vpop.f32.mrf.mxu3 }
 0x6a0   :  { %v575_v23 = vadd.f32 %v572_v22, %v2179_v2  ;;  %v1910_v2 = vld [vmem:[%s2658_s0 + $0x48] sm:$0xff]  ;;  %v2027_v22 = vunpack.i.h.bf16 %v2025_v12 }
 0x6a1   :  { %v2013_v30 = vpack.i.bf16 %v1909_v28, %v1910_v2 }
 0x6a2   :  { %v2243_v24 = vadd.f32 %v2030_v21, %v575_v23  ;;  %v132_v29 = vsel %vm127_vm6, %v1913_v26, %v2027_v22  ;;  %v142_v22 = vld [vmem:[#allocation2 + $0x330] sm:$0xff] }
 0x6a4   :  { %v581_v25 = vsel %vm339_vm1, %v2243_v24, 0.0 }
 0x6a5   :  { %582 = vadd.xlane.f32.xlu0 %v581_v25 }
 0x6b9   :  { %2014 = vrot.lane.b32.xlu0 %v2013_v30, %s2141_s28 }
 0x718   :  { %v583_v34 = vpop.xlane.xlu0 %582 }
 0x719   :  { %v584_v35 = vmul.f32 %v583_v34, %v2183_v10 }
 0x71b   :  { %v2270_v36 = vsub.f32 %v2243_v24, %v584_v35  ;;  %v2032_v35 = vld [vmem:[%s2659_s1 + $0x7] ss:$0 sm:$0xff] }
 0x71d   :  { %v586_v37 = vmul.f32 %v2270_v36, %v2270_v36 }
 0x71f   :  { %v587_v38 = vsel %vm339_vm1, %v586_v37, 0.0 }
 0x720   :  { %588 = vadd.xlane.f32.xlu2 %v587_v38 }
 0x72b   :  { %v2015_v52 = vpop.permute.xlu0 %2014 }
 0x72c   :  { %v2016_v54 = vunpack.i.l.bf16 %v2015_v52  ;;  %v2017_v57 = vunpack.i.h.bf16 %v2015_v52 }
 0x72e   :  { %v129_v58 = vsel %vm127_vm6, %v77_v56, %v2016_v54  ;;  %v128_v60 = vsel %vm127_vm6, %v76_v59, %v2017_v57  ;;  %v141_v54 = vld [vmem:[#allocation2 + $0x328] sm:$0xff] }
 0x72f   :  { %215 = vmatpush.msra.mxu0 %v129_v58 }
 0x731   :  { %216 = vmatpush.msra.mxu0 %v128_v60 }
 0x732   :  { %1921 = vmatmul.msk.f32.vlgmr.msra.gmra.mxu0 %vm152_vm10, %v136_v61 }
 0x738   :  { %2019 = vrot.lane.b32.xlu2 %v2018_v41, %s2141_s28 }
 0x73a   :  { %1922 = vmatmul.msk.f32.gmra.mxu0 %vm152_vm10, %v137_v3 }
 0x793   :  { %v589_v8 = vpop.xlane.xlu2 %588 }
 0x794   :  { %v590_v9 = vmul.f32 %v589_v8, %v2183_v10 }
 0x796   :  { %v591_v11 = vadd.f32 1e-05, %v590_v9 }
 0x798   :  { %2060 = vrsqrt.f32 %v591_v11  ;;  %vm598_vm14 = vweird.f32 %v591_v11 }
 0x79b   :  { %v2020_v13 = vpop.permute.xlu2 %2019 }
 0x79c   :  { %v2022_v16 = vunpack.i.h.bf16 %v2020_v13  ;;  %v2021_v17 = vunpack.i.l.bf16 %v2020_v13 }
 0x79e   :  { %v2061_v20 = vpop.eup %2060  ;;  %v135_v21 = vsel %vm127_vm6, %v1916_v14, %v2021_v17  ;;  %v134_v23 = vsel %vm127_vm6, %v1915_v15, %v2022_v16 }
 0x79f   :  { %v593_v25 = vmul.f32 %v2061_v20, %v591_v11  ;;  %278 = vmatpush.msra.mxu1 %v135_v21  ;;  %vm599_vm12 = vweird.f32 %v2061_v20 }
 0x7a0   :  { %vm600_vm15 = vmor %vm598_vm14, %vm599_vm12 }
 0x7a1   :  { %v594_v28 = vmul.f32 %v2061_v20, %v593_v25  ;;  %279 = vmatpush.msra.mxu1 %v134_v23  ;;  %v143_v23 = vld [vmem:[#allocation2 + $0x338] sm:$0xff] }
 0x7a3   :  { %v595_v2 = vmul.f32 0.5, %v594_v28  ;;  %280 = vmatpush.msra.mxu1 %v133_v27 }
 0x7a5   :  { %v596_v30 = vsub.f32 1.5, %v595_v2  ;;  %281 = vmatpush.msra.mxu1 %v132_v29 }
 0x7a6   :  { %1937 = vmatmul.msk.f32.vlgmr.msra.gmra.mxu1 %vm152_vm10, %v136_v61 }
 0x7a7   :  { %v597_v31 = vmul.f32 %v2061_v20, %v596_v30 }
 0x7a9   :  { %v601_v33 = vsel %vm600_vm15, %v2061_v20, %v597_v31 }
 0x7aa   :  { %v602_v34 = vmul.f32 %v601_v33, %v2270_v36  ;;  %v138_v36 = vld [vmem:[#allocation2 + $0x310] sm:$0xff] }
 0x7ab   :  { %1923 = vmatmul.msk.f32.gmra.mxu0 %vm152_vm10, %v138_v36 }
 0x7ac   :  { %v604_v37 = vmul.f32 %v2031_v32, %v602_v34 }
 0x7ae   :  { %v606_v38 = vadd.f32 %v2032_v35, %v604_v37  ;;  %1938 = vmatmul.msk.f32.gmra.mxu1 %vm152_vm10, %v137_v3 }
 0x7af   :  { %v218_v39 = vpop.f32.mrf.mxu0 }
 0x7b0   :  { %1963 = vmatmul.msk.f32.vlgmr.msrb.gmra.mxu2 %vm127_vm6, %v606_v38 }
 0x7b3   :  { %1924 = vmatmul.msk.f32.gmra.mxu0 %vm152_vm10, %v139_v47 }
 0x7b6   :  { %1939 = vmatmul.msk.f32.gmra.mxu1 %vm152_vm10, %v138_v36 }
 0x7b7   :  { %v221_v40 = vpop.f32.mrf.mxu0 }
 0x7b8   :  { %655 = vmatpush.msrb.mxu3 %v221_v40 }
 0x7ba   :  { %656 = vmatpush.msrb.mxu3 %v218_v39 }
 0x7bb   :  { %1925 = vmatmul.msk.f32.gmra.mxu0 %vm152_vm10, %v140_v50 }
 0x7be   :  { %1940 = vmatmul.msk.f32.gmra.mxu1 %vm152_vm10, %v139_v47 }
 0x7c3   :  { %1926 = vmatmul.msk.f32.gmra.mxu0 %vm152_vm10, %v141_v54 }
 0x7c6   :  { %1941 = vmatmul.msk.f32.gmra.mxu1 %vm152_vm10, %v140_v50 }
 0x7cb   :  { %1927 = vmatmul.msk.f32.gmra.mxu0 %vm152_vm10, %v142_v22 }
 0x7ce   :  { %1942 = vmatmul.msk.f32.gmra.mxu1 %vm152_vm10, %v141_v54 }
 0x7d3   :  { %1928 = vmatmul.msk.f32.gmra.mxu0 %vm152_vm10, %v143_v23 }
 0x7d6   :  { %1943 = vmatmul.msk.f32.gmra.mxu1 %vm152_vm10, %v142_v22  ;;  %v915_v22 = vld [vmem:[#allocation2 + $0xc0] sm:$0xff] }
 0x7de   :  { %1944 = vmatmul.msk.f32.gmra.mxu1 %vm152_vm10, %v143_v23 }
 0x823   :  { %v283_v41 = vpop.f32.mrf.mxu1 }
 0x828   :  { %v224_v63 = vpop.f32.mrf.mxu0 }
 0x82b   :  { %v286_v42 = vpop.f32.mrf.mxu1 }
 0x82c   :  { %675 = vmatpush.msra.mxu3 %v286_v42 }
 0x82e   :  { %676 = vmatpush.msra.mxu3 %v283_v41 }
 0x830   :  { %v227_v48 = vpop.f32.mrf.mxu0 }
 0x833   :  { %v635_v43 = vpop.f32.mrf.mxu2  ;;  %v289_v46 = vpop.f32.mrf.mxu1 }
 0x834   :  { %744 = vrot.lane.b32.xlu2 %v635_v43, %s2145_s5  ;;  %1964 = vmatmul.msk.f32.vlgmr.msrb.gmra.mxu3 %vm407_vm7, %v635_v43 }
 0x838   :  { %v230_v3 = vpop.f32.mrf.mxu0 }
 0x83b   :  { %v292_v0 = vpop.f32.mrf.mxu1 }
 0x83c   :  { %1965 = vmatmul.msk.f32.vlgmr.msra.gmra.mxu3 %vm407_vm7, %v635_v43 }
 0x840   :  { %v233_v9 = vpop.f32.mrf.mxu0 }
 0x841   :  { %718 = vmatpush.xpose.msra.mxu2 %v233_v9 }
 0x843   :  { %v295_v6 = vpop.f32.mrf.mxu1 }
 0x845   :  { %719 = vmatpush.xpose.msra.mxu2 %v230_v3 }
 0x848   :  { %v236_v37 = vpop.f32.mrf.mxu0 }
 0x849   :  { %762 = vmatpush.msrb.mxu2 %v227_v48 }
 0x84b   :  { %v298_v11 = vpop.f32.mrf.mxu1  ;;  %763 = vmatpush.msrb.mxu2 %v224_v63  ;;  %v857_v63 = vld [vmem:[#allocation2 + $0xa8] sm:$0xff] }
 0x84c   :  { %738 = vmatpush.xpose.msrb.mxu3 %v298_v11 }
 0x850   :  { %739 = vmatpush.xpose.msrb.mxu3 %v295_v6  ;;  %v239_v39 = vpop.f32.mrf.mxu0 }
 0x853   :  { %v301_v38 = vpop.f32.mrf.mxu1 }
 0x854   :  { %782 = vmatpush.msra.mxu3 %v292_v0 }
 0x856   :  { %783 = vmatpush.msra.mxu3 %v289_v46 }
 0x85b   :  { %v304_v40 = vpop.f32.mrf.mxu1 }
 0x88e   :  { %v745_v21 = vpop.permute.xlu2 %744 }
 0x8b7   :  { %v658_v51 = vpop.f32.mrf.mxu3 }
 0x8b8   :  { %v681_v52 = vmul.f32 0.25, %v658_v51 }
 0x8ba   :  { %v683_v57 = vadd.f32 %v681_v52, %v2339_v53 }
 0x8bc   :  { %v685_v60 = vsel %vm452_vm8, %v683_v57, -inf }
 0x8bf   :  { %v678_v56 = vpop.f32.mrf.mxu3 }
 0x8c0   :  { %v682_v58 = vmul.f32 0.25, %v678_v56 }
 0x8c2   :  { %v684_v59 = vadd.f32 %v682_v58, %v2344_v55 }
 0x8c4   :  { %v686_v61 = vsel %vm452_vm8, %v684_v59, -inf }
 0x8c5   :  { %v687_v62 = vmax.f32 %v685_v60, %v686_v61  ;;  %v859_v61 = vld [vmem:[#allocation2 + $0xb8] sm:$0xff] }
 0x8c7   :  { %688 = vmax.xlane.f32.xlu1 %v687_v62  ;;  %v858_v62 = vld [vmem:[#allocation2 + $0xb0] sm:$0xff] }
 0x93a   :  { %v689_v1 = vpop.xlane.xlu1 %688 }
 0x93b   :  { %v690_v4 = vsub.f32 %v683_v57, %v689_v1  ;;  %v691_v5 = vsub.f32 %v684_v59, %v689_v1  ;;  %v856_v1 = vld [vmem:[#allocation2 + $0xa0] sm:$0xff] }
 0x93d   :  { %v692_v7 = vmul.f32 1.442695, %v690_v4  ;;  %v694_v8 = vmul.f32 1.442695, %v691_v5  ;;  %v2033_v5 = vld [vmem:[%s2659_s1 + $0x8] ss:$0 sm:$0xff] }
 0x93f   :  { %2062 = vpow2.f32 %v692_v7 }
 0x940   :  { %2064 = vpow2.f32 %v694_v8 }
 0x945   :  { %v2063_v12 = vpop.eup %2062 }
 0x946   :  { %v2065_v13 = vpop.eup %2064  ;;  %v696_v14 = vsel %vm452_vm8, %v2063_v12, 0.0 }
 0x947   :  { %v697_v15 = vsel %vm452_vm8, %v2065_v13, 0.0 }
 0x948   :  { %v698_v16 = vadd.f32 %v697_v15, %v696_v14 }
 0x94a   :  { %699 = vadd.xlane.f32.xlu0 %v698_v16  ;;  %v922_v16 = vld [vmem:[#allocation2 + $0xf8] sm:$0xff] }
 0x9bd   :  { %v700_v17 = vpop.xlane.xlu0 %699 }
 0x9be   :  { %2066 = vrcp.f32 %v700_v17  ;;  %v921_v17 = vld [vmem:[#allocation2 + $0xf0] sm:$0xff] }
 0x9c4   :  { %v2067_v18 = vpop.eup %2066 }
 0x9c5   :  { %v702_v19 = vmul.f32 %v2067_v18, %v2063_v12  ;;  %v703_v20 = vmul.f32 %v2067_v18, %v2065_v13  ;;  %v919_v18 = vld [vmem:[#allocation2 + $0xe0] sm:$0xff] }
 0x9c7   :  { %720 = vmatmul.f32.vlgmr.msra.gmra.mxu2 %v702_v19  ;;  %740 = vmatmul.f32.vlgmr.msrb.gmra.mxu3 %v703_v20  ;;  %v918_v19 = vld [vmem:[#allocation2 + $0xd8] sm:$0xff]  ;;  %v917_v20 = vld [vmem:[#allocation2 + $0xd0] sm:$0xff] }
 0x9c8   :  { %825 = vmatpush.xpose.msra.mxu2 %v239_v39  ;;  %845 = vmatpush.xpose.msrb.mxu3 %v304_v40  ;;  %v1003_v39 = vld [vmem:[#allocation2 + $0x178] sm:$0xff]  ;;  %v1002_v40 = vld [vmem:[#allocation2 + $0x170] sm:$0xff] }
 0x9cc   :  { %826 = vmatpush.xpose.msra.mxu2 %v236_v37  ;;  %846 = vmatpush.xpose.msrb.mxu3 %v301_v38 }
 0x9cf   :  { %1966 = vmatmul.msk.f32.vlgmr.msrb.gmra.mxu2 %vm407_vm7, %v745_v21  ;;  %1967 = vmatmul.msk.f32.vlgmr.msra.gmra.mxu3 %vm407_vm7, %v745_v21  ;;  %v916_v21 = vld [vmem:[#allocation2 + $0xc8] sm:$0xff] }
 0x9d0   :  { %875 = vmatpush.msrb.mxu2 %v859_v61  ;;  %936 = vmatpush.msra.mxu3 %v922_v16  ;;  %v994_v61 = vld [vmem:[#allocation2 + $0x130] sm:$0xff] }
 0x9d2   :  { %876 = vmatpush.msrb.mxu2 %v858_v62  ;;  %937 = vmatpush.msra.mxu3 %v921_v17  ;;  %v993_v62 = vld [vmem:[#allocation2 + $0x128] sm:$0xff] }
 0x9d4   :  { %877 = vmatpush.msrb.mxu2 %v857_v63  ;;  %v992_v63 = vld [vmem:[#allocation2 + $0x120] sm:$0xff] }
 0x9d6   :  { %878 = vmatpush.msrb.mxu2 %v856_v1 }
 0xa4a   :  { %v721_v25 = vpop.f32.mrf.mxu2  ;;  %v741_v26 = vpop.f32.mrf.mxu3 }
 0xa4b   :  { %v742_v27 = vadd.f32 %v741_v26, %v721_v25 }
 0xa52   :  { %v765_v28 = vpop.f32.mrf.mxu2  ;;  %v785_v29 = vpop.f32.mrf.mxu3 }
 0xa53   :  { %v788_v2 = vmul.f32 0.25, %v765_v28  ;;  %v789_v30 = vmul.f32 0.25, %v785_v29 }
 0xa55   :  { %v790_v31 = vadd.f32 %v788_v2, %v2339_v53  ;;  %v791_v32 = vadd.f32 %v789_v30, %v2344_v55 }
 0xa57   :  { %v792_v33 = vsel %vm452_vm8, %v790_v31, -inf  ;;  %v793_v34 = vsel %vm452_vm8, %v791_v32, -inf }
 0xa58   :  { %v794_v35 = vmax.f32 %v792_v33, %v793_v34 }
 0xa5a   :  { %795 = vmax.xlane.f32.xlu2 %v794_v35  ;;  %v2035_v35 = vld [vmem:[%s2659_s1 + $0xa] ss:$0 sm:$0xff] }
 0xacd   :  { %v796_v41 = vpop.xlane.xlu2 %795 }
 0xace   :  { %v797_v42 = vsub.f32 %v790_v31, %v796_v41  ;;  %v798_v43 = vsub.f32 %v791_v32, %v796_v41  ;;  %v2034_v32 = vld [vmem:[%s2659_s1 + $0x9] ss:$0 sm:$0xff]  ;;  %v2036_v41 = vld [vmem:[%s2659_s1 + $0xb] ss:$0 sm:$0xff] }
 0xad0   :  { %v799_v36 = vmul.f32 1.442695, %v797_v42  ;;  %v801_v47 = vmul.f32 1.442695, %v798_v43  ;;  %v1001_v42 = vld [vmem:[#allocation2 + $0x168] sm:$0xff] }
 0xad2   :  { %2068 = vpow2.f32 %v799_v36  ;;  %v1000_v36 = vld [vmem:[#allocation2 + $0x160] sm:$0xff] }
 0xad3   :  { %2070 = vpow2.f32 %v801_v47 }
 0xad8   :  { %v2069_v50 = vpop.eup %2068 }
 0xad9   :  { %v2071_v51 = vpop.eup %2070  ;;  %v803_v52 = vsel %vm452_vm8, %v2069_v50, 0.0 }
 0xada   :  { %v804_v54 = vsel %vm452_vm8, %v2071_v51, 0.0 }
 0xadb   :  { %v805_v56 = vadd.f32 %v804_v54, %v803_v52  ;;  %v998_v52 = vld [vmem:[#allocation2 + $0x150] sm:$0xff] }
 0xadd   :  { %806 = vadd.xlane.f32.xlu1 %v805_v56  ;;  %v997_v56 = vld [vmem:[#allocation2 + $0x148] sm:$0xff] }
 0xb50   :  { %v807_v57 = vpop.xlane.xlu1 %806 }
 0xb51   :  { %2072 = vrcp.f32 %v807_v57 }
 0xb57   :  { %v2073_v58 = vpop.eup %2072 }
 0xb58   :  { %v809_v59 = vmul.f32 %v2073_v58, %v2069_v50  ;;  %v810_v60 = vmul.f32 %v2073_v58, %v2071_v51  ;;  %v999_v50 = vld [vmem:[#allocation2 + $0x158] sm:$0xff]  ;;  %v996_v58 = vld [vmem:[#allocation2 + $0x140] sm:$0xff] }
 0xb5a   :  { %827 = vmatmul.f32.vlgmr.msra.gmra.mxu2 %v809_v59  ;;  %847 = vmatmul.f32.vlgmr.msrb.gmra.mxu3 %v810_v60  ;;  %v995_v60 = vld [vmem:[#allocation2 + $0x138] sm:$0xff] }
 0xb5b   :  { %1004 = vmatpush.msra.mxu2 %v1003_v39 }
 0xb5d   :  { %1005 = vmatpush.msra.mxu2 %v1002_v40 }
 0xb5f   :  { %1006 = vmatpush.msra.mxu2 %v1001_v42 }
 0xb61   :  { %1007 = vmatpush.msra.mxu2 %v1000_v36 }
 0xb63   :  { %1008 = vmatpush.msra.mxu2 %v999_v50  ;;  %v1062_v50 = vld [vmem:[#allocation2 + $0x1b0] sm:$0xff] }
 0xb65   :  { %1009 = vmatpush.msra.mxu2 %v998_v52  ;;  %v1059_v52 = vld [vmem:[#allocation2 + $0x198] sm:$0xff] }
 0xb67   :  { %1010 = vmatpush.msra.mxu2 %v997_v56  ;;  %v1057_v56 = vld [vmem:[#allocation2 + $0x188] sm:$0xff] }
 0xb69   :  { %1011 = vmatpush.msra.mxu2 %v996_v58 }
 0xb6b   :  { %1012 = vmatpush.msra.mxu2 %v995_v60 }
 0xb6d   :  { %1013 = vmatpush.msra.mxu2 %v994_v61 }
 0xb6f   :  { %1014 = vmatpush.msra.mxu2 %v993_v62 }
 0xb71   :  { %1015 = vmatpush.msra.mxu2 %v992_v63 }
 0xbdd   :  { %v828_v46 = vpop.f32.mrf.mxu2  ;;  %v848_v48 = vpop.f32.mrf.mxu3 }
 0xbde   :  { %v849_v0 = vadd.f32 %v848_v48, %v828_v46 }
 0xbe0   :  { %852 = vrot.lane.b32.xlu0 %v849_v0, %s2146_s6  ;;  %v991_v0 = vld [vmem:[#allocation2 + $0x118] sm:$0xff] }
 0xbe1   :  { %1016 = vmatpush.msra.mxu2 %v991_v0 }
 0xc52   :  { %v853_v3 = vpop.permute.xlu0 %852 }
 0xc53   :  { %v855_v4 = vsel %vm407_vm7, %v742_v27, %v853_v3  ;;  %v990_v3 = vld [vmem:[#allocation2 + $0x110] sm:$0xff] }
 0xc54   :  { %1968 = vmatmul.msk.f32.vlgmr.msrb.gmra.mxu2 %vm152_vm10, %v855_v4 }
 0xc55   :  { %1017 = vmatpush.msra.mxu2 %v990_v3 }
 0xcd7   :  { %v880_v6 = vpop.f32.mrf.mxu2 }
 0xcd8   :  { %v883_v7 = vadd.f32 %v880_v6, %v2243_v24  ;;  %v920_v24 = vld [vmem:[#allocation2 + $0xe8] sm:$0xff] }
 0xcd9   :  { %938 = vmatpush.msra.mxu3 %v920_v24 }
 0xcda   :  { %v2373_v8 = vadd.f32 %v2033_v5, %v883_v7  ;;  %v989_v7 = vld [vmem:[#allocation2 + $0x108] sm:$0xff] }
 0xcdb   :  { %939 = vmatpush.msra.mxu3 %v919_v18  ;;  %1018 = vmatpush.msra.mxu2 %v989_v7 }
 0xcdc   :  { %v889_v9 = vsel %vm339_vm1, %v2373_v8, 0.0 }
 0xcdd   :  { %890 = vadd.xlane.f32.xlu1 %v889_v9  ;;  %940 = vmatpush.msra.mxu3 %v918_v19  ;;  %v988_v9 = vld [vmem:[#allocation2 + $0x100] sm:$0xff] }
 0xcde   :  { %1019 = vmatpush.msra.mxu2 %v988_v9 }
 0xcdf   :  { %941 = vmatpush.msra.mxu3 %v917_v20 }
 0xce1   :  { %942 = vmatpush.msra.mxu3 %v916_v21 }
 0xce3   :  { %943 = vmatpush.msra.mxu3 %v915_v22 }
 0xd50   :  { %v891_v11 = vpop.xlane.xlu1 %890 }
 0xd51   :  { %v892_v12 = vmul.f32 %v891_v11, %v2183_v10 }
 0xd53   :  { %v893_v13 = vsub.f32 %v2373_v8, %v892_v12 }
 0xd55   :  { %v894_v14 = vmul.f32 %v893_v13, %v893_v13 }
 0xd57   :  { %v895_v15 = vsel %vm339_vm1, %v894_v14, 0.0 }
 0xd58   :  { %896 = vadd.xlane.f32.xlu1 %v895_v15 }
 0xdcb   :  { %v897_v23 = vpop.xlane.xlu1 %896 }
 0xdcc   :  { %v898_v25 = vmul.f32 %v897_v23, %v2183_v10 }
 0xdce   :  { %v899_v26 = vadd.f32 1e-05, %v898_v25 }
 0xdd0   :  { %2074 = vrsqrt.f32 %v899_v26  ;;  %vm906_vm13 = vweird.f32 %v899_v26 }
 0xdd6   :  { %v2075_v27 = vpop.eup %2074 }
 0xdd7   :  { %v901_v28 = vmul.f32 %v2075_v27, %v899_v26  ;;  %vm907_vm11 = vweird.f32 %v2075_v27 }
 0xdd8   :  { %vm908_vm0 = vmor %vm906_vm13, %vm907_vm11 }
 0xdd9   :  { %v902_v29 = vmul.f32 %v2075_v27, %v901_v28 }
 0xddb   :  { %v903_v2 = vmul.f32 0.5, %v902_v29 }
 0xddd   :  { %v904_v30 = vsub.f32 1.5, %v903_v2 }
 0xddf   :  { %v905_v31 = vmul.f32 %v2075_v27, %v904_v30 }
 0xde1   :  { %v909_v33 = vsel %vm908_vm0, %v2075_v27, %v905_v31 }
 0xde2   :  { %v910_v34 = vmul.f32 %v909_v33, %v893_v13 }
 0xde4   :  { %v912_v37 = vmul.f32 %v2034_v32, %v910_v34  ;;  %v2037_v34 = vld [vmem:[%s2659_s1 + $0xc] ss:$0 sm:$0xff] }
 0xde6   :  { %v914_v38 = vadd.f32 %v2035_v35, %v912_v37 }
 0xde8   :  { %1969 = vmatmul.msk.f32.vlgmr.msra.gmra.mxu3 %vm127_vm6, %v914_v38 }
 0xe6b   :  { %v945_v43 = vpop.f32.mrf.mxu3 }
 0xe6c   :  { %v2391_v47 = vadd.f32 %v2036_v41, %v945_v43 }
 0xe6e   :  { %v949_v51 = vmul.f32 0.70710677, %v2391_v47  ;;  %v948_v31 = vmul.f32 0.5, %v2391_v47  ;;  %v1063_v47 = vld [vmem:[#allocation2 + $0x1b8] sm:$0xff] }
 0xe6f   :  { %1075 = vmatpush.msrb.mxu3 %v1063_v47  ;;  %v1227_v47 = vld [vmem:[#allocation2 + $0x1c0] sm:$0xff] }
 0xe70   :  { %v950_v54 = vand.u32 2147483647, %v949_v51  ;;  %vm983_vm14 = vcmp.lt.f32.partialorder %v949_v51, 0.0  ;;  %v1060_v51 = vld [vmem:[#allocation2 + $0x1a0] sm:$0xff] }
 0xe71   :  { %1076 = vmatpush.msrb.mxu3 %v1062_v50 }
 0xe72   :  { %v951_v57 = vmul.f32 0.3275911, %v950_v54  ;;  %v977_v15 = vsub.f32 0.0, %v950_v54 }
 0xe74   :  { %v952_v59 = vadd.f32 1.0, %v951_v57  ;;  %v978_v24 = vmul.f32 %v977_v15, %v950_v54  ;;  %v1058_v54 = vld [vmem:[#allocation2 + $0x190] sm:$0xff]  ;;  %v1056_v57 = vld [vmem:[#allocation2 + $0x180] sm:$0xff] }
 0xe76   :  { %2076 = vrcp.f32 %v952_v59  ;;  %v964_v4 = vand.u32 2147483648, %v952_v59  ;;  %v962_v6 = vand.u32 2147483647, %v952_v59  ;;  %vm958_vm3 = vweird.f32 %v952_v59 }
 0xe77   :  { %v979_v20 = vmul.f32 1.442695, %v978_v24 }
 0xe78   :  { %v965_v12 = vor.u32 1.1754944e-38, %v964_v4  ;;  %vm963_vm12 = vcmp.eq.f32.partialorder %v962_v6, 8.507059e+37 }
 0xe79   :  { %2078 = vpow2.f32 %v979_v20 }
 0xe7c   :  { %v2077_v46 = vpop.eup %2076 }
 0xe7d   :  { %v954_v48 = vmul.f32 %v2077_v46, %v952_v59  ;;  %vm959_vm2 = vweird.f32 %v2077_v46 }
 0xe7e   :  { %vm960_vm4 = vmor %vm958_vm3, %vm959_vm2 }
 0xe7f   :  { %v955_v1 = vsub.f32 1.0, %v954_v48  ;;  %v2079_v27 = vpop.eup %2078 }
 0xe81   :  { %v956_v5 = vmul.f32 %v2077_v46, %v955_v1  ;;  %v2038_v1 = vld [vmem:[%s2659_s1 + $0xd] ss:$0 sm:$0xff] }
 0xe83   :  { %v957_v11 = vadd.f32 %v2077_v46, %v956_v5  ;;  %v2039_v5 = vld [vmem:[%s2659_s1 + $0xe] ss:$0 sm:$0xff] }
 0xe85   :  { %v961_v13 = vsel %vm960_vm4, %v2077_v46, %v957_v11 }
 0xe86   :  { %v966_v14 = vsel %vm963_vm12, %v965_v12, %v961_v13 }
 0xe87   :  { %v968_v16 = vmul.f32 1.0614054, %v966_v14 }
 0xe89   :  { %v969_v17 = vadd.f32 -1.4531521, %v968_v16 }
 0xe8b   :  { %v970_v18 = vmul.f32 %v969_v17, %v966_v14 }
 0xe8d   :  { %v971_v19 = vadd.f32 1.4214138, %v970_v18 }
 0xe8f   :  { %v972_v21 = vmul.f32 %v971_v19, %v966_v14 }
 0xe91   :  { %v973_v22 = vadd.f32 -0.28449672, %v972_v21 }
 0xe93   :  { %v974_v23 = vmul.f32 %v973_v22, %v966_v14 }
 0xe95   :  { %v975_v25 = vadd.f32 0.2548296, %v974_v23 }
 0xe97   :  { %v976_v26 = vmul.f32 %v975_v25, %v966_v14 }
 0xe99   :  { %v981_v28 = vmul.f32 %v2079_v27, %v976_v26 }
 0xe9b   :  { %v982_v29 = vsub.f32 1.0, %v981_v28 }
 0xe9d   :  { %v984_v2 = vsub.f32 0.0, %v982_v29 }
 0xe9f   :  { %v985_v30 = vsel %vm983_vm14, %v984_v2, %v982_v29 }
 0xea0   :  { %v986_v32 = vadd.f32 1.0, %v985_v30 }
 0xea2   :  { %v987_v33 = vmul.f32 %v986_v32, %v948_v31 }
 0xea4   :  { %1020 = vmatmul.f32.vlgmr.msra.gmra.mxu2 %v987_v33 }
 0xf27   :  { %v1021_v35 = vpop.f32.mrf.mxu2 }
 0xf28   :  { %v1024_v37 = vadd.f32 %v1021_v35, %v2373_v8  ;;  %v1061_v8 = vld [vmem:[#allocation2 + $0x1a8] sm:$0xff] }
 0xf29   :  { %1077 = vmatpush.msrb.mxu3 %v1061_v8 }
 0xf2a   :  { %v2399_v38 = vadd.f32 %v2037_v34, %v1024_v37 }
 0xf2b   :  { %1078 = vmatpush.msrb.mxu3 %v1060_v51  ;;  %v2040_v51 = vld [vmem:[%s2659_s1 + $0xf] ss:$0 sm:$0xff] }
 0xf2c   :  { %v1030_v39 = vsel %vm339_vm1, %v2399_v38, 0.0 }
 0xf2d   :  { %1031 = vadd.xlane.f32.xlu2 %v1030_v39  ;;  %1079 = vmatpush.msrb.mxu3 %v1059_v52 }
 0xf2f   :  { %1080 = vmatpush.msrb.mxu3 %v1058_v54 }
 0xf31   :  { %1081 = vmatpush.msrb.mxu3 %v1057_v56 }
 0xf33   :  { %1082 = vmatpush.msrb.mxu3 %v1056_v57 }
 0xfa0   :  { %v1032_v40 = vpop.xlane.xlu2 %1031 }
 0xfa1   :  { %v1033_v41 = vmul.f32 %v1032_v40, %v2183_v10  ;;  %v1230_v40 = vld [vmem:[#allocation2 + $0x1d8] sm:$0xff] }
 0xfa3   :  { %v1034_v42 = vsub.f32 %v2399_v38, %v1033_v41  ;;  %v1229_v41 = vld [vmem:[#allocation2 + $0x1d0] sm:$0xff] }
 0xfa5   :  { %v1035_v43 = vmul.f32 %v1034_v42, %v1034_v42 }
 0xfa7   :  { %v1036_v36 = vsel %vm339_vm1, %v1035_v43, 0.0 }
 0xfa8   :  { %1037 = vadd.xlane.f32.xlu1 %v1036_v36 }
0x101b   :  { %v1038_v58 = vpop.xlane.xlu1 %1037 }
0x101c   :  { %v1039_v59 = vmul.f32 %v1038_v58, %v2183_v10  ;;  %v1293_v58 = vld [vmem:[#allocation2 + $0x218] sm:$0xff] }
0x101d   :  { %1305 = vmatpush.msrb.mxu0 %v1293_v58 }
0x101e   :  { %v1040_v60 = vadd.f32 1e-05, %v1039_v59  ;;  %v1292_v59 = vld [vmem:[#allocation2 + $0x210] sm:$0xff] }
0x101f   :  { %1306 = vmatpush.msrb.mxu0 %v1292_v59 }
0x1020   :  { %2080 = vrsqrt.f32 %v1040_v60  ;;  %vm1047_vm11 = vweird.f32 %v1040_v60 }
0x1026   :  { %v2081_v61 = vpop.eup %2080 }
0x1027   :  { %v1042_v62 = vmul.f32 %v2081_v61, %v1040_v60  ;;  %vm1048_vm15 = vweird.f32 %v2081_v61  ;;  %v144_v60 = vld [vmem:[#allocation2 + $0x340] sm:$0xff] }
0x1028   :  { %vm1049_vm13 = vmor %vm1047_vm11, %vm1048_vm15  ;;  %1929 = vmatmul.msk.f32.gmra.mxu0 %vm152_vm10, %v144_v60  ;;  %1945 = vmatmul.msk.f32.gmra.mxu1 %vm152_vm10, %v144_v60  ;;  %vm1707_vm11 = vcmp.eq.s32.totalorder %v2203_v44, 0 }
0x1029   :  { %v1043_v63 = vmul.f32 %v2081_v61, %v1042_v62  ;;  %v1290_v62 = vld [vmem:[#allocation2 + $0x200] sm:$0xff] }
0x102b   :  { %v1044_v46 = vmul.f32 0.5, %v1043_v63  ;;  %v1289_v63 = vld [vmem:[#allocation2 + $0x1f8] sm:$0xff] }
0x102d   :  { %v1045_v48 = vsub.f32 1.5, %v1044_v46  ;;  %v1288_v46 = vld [vmem:[#allocation2 + $0x1f0] sm:$0xff] }
0x102f   :  { %v1046_v0 = vmul.f32 %v2081_v61, %v1045_v48  ;;  %v146_v48 = vld [vmem:[#allocation2 + $0x350] sm:$0xff] }
0x1031   :  { %v1050_v3 = vsel %vm1049_vm13, %v2081_v61, %v1046_v0  ;;  %v1291_v61 = vld [vmem:[#allocation2 + $0x208] sm:$0xff]  ;;  %v147_v0 = vld [vmem:[#allocation2 + $0x358] sm:$0xff]  ;;  %vm1708_vm13 = vcmp.eq.s32.totalorder %v2205_v45, 1 }
0x1032   :  { %v1051_v4 = vmul.f32 %v1050_v3, %v1034_v42  ;;  %v1228_v42 = vld [vmem:[#allocation2 + $0x1c8] sm:$0xff]  ;;  %1307 = vmatpush.msrb.mxu0 %v1291_v61 }
0x1034   :  { %v1053_v6 = vmul.f32 %v2038_v1, %v1051_v4  ;;  %1308 = vmatpush.msrb.mxu0 %v1290_v62 }
0x1036   :  { %v1055_v7 = vadd.f32 %v2039_v5, %v1053_v6  ;;  %1309 = vmatpush.msrb.mxu0 %v1289_v63 }
0x1038   :  { %1970 = vmatmul.msk.f32.vlgmr.msrb.gmra.mxu3 %vm127_vm6, %v1055_v7  ;;  %1310 = vmatpush.msrb.mxu0 %v1288_v46  ;;  %v148_v7 = vld [vmem:[#allocation2 + $0x360] sm:$0xff] }
0x10bb   :  { %v1084_v9 = vpop.f32.mrf.mxu3 }
0x10bc   :  { %1154 = vrot.lane.b32.xlu1 %v1084_v9, %s2145_s5  ;;  %1156 = vrot.lane.b32.xlu2 %v1084_v9, %s2140_s27 }
0x10bd   :  { %1088 = vrot.lane.b32.xlu0 %v1084_v9, %s2142_s29 }
0x1116   :  { %v1157_v12 = vpop.permute.xlu2 %1156 }
0x112e   :  { %v1155_v13 = vpop.permute.xlu1 %1154 }
0x112f   :  { %v1089_v11 = vpop.permute.xlu0 %1088 }
0x1130   :  { %1971 = vmatpush.xpose.msk.msra.mxu3 %vm407_vm7, %v1089_v11  ;;  %v150_v11 = vld [vmem:[#allocation2 + $0x370] sm:$0xff] }
0x1133   :  { %1972 = vmatmul.msk.f32.vlgmr.msra.gmra.mxu3 %vm407_vm7, %v1084_v9 }
0x1134   :  { %1975 = vmatpush.xpose.msk.msrb.mxu3 %vm407_vm7, %v1157_v12  ;;  %v151_v12 = vld [vmem:[#allocation2 + $0x378] sm:$0xff] }
0x1138   :  { %1246 = vmatpush.msra.mxu3 %v1230_v40 }
0x113a   :  { %1247 = vmatpush.msra.mxu3 %v1229_v41 }
0x113b   :  { %1976 = vmatmul.msk.f32.vlgmr.msrb.gmra.mxu3 %vm407_vm7, %v1155_v13  ;;  %v1287_v13 = vld [vmem:[#allocation2 + $0x1e8] sm:$0xff] }
0x113c   :  { %1248 = vmatpush.msra.mxu3 %v1228_v42  ;;  %1311 = vmatpush.msrb.mxu0 %v1287_v13 }
0x113e   :  { %1249 = vmatpush.msra.mxu3 %v1227_v47 }
0x11b6   :  { %v1111_v14 = vpop.f32.mrf.mxu3 }
0x11b7   :  { %v1114_v15 = vmul.f32 0.25, %v1111_v14  ;;  %v1286_v14 = vld [vmem:[#allocation2 + $0x1e0] sm:$0xff] }
0x11b8   :  { %1312 = vmatpush.msrb.mxu0 %v1286_v14 }
0x11b9   :  { %v1115_v16 = vadd.f32 %v1114_v15, %v2222_v49  ;;  %v242_v15 = vpop.f32.mrf.mxu0 }
0x11bb   :  { %v1116_v17 = vsel %vm434_vm5, %v1115_v16, -inf }
0x11bc   :  { %1117 = vmax.xlane.f32.xlu0 %v1116_v17 }
0x11be   :  { %v1179_v24 = vpop.f32.mrf.mxu3 }
0x11bf   :  { %v1182_v18 = vmul.f32 0.25, %v1179_v24 }
0x11c1   :  { %v1183_v19 = vadd.f32 %v1182_v18, %v2222_v49 }
0x11c3   :  { %v1184_v20 = vsel %vm434_vm5, %v1183_v19, -inf }
0x11c4   :  { %1185 = vmax.xlane.f32.xlu2 %v1184_v20 }
0x11dc   :  { %1195 = vrot.lane.b32.xlu2 %v1084_v9, %s2144_s30 }
0x122f   :  { %v1118_v21 = vpop.xlane.xlu0 %1117 }
0x1230   :  { %v1119_v22 = vsub.f32 %v1115_v16, %v1118_v21  ;;  %v307_v16 = vpop.f32.mrf.mxu1 }
0x1232   :  { %v1120_v23 = vmul.f32 1.442695, %v1119_v22 }
0x1234   :  { %2082 = vpow2.f32 %v1120_v23 }
0x1237   :  { %v1186_v25 = vpop.xlane.xlu2 %1185 }
0x1238   :  { %v1187_v26 = vsub.f32 %v1183_v19, %v1186_v25 }
0x123a   :  { %v2083_v27 = vpop.eup %2082  ;;  %v1188_v28 = vmul.f32 1.442695, %v1187_v26 }
0x123b   :  { %v1122_v29 = vsel %vm434_vm5, %v2083_v27, 0.0 }
0x123c   :  { %2084 = vpow2.f32 %v1188_v28  ;;  %1123 = vadd.xlane.f32.xlu1 %v1122_v29  ;;  %v2041_v29 = vld [vmem:[%s2659_s1 + $0x10] ss:$0 sm:$0xff] }
0x123f   :  { %v1196_v35 = vpop.permute.xlu2 %1195 }
0x1242   :  { %v2085_v2 = vpop.eup %2084 }
0x1243   :  { %v1190_v49 = vsel %vm434_vm5, %v2085_v2, 0.0 }
0x1244   :  { %1191 = vadd.xlane.f32.xlu0 %v1190_v49 }
0x1258   :  { %1127 = vrot.lane.b32.xlu0 %v1084_v9, %s2141_s28  ;;  %v149_v9 = vld [vmem:[#allocation2 + $0x368] sm:$0xff] }
0x12af   :  { %v1124_v30 = vpop.xlane.xlu1 %1123 }
0x12b0   :  { %2086 = vrcp.f32 %v1124_v30 }
0x12b6   :  { %v2087_v32 = vpop.eup %2086 }
0x12b7   :  { %v1192_v31 = vpop.xlane.xlu0 %1191  ;;  %v1126_v33 = vmul.f32 %v2087_v32, %v2083_v27 }
0x12b8   :  { %2088 = vrcp.f32 %v1192_v31  ;;  %v2042_v31 = vld [vmem:[%s2659_s1 + $0x11] ss:$0 sm:$0xff] }
0x12be   :  { %v2089_v37 = vpop.eup %2088 }
0x12bf   :  { %v1194_v39 = vmul.f32 %v2089_v37, %v2085_v2 }
0x12ca   :  { %v1128_v34 = vpop.permute.xlu0 %1127 }
0x12cb   :  { %1973 = vmatpush.msk.msrb.mxu2 %vm452_vm8, %v1128_v34 }
0x12cc   :  { %1974 = vmatmul.msk.f32.vlgmr.msrb.gmra.mxu2 %vm448_vm9, %v1126_v33 }
0x12cd   :  { %1977 = vmatpush.msk.msra.mxu2 %vm452_vm8, %v1196_v35 }
0x12d4   :  { %1978 = vmatmul.msk.f32.vlgmr.msra.gmra.mxu2 %vm448_vm9, %v1194_v39 }
0x134f   :  { %v1151_v43 = vpop.f32.mrf.mxu2 }
0x1357   :  { %v1219_v36 = vpop.f32.mrf.mxu2 }
0x1358   :  { %1223 = vrot.lane.b32.xlu1 %v1219_v36, %s2146_s6 }
0x13ca   :  { %v1224_v50 = vpop.permute.xlu1 %1223 }
0x13cb   :  { %v1226_v8 = vsel %vm407_vm7, %v1151_v43, %v1224_v50 }
0x13cc   :  { %1979 = vmatmul.msk.f32.vlgmr.msra.gmra.mxu3 %vm152_vm10, %v1226_v8 }
0x144f   :  { %v1251_v52 = vpop.f32.mrf.mxu3 }
0x1450   :  { %v1254_v54 = vadd.f32 %v1251_v52, %v2399_v38  ;;  %v145_v38 = vld [vmem:[#allocation2 + $0x348] sm:$0xff] }
0x1451   :  { %1930 = vmatmul.msk.f32.gmra.mxu0 %vm152_vm10, %v145_v38  ;;  %1946 = vmatmul.msk.f32.gmra.mxu1 %vm152_vm10, %v145_v38 }
0x1452   :  { %v2440_v56 = vadd.f32 %v2040_v51, %v1254_v54 }
0x1454   :  { %v1260_v57 = vsel %vm339_vm1, %v2440_v56, 0.0 }
0x1455   :  { %1261 = vadd.xlane.f32.xlu0 %v1260_v57 }
0x1459   :  { %1931 = vmatmul.msk.f32.gmra.mxu0 %vm152_vm10, %v146_v48  ;;  %1947 = vmatmul.msk.f32.gmra.mxu1 %vm152_vm10, %v146_v48 }
0x1461   :  { %1932 = vmatmul.msk.f32.gmra.mxu0 %vm152_vm10, %v147_v0  ;;  %1948 = vmatmul.msk.f32.gmra.mxu1 %vm152_vm10, %v147_v0 }
0x1469   :  { %1933 = vmatmul.msk.f32.gmra.mxu0 %vm152_vm10, %v148_v7  ;;  %1949 = vmatmul.msk.f32.gmra.mxu1 %vm152_vm10, %v148_v7 }
0x1471   :  { %1934 = vmatmul.msk.f32.gmra.mxu0 %vm152_vm10, %v149_v9  ;;  %1950 = vmatmul.msk.f32.gmra.mxu1 %vm152_vm10, %v149_v9 }
0x1479   :  { %1935 = vmatmul.msk.f32.gmra.mxu0 %vm152_vm10, %v150_v11  ;;  %1951 = vmatmul.msk.f32.gmra.mxu1 %vm152_vm10, %v150_v11 }
0x1481   :  { %1936 = vmatmul.msk.f32.gmra.mxu0 %vm152_vm10, %v151_v12  ;;  %1952 = vmatmul.msk.f32.gmra.mxu1 %vm152_vm10, %v151_v12 }
0x14c8   :  { %v1262_v1 = vpop.xlane.xlu0 %1261 }
0x14c9   :  { %v1263_v3 = vmul.f32 %v1262_v1, %v2183_v10 }
0x14cb   :  { %v1264_v4 = vsub.f32 %v2440_v56, %v1263_v3 }
0x14cd   :  { %v1265_v5 = vmul.f32 %v1264_v4, %v1264_v4 }
0x14ce   :  { %v245_v19 = vpop.f32.mrf.mxu0  ;;  %v310_v20 = vpop.f32.mrf.mxu1 }
0x14cf   :  { %v1266_v6 = vsel %vm339_vm1, %v1265_v5, 0.0  ;;  %1334 = vmatpush.msrb.mxu2 %v245_v19  ;;  %1354 = vmatpush.msrb.mxu3 %v310_v20 }
0x14d0   :  { %1267 = vadd.xlane.f32.xlu2 %v1266_v6 }
0x14d1   :  { %1335 = vmatpush.msrb.mxu2 %v242_v15  ;;  %1355 = vmatpush.msrb.mxu3 %v307_v16 }
0x14d6   :  { %v248_v23 = vpop.f32.mrf.mxu0  ;;  %v313_v40 = vpop.f32.mrf.mxu1 }
0x14de   :  { %v251_v2 = vpop.f32.mrf.mxu0  ;;  %v316_v41 = vpop.f32.mrf.mxu1 }
0x14df   :  { %1441 = vmatpush.msra.mxu3 %v251_v2  ;;  %1461 = vmatpush.msra.mxu0 %v316_v41 }
0x14e1   :  { %1442 = vmatpush.msra.mxu3 %v248_v23  ;;  %1462 = vmatpush.msra.mxu0 %v313_v40 }
0x14e6   :  { %v254_v34 = vpop.f32.mrf.mxu0  ;;  %v319_v12 = vpop.f32.mrf.mxu1 }
0x14ee   :  { %v257_v35 = vpop.f32.mrf.mxu0  ;;  %v322_v13 = vpop.f32.mrf.mxu1 }
0x14ef   :  { %1397 = vmatpush.xpose.msrb.mxu1 %v257_v35  ;;  %1417 = vmatpush.xpose.msra.mxu2 %v322_v13 }
0x14f3   :  { %1398 = vmatpush.xpose.msrb.mxu1 %v254_v34  ;;  %1418 = vmatpush.xpose.msra.mxu2 %v319_v12  ;;  %v1536_v34 = vld [vmem:[#allocation2 + $0x228] sm:$0xff]  ;;  %v2044_v12 = vld [vmem:[%s2659_s1 + $0x13] ss:$0 sm:$0xff] }
0x14f6   :  { %v260_v37 = vpop.f32.mrf.mxu0  ;;  %v325_v14 = vpop.f32.mrf.mxu1 }
0x14fe   :  { %v263_v39 = vpop.f32.mrf.mxu0  ;;  %v328_v19 = vpop.f32.mrf.mxu1 }
0x14ff   :  { %1504 = vmatpush.xpose.msra.mxu1 %v263_v39 }
0x1503   :  { %1505 = vmatpush.xpose.msra.mxu1 %v260_v37 }
0x1543   :  { %v1268_v17 = vpop.xlane.xlu2 %1267 }
0x1544   :  { %v1269_v24 = vmul.f32 %v1268_v17, %v2183_v10 }
0x1546   :  { %v1270_v18 = vadd.f32 1e-05, %v1269_v24 }
0x1548   :  { %2090 = vrsqrt.f32 %v1270_v18  ;;  %vm1277_vm0 = vweird.f32 %v1270_v18 }
0x154e   :  { %v2091_v21 = vpop.eup %2090 }
0x154f   :  { %v1272_v22 = vmul.f32 %v2091_v21, %v1270_v18  ;;  %vm1278_vm5 = vweird.f32 %v2091_v21 }
0x1550   :  { %vm1279_vm2 = vmor %vm1277_vm0, %vm1278_vm5  ;;  %vm1711_vm5 = vcmp.eq.s32.totalorder %v2203_v44, 2  ;;  %vm1712_vm0 = vcmp.eq.s32.totalorder %v2205_v45, 2 }
0x1551   :  { %v1273_v25 = vmul.f32 %v2091_v21, %v1272_v22 }
0x1553   :  { %v1274_v26 = vmul.f32 0.5, %v1273_v25 }
0x1555   :  { %v1275_v27 = vsub.f32 1.5, %v1274_v26 }
0x1557   :  { %v1276_v28 = vmul.f32 %v2091_v21, %v1275_v27 }
0x1559   :  { %v1280_v49 = vsel %vm1279_vm2, %v2091_v21, %v1276_v28  ;;  %vm2521_vm2 = vmand %vm1707_vm11, %vm1708_vm13 }
0x155a   :  { %v1281_v30 = vmul.f32 %v1280_v49, %v1264_v4 }
0x155c   :  { %v1283_v32 = vmul.f32 %v2041_v29, %v1281_v30 }
0x155e   :  { %v1285_v33 = vadd.f32 %v2042_v31, %v1283_v32  ;;  %v1538_v32 = vld [vmem:[#allocation2 + $0x238] sm:$0xff] }
0x1560   :  { %1980 = vmatmul.msk.f32.vlgmr.msrb.gmra.mxu0 %vm127_vm6, %v1285_v33  ;;  %v1537_v33 = vld [vmem:[#allocation2 + $0x230] sm:$0xff] }
0x15dd   :  { %v1314_v42 = vpop.f32.mrf.mxu0 }
0x15de   :  { %1423 = vrot.lane.b32.xlu1 %v1314_v42, %s2145_s5  ;;  %1981 = vmatmul.msk.f32.vlgmr.msrb.gmra.mxu2 %vm407_vm7, %v1314_v42 }
0x15df   :  { %1982 = vmatmul.msk.f32.vlgmr.msrb.gmra.mxu3 %vm407_vm7, %v1314_v42  ;;  %1524 = vmatpush.xpose.msrb.mxu2 %v328_v19  ;;  %v1535_v42 = vld [vmem:[#allocation2 + $0x220] sm:$0xff]  ;;  %v1680_v19 = vld [vmem:[#allocation2 + $0x2e8] sm:$0xff] }
0x15e0   :  { %1554 = vmatpush.msrb.mxu3 %v1538_v32  ;;  %v1672_v32 = vld [vmem:[#allocation2 + $0x2a8] sm:$0xff] }
0x15e2   :  { %1555 = vmatpush.msrb.mxu3 %v1537_v33  ;;  %v1671_v33 = vld [vmem:[#allocation2 + $0x2a0] sm:$0xff] }
0x15e3   :  { %1525 = vmatpush.xpose.msrb.mxu2 %v325_v14 }
0x15e4   :  { %1556 = vmatpush.msrb.mxu3 %v1536_v34 }
0x15e6   :  { %1557 = vmatpush.msrb.mxu3 %v1535_v42 }
0x1650   :  { %v1424_v43 = vpop.permute.xlu1 %1423 }
0x1651   :  { %1983 = vmatmul.msk.f32.vlgmr.msra.gmra.mxu3 %vm407_vm7, %v1424_v43  ;;  %1984 = vmatmul.msk.f32.vlgmr.msra.gmra.mxu0 %vm407_vm7, %v1424_v43 }
0x1661   :  { %v1337_v36 = vpop.f32.mrf.mxu2 }
0x1662   :  { %v1360_v47 = vmul.f32 0.25, %v1337_v36  ;;  %v1357_v50 = vpop.f32.mrf.mxu3 }
0x1663   :  { %v1361_v8 = vmul.f32 0.25, %v1357_v50  ;;  %v2043_v50 = vld [vmem:[%s2659_s1 + $0x12] ss:$0 sm:$0xff] }
0x1664   :  { %v1362_v51 = vadd.f32 %v1360_v47, %v2339_v53 }
0x1665   :  { %v1363_v52 = vadd.f32 %v1361_v8, %v2344_v55 }
0x1666   :  { %v1364_v54 = vsel %vm452_vm8, %v1362_v51, -inf }
0x1667   :  { %v1365_v57 = vsel %vm452_vm8, %v1363_v52, -inf }
0x1668   :  { %v1366_v58 = vmax.f32 %v1364_v54, %v1365_v57 }
0x166a   :  { %1367 = vmax.xlane.f32.xlu1 %v1366_v58 }
0x16ce   :  { %v1464_v59 = vpop.f32.mrf.mxu0 }
0x16cf   :  { %v1468_v60 = vmul.f32 0.25, %v1464_v59 }
0x16d1   :  { %v1470_v62 = vadd.f32 %v1468_v60, %v2344_v55 }
0x16d3   :  { %v1472_v48 = vsel %vm452_vm8, %v1470_v62, -inf }
0x16d4   :  { %v1444_v61 = vpop.f32.mrf.mxu3 }
0x16d5   :  { %v1467_v63 = vmul.f32 0.25, %v1444_v61 }
0x16d7   :  { %v1469_v38 = vadd.f32 %v1467_v63, %v2339_v53  ;;  %v1600_v63 = vld [vmem:[#allocation2 + $0x270] sm:$0xff] }
0x16d9   :  { %v1471_v46 = vsel %vm452_vm8, %v1469_v38, -inf }
0x16da   :  { %v1473_v0 = vmax.f32 %v1471_v46, %v1472_v48  ;;  %v1597_v46 = vld [vmem:[#allocation2 + $0x258] sm:$0xff]  ;;  %v1596_v48 = vld [vmem:[#allocation2 + $0x250] sm:$0xff] }
0x16dc   :  { %1474 = vmax.xlane.f32.xlu0 %v1473_v0  ;;  %v1595_v0 = vld [vmem:[#allocation2 + $0x248] sm:$0xff] }
0x16dd   :  { %v1368_v1 = vpop.xlane.xlu1 %1367 }
0x16de   :  { %v1369_v3 = vsub.f32 %v1362_v51, %v1368_v1  ;;  %v1370_v4 = vsub.f32 %v1363_v52, %v1368_v1  ;;  %v1594_v1 = vld [vmem:[#allocation2 + $0x240] sm:$0xff] }
0x16e0   :  { %v1371_v5 = vmul.f32 1.442695, %v1369_v3  ;;  %v1373_v6 = vmul.f32 1.442695, %v1370_v4 }
0x16e2   :  { %2092 = vpow2.f32 %v1371_v5 }
0x16e3   :  { %2094 = vpow2.f32 %v1373_v6 }
0x16e8   :  { %v2093_v7 = vpop.eup %2092 }
0x16e9   :  { %v2095_v9 = vpop.eup %2094  ;;  %v1375_v55 = vsel %vm452_vm8, %v2093_v7, 0.0 }
0x16ea   :  { %v1376_v11 = vsel %vm452_vm8, %v2095_v9, 0.0 }
0x16eb   :  { %v1377_v53 = vadd.f32 %v1376_v11, %v1375_v55 }
0x16ed   :  { %1378 = vadd.xlane.f32.xlu0 %v1377_v53 }
0x174f   :  { %v1475_v15 = vpop.xlane.xlu0 %1474 }
0x1750   :  { %v1476_v16 = vsub.f32 %v1469_v38, %v1475_v15  ;;  %v1477_v17 = vsub.f32 %v1470_v62, %v1475_v15  ;;  %v1601_v62 = vld [vmem:[#allocation2 + $0x278] sm:$0xff]  ;;  %v1598_v38 = vld [vmem:[#allocation2 + $0x260] sm:$0xff] }
0x1751   :  { %1615 = vmatpush.msrb.mxu0 %v1601_v62 }
0x1752   :  { %v1478_v24 = vmul.f32 1.442695, %v1476_v16  ;;  %v1480_v18 = vmul.f32 1.442695, %v1477_v17  ;;  %v1682_v17 = vld [vmem:[#allocation2 + $0x2f8] sm:$0xff] }
0x1753   :  { %1616 = vmatpush.msrb.mxu0 %v1600_v63 }
0x1754   :  { %2096 = vpow2.f32 %v1478_v24  ;;  %v1681_v24 = vld [vmem:[#allocation2 + $0x2f0] sm:$0xff] }
0x1755   :  { %2098 = vpow2.f32 %v1480_v18  ;;  %v2046_v18 = vld [vmem:[%s2659_s1 + $0x15] ss:$0 sm:$0xff] }
0x175a   :  { %v2097_v20 = vpop.eup %2096 }
0x175b   :  { %v2099_v21 = vpop.eup %2098  ;;  %v1482_v22 = vsel %vm452_vm8, %v2097_v20, 0.0 }
0x175c   :  { %v1483_v23 = vsel %vm452_vm8, %v2099_v21, 0.0 }
0x175d   :  { %v1484_v25 = vadd.f32 %v1483_v23, %v1482_v22  ;;  %v1678_v23 = vld [vmem:[#allocation2 + $0x2d8] sm:$0xff] }
0x175f   :  { %1485 = vadd.xlane.f32.xlu2 %v1484_v25 }
0x1760   :  { %v1379_v26 = vpop.xlane.xlu0 %1378 }
0x1761   :  { %2100 = vrcp.f32 %v1379_v26  ;;  %v1677_v26 = vld [vmem:[#allocation2 + $0x2d0] sm:$0xff] }
0x1767   :  { %v2101_v27 = vpop.eup %2100 }
0x1768   :  { %v1381_v28 = vmul.f32 %v2101_v27, %v2093_v7  ;;  %v1382_v29 = vmul.f32 %v2101_v27, %v2095_v9 }
0x176a   :  { %1399 = vmatmul.f32.vlgmr.msrb.gmra.mxu1 %v1381_v28  ;;  %1419 = vmatmul.f32.vlgmr.msra.gmra.mxu2 %v1382_v29  ;;  %v1676_v28 = vld [vmem:[#allocation2 + $0x2c8] sm:$0xff] }
0x176b   :  { %1683 = vmatpush.msrb.mxu1 %v1682_v17  ;;  %v1805_v17 = vld [vmem:[%s2661_s3 + $0xf0] sm:$0xff] }
0x176d   :  { %1684 = vmatpush.msrb.mxu1 %v1681_v24  ;;  %v1806_v24 = vld [vmem:[%s2661_s3 + $0xf8] sm:$0xff] }
0x176f   :  { %1685 = vmatpush.msrb.mxu1 %v1680_v19  ;;  %v1801_v19 = vld [vmem:[%s2661_s3 + $0xd0] sm:$0xff] }
0x17d2   :  { %v1486_v2 = vpop.xlane.xlu2 %1485 }
0x17d3   :  { %2102 = vrcp.f32 %v1486_v2  ;;  %v1675_v2 = vld [vmem:[#allocation2 + $0x2c0] sm:$0xff] }
0x17d9   :  { %v2103_v49 = vpop.eup %2102 }
0x17da   :  { %v1488_v30 = vmul.f32 %v2103_v49, %v2097_v20  ;;  %v1489_v31 = vmul.f32 %v2103_v49, %v2099_v21  ;;  %v1679_v21 = vld [vmem:[#allocation2 + $0x2e0] sm:$0xff] }
0x17db   :  { %1686 = vmatpush.msrb.mxu1 %v1679_v21  ;;  %v1799_v21 = vld [vmem:[%s2661_s3 + $0xc0] sm:$0xff] }
0x17dc   :  { %1506 = vmatmul.f32.vlgmr.msra.gmra.mxu1 %v1488_v30  ;;  %1526 = vmatmul.f32.vlgmr.msrb.gmra.mxu2 %v1489_v31  ;;  %v1674_v30 = vld [vmem:[#allocation2 + $0x2b8] sm:$0xff]  ;;  %v1673_v31 = vld [vmem:[#allocation2 + $0x2b0] sm:$0xff] }
0x17dd   :  { %1687 = vmatpush.msrb.mxu1 %v1678_v23  ;;  %v1797_v23 = vld [vmem:[%s2661_s3 + $0xb0] sm:$0xff] }
0x17df   :  { %1688 = vmatpush.msrb.mxu1 %v1677_v26  ;;  %v1793_v26 = vld [vmem:[%s2661_s3 + $0x90] sm:$0xff] }
0x17e1   :  { %1689 = vmatpush.msrb.mxu1 %v1676_v28  ;;  %v1790_v28 = vld [vmem:[%s2661_s3 + $0x78] sm:$0xff] }
0x17e3   :  { %1690 = vmatpush.msrb.mxu1 %v1675_v2  ;;  %v1786_v2 = vld [vmem:[%s2661_s3 + $0x58] sm:$0xff] }
0x17e5   :  { %1691 = vmatpush.msrb.mxu1 %v1674_v30  ;;  %v1787_v30 = vld [vmem:[%s2661_s3 + $0x60] sm:$0xff] }
0x17e7   :  { %v1400_v35 = vpop.f32.mrf.mxu1  ;;  %1692 = vmatpush.msrb.mxu1 %v1673_v31  ;;  %v1796_v31 = vld [vmem:[%s2661_s3 + $0xa8] sm:$0xff] }
0x17e9   :  { %1693 = vmatpush.msrb.mxu1 %v1672_v32  ;;  %v1785_v32 = vld [vmem:[%s2661_s3 + $0x50] sm:$0xff] }
0x17eb   :  { %1694 = vmatpush.msrb.mxu1 %v1671_v33  ;;  %v1794_v33 = vld [vmem:[%s2661_s3 + $0x98] sm:$0xff] }
0x17ed   :  { %v1420_v37 = vpop.f32.mrf.mxu2 }
0x17ee   :  { %v1421_v43 = vadd.f32 %v1420_v37, %v1400_v35  ;;  %v1670_v37 = vld [vmem:[#allocation2 + $0x298] sm:$0xff] }
0x17ef   :  { %1695 = vmatpush.msrb.mxu1 %v1670_v37  ;;  %v1792_v37 = vld [vmem:[%s2661_s3 + $0x88] sm:$0xff] }
0x1859   :  { %v1507_v39 = vpop.f32.mrf.mxu1 }
0x185f   :  { %v1527_v40 = vpop.f32.mrf.mxu2 }
0x1860   :  { %v1528_v41 = vadd.f32 %v1527_v40, %v1507_v39  ;;  %v1669_v40 = vld [vmem:[#allocation2 + $0x290] sm:$0xff] }
0x1861   :  { %1696 = vmatpush.msrb.mxu1 %v1669_v40  ;;  %v1782_v40 = vld [vmem:[%s2661_s3 + $0x38] sm:$0xff] }
0x1862   :  { %1531 = vrot.lane.b32.xlu0 %v1528_v41, %s2146_s6 }
0x18d4   :  { %v1532_v36 = vpop.permute.xlu0 %1531 }
0x18d5   :  { %v1534_v47 = vsel %vm407_vm7, %v1421_v43, %v1532_v36  ;;  %v1668_v36 = vld [vmem:[#allocation2 + $0x288] sm:$0xff] }
0x18d6   :  { %1985 = vmatmul.msk.f32.vlgmr.msrb.gmra.mxu3 %vm152_vm10, %v1534_v47  ;;  %1697 = vmatpush.msrb.mxu1 %v1668_v36  ;;  %v1667_v47 = vld [vmem:[#allocation2 + $0x280] sm:$0xff]  ;;  %v1777_v36 = vld [vmem:[%s2661_s3 + $0x10] sm:$0xff] }
0x18d8   :  { %1698 = vmatpush.msrb.mxu1 %v1667_v47  ;;  %v1776_v47 = vld [vmem:[%s2661_s3 + $0x8] sm:$0xff] }
0x1959   :  { %v1559_v8 = vpop.f32.mrf.mxu3 }
0x195a   :  { %v1562_v51 = vadd.f32 %v1559_v8, %v2440_v56  ;;  %v1599_v56 = vld [vmem:[#allocation2 + $0x268] sm:$0xff] }
0x195b   :  { %1617 = vmatpush.msrb.mxu0 %v1599_v56 }
0x195c   :  { %v2495_v52 = vadd.f32 %v2043_v50, %v1562_v51 }
0x195d   :  { %1618 = vmatpush.msrb.mxu0 %v1598_v38 }
0x195e   :  { %v1568_v54 = vsel %vm339_vm1, %v2495_v52, 0.0 }
0x195f   :  { %1569 = vadd.xlane.f32.xlu2 %v1568_v54  ;;  %1619 = vmatpush.msrb.mxu0 %v1597_v46 }
0x1961   :  { %1620 = vmatpush.msrb.mxu0 %v1596_v48 }
0x1963   :  { %1621 = vmatpush.msrb.mxu0 %v1595_v0 }
0x1965   :  { %1622 = vmatpush.msrb.mxu0 %v1594_v1 }
0x19d2   :  { %v1570_v57 = vpop.xlane.xlu2 %1569 }
0x19d3   :  { %v1571_v58 = vmul.f32 %v1570_v57, %v2183_v10 }
0x19d5   :  { %v1572_v59 = vsub.f32 %v2495_v52, %v1571_v58 }
0x19d7   :  { %v1573_v60 = vmul.f32 %v1572_v59, %v1572_v59 }
0x19d9   :  { %v1574_v61 = vsel %vm339_vm1, %v1573_v60, 0.0 }
0x19da   :  { %1575 = vadd.xlane.f32.xlu1 %v1574_v61 }
0x1a4d   :  { %v1576_v3 = vpop.xlane.xlu1 %1575 }
0x1a4e   :  { %v1577_v4 = vmul.f32 %v1576_v3, %v2183_v10  ;;  %v2045_v10 = vld [vmem:[%s2659_s1 + $0x14] ss:$0 sm:$0xff] }
0x1a50   :  { %v1578_v5 = vadd.f32 1e-05, %v1577_v4 }
0x1a52   :  { %2104 = vrsqrt.f32 %v1578_v5  ;;  %vm1585_vm7 = vweird.f32 %v1578_v5 }
0x1a58   :  { %v2105_v6 = vpop.eup %2104 }
0x1a59   :  { %v1580_v7 = vmul.f32 %v2105_v6, %v1578_v5  ;;  %vm1586_vm1 = vweird.f32 %v2105_v6 }
0x1a5a   :  { %vm1587_vm10 = vmor %vm1585_vm7, %vm1586_vm1  ;;  %vm1715_vm7 = vcmp.eq.s32.totalorder %v2203_v44, 1 }
0x1a5b   :  { %v1581_v9 = vmul.f32 %v2105_v6, %v1580_v7  ;;  %vm1713_vm1 = vmand %vm1711_vm5, %vm1712_vm0 }
0x1a5d   :  { %v1582_v55 = vmul.f32 0.5, %v1581_v9 }
0x1a5f   :  { %v1583_v11 = vsub.f32 1.5, %v1582_v55 }
0x1a61   :  { %v1584_v53 = vmul.f32 %v2105_v6, %v1583_v11 }
0x1a63   :  { %v1588_v13 = vsel %vm1587_vm10, %v2105_v6, %v1584_v53  ;;  %vm1716_vm10 = vcmp.eq.s32.totalorder %v2205_v45, 4 }
0x1a64   :  { %v1589_v14 = vmul.f32 %v1588_v13, %v1572_v59  ;;  %v2047_v13 = vld [vmem:[%s2659_s1 + $0x16] ss:$0 sm:$0xff] }
0x1a66   :  { %v1591_v15 = vmul.f32 %v2044_v12, %v1589_v14  ;;  %v1789_v12 = vld [vmem:[%s2661_s3 + $0x70] sm:$0xff] }
0x1a67   :  { %1861 = vmatpush.msra.mxu0 %v1789_v12 }
0x1a68   :  { %v1593_v16 = vadd.f32 %v2045_v10, %v1591_v15  ;;  %v2147_v10 = vmov 0.0  }
0x1a69   :  { %1862 = vmatpush.msra.mxu0 %v1787_v30 }
0x1a6a   :  { %1986 = vmatmul.msk.f32.vlgmr.msrb.gmra.mxu0 %vm127_vm6, %v1593_v16 }
0x1a6b   :  { %1863 = vmatpush.msra.mxu0 %v1785_v32 }
0x1ae7   :  { %v1624_v20 = vpop.f32.mrf.mxu0 }
0x1ae8   :  { %v2513_v22 = vadd.f32 %v2046_v18, %v1624_v20  ;;  %v1804_v18 = vld [vmem:[%s2661_s3 + $0xe8] sm:$0xff]  ;;  %v1802_v20 = vld [vmem:[%s2661_s3 + $0xd8] sm:$0xff] }
0x1aea   :  { %v1628_v25 = vmul.f32 0.70710677, %v2513_v22  ;;  %v1627_v7 = vmul.f32 0.5, %v2513_v22  ;;  %v1800_v22 = vld [vmem:[%s2661_s3 + $0xc8] sm:$0xff] }
0x1aec   :  { %v1629_v27 = vand.u32 2147483647, %v1628_v25  ;;  %vm1662_vm15 = vcmp.lt.f32.partialorder %v1628_v25, 0.0  ;;  %v1795_v25 = vld [vmem:[%s2661_s3 + $0xa0] sm:$0xff] }
0x1aee   :  { %v1630_v29 = vmul.f32 0.3275911, %v1629_v27  ;;  %v1656_v57 = vsub.f32 0.0, %v1629_v27 }
0x1af0   :  { %v1631_v49 = vadd.f32 1.0, %v1630_v29  ;;  %v1657_v60 = vmul.f32 %v1656_v57, %v1629_v27  ;;  %v1791_v27 = vld [vmem:[%s2661_s3 + $0x80] sm:$0xff]  ;;  %v1788_v29 = vld [vmem:[%s2661_s3 + $0x68] sm:$0xff] }
0x1af2   :  { %2106 = vrcp.f32 %v1631_v49  ;;  %v1643_v41 = vand.u32 2147483648, %v1631_v49  ;;  %v1641_v43 = vand.u32 2147483647, %v1631_v49  ;;  %vm1637_vm4 = vweird.f32 %v1631_v49 }
0x1af3   :  { %v1658_v63 = vmul.f32 1.442695, %v1657_v60 }
0x1af4   :  { %v1644_v8 = vor.u32 1.1754944e-38, %v1643_v41  ;;  %vm1642_vm14 = vcmp.eq.f32.partialorder %v1641_v43, 8.507059e+37  ;;  %v1780_v41 = vld [vmem:[%s2661_s3 + $0x28] sm:$0xff]  ;;  %v1778_v43 = vld [vmem:[%s2661_s3 + $0x18] sm:$0xff] }
0x1af5   :  { %2108 = vpow2.f32 %v1658_v63 }
0x1af8   :  { %v2107_v34 = vpop.eup %2106 }
0x1af9   :  { %v1633_v35 = vmul.f32 %v2107_v34, %v1631_v49  ;;  %vm1638_vm3 = vweird.f32 %v2107_v34  ;;  %v1798_v49 = vld [vmem:[%s2661_s3 + $0xb8] sm:$0xff] }
0x1afa   :  { %vm1639_vm12 = vmor %vm1637_vm4, %vm1638_vm3 }
0x1afb   :  { %v1634_v39 = vsub.f32 1.0, %v1633_v35  ;;  %v2109_v1 = vpop.eup %2108  ;;  %vm1714_vm3 = vmor %vm2521_vm2, %vm1713_vm1  ;;  %v1784_v35 = vld [vmem:[%s2661_s3 + $0x48] sm:$0xff] }
0x1afc   :  { %vm2529_vm4 = vmand %vm1715_vm7, %vm1716_vm10 }
0x1afd   :  { %v1635_v42 = vmul.f32 %v2107_v34, %v1634_v39  ;;  %vm1718_vm5 = vmor %vm2521_vm2, %vm2529_vm4  ;;  %v1781_v39 = vld [vmem:[%s2661_s3 + $0x30] sm:$0xff] }
0x1afe   :  { %v1724_v16 = vsel %vm1718_vm5, 1.0, %v2147_v10 }
0x1aff   :  { %v1636_v50 = vadd.f32 %v2107_v34, %v1635_v42  ;;  %v1779_v42 = vld [vmem:[%s2661_s3 + $0x20] sm:$0xff] }
0x1b01   :  { %v1640_v51 = vsel %vm1639_vm12, %v2107_v34, %v1636_v50  ;;  %vm1720_vm12 = vcmp.eq.s32.totalorder %v2203_v44, 3  ;;  %v1783_v34 = vld [vmem:[%s2661_s3 + $0x40] sm:$0xff] }
0x1b02   :  { %v1645_v54 = vsel %vm1642_vm14, %v1644_v8, %v1640_v51  ;;  %vm1721_vm14 = vcmp.eq.s32.totalorder %v2205_v45, 5  ;;  %1864 = vmatpush.msra.mxu0 %v1783_v34  ;;  %v1775_v50 = vld [vmem:[%s2661_s3] sm:$0xff] }
0x1b03   :  { %v1647_v58 = vmul.f32 1.0614054, %v1645_v54  ;;  %vm1722_vm11 = vmand %vm1720_vm12, %vm1721_vm14 }
0x1b04   :  { %1865 = vmatpush.msra.mxu0 %v1781_v39 }
0x1b05   :  { %v1648_v59 = vadd.f32 -1.4531521, %v1647_v58 }
0x1b06   :  { %1866 = vmatpush.msra.mxu0 %v1779_v42 }
0x1b07   :  { %v1649_v61 = vmul.f32 %v1648_v59, %v1645_v54 }
0x1b08   :  { %1867 = vmatpush.msra.mxu0 %v1777_v36 }
0x1b09   :  { %v1650_v62 = vadd.f32 1.4214138, %v1649_v61 }
0x1b0a   :  { %1868 = vmatpush.msra.mxu0 %v1775_v50 }
0x1b0b   :  { %v1651_v56 = vmul.f32 %v1650_v62, %v1645_v54 }
0x1b0d   :  { %v1652_v38 = vadd.f32 -0.28449672, %v1651_v56 }
0x1b0f   :  { %v1653_v46 = vmul.f32 %v1652_v38, %v1645_v54 }
0x1b11   :  { %v1654_v48 = vadd.f32 0.2548296, %v1653_v46 }
0x1b13   :  { %v1655_v0 = vmul.f32 %v1654_v48, %v1645_v54  ;;  %v1995_v54 = vld [vmem:[%s2661_s3 + $0x100] ss:$8 sm:$0x3] }
0x1b14   :  { %v1896_v58 = vperm.slane %v1995_v54, 0  ;;  %v1897_v62 = vperm.slane %v1995_v54, 1 }
0x1b15   :  { %v1660_v3 = vmul.f32 %v2109_v1, %v1655_v0 }
0x1b17   :  { %v1661_v4 = vsub.f32 1.0, %v1660_v3 }
0x1b19   :  { %v1663_v5 = vsub.f32 0.0, %v1661_v4 }
0x1b1b   :  { %v1664_v6 = vsel %vm1662_vm15, %v1663_v5, %v1661_v4  ;;  %vm1719_vm15 = vmor %vm1714_vm3, %vm2529_vm4 }
0x1b1c   :  { %v1665_v9 = vadd.f32 1.0, %v1664_v6  ;;  %vm1723_vm13 = vmor %vm1719_vm15, %vm1722_vm11 }
0x1b1d   :  { %v1725_v15 = vsel %vm1723_vm13, 1.0, %v2147_v10 }
0x1b1e   :  { %v1666_v55 = vmul.f32 %v1665_v9, %v1627_v7 }
0x1b20   :  { %1699 = vmatmul.f32.vlgmr.msrb.gmra.mxu1 %v1666_v55 }
0x1b9d   :  { %v1700_v14 = vpop.f32.mrf.mxu1 }
0x1b9e   :  { %v1703_v44 = vadd.f32 %v1700_v14, %v2495_v52  ;;  %v1803_v52 = vld [vmem:[%s2661_s3 + $0xe0] sm:$0xff] }
0x1ba0   :  { %v1706_v45 = vadd.f32 %v2047_v13, %v1703_v44 }
0x1ba2   :  { %1987 = vmatpush.msk.msra.mxu2 %vm452_vm8, %v1706_v45  ;;  %1989 = vmatpush.msk.msra.mxu3 %vm452_vm8, %v1706_v45 }
0x1ba3   :  { %1990 = vmatmul.msk.f32.vlgmr.msra.gmra.mxu3 %vm448_vm9, %v1725_v15  ;;  %1988 = vmatmul.msk.f32.vlgmr.msra.gmra.mxu2 %vm448_vm9, %v1724_v16 }
0x1ba4   :  { %1818 = vmatpush.msrb.mxu2 %v1805_v17  ;;  %1838 = vmatpush.msrb.mxu3 %v1806_v24 }
0x1ba6   :  { %1819 = vmatpush.msrb.mxu2 %v1803_v52  ;;  %1839 = vmatpush.msrb.mxu3 %v1804_v18 }
0x1ba8   :  { %1820 = vmatpush.msrb.mxu2 %v1801_v19  ;;  %1840 = vmatpush.msrb.mxu3 %v1802_v20 }
0x1baa   :  { %1821 = vmatpush.msrb.mxu2 %v1799_v21  ;;  %1841 = vmatpush.msrb.mxu3 %v1800_v22 }
0x1bac   :  { %1822 = vmatpush.msrb.mxu2 %v1797_v23  ;;  %1842 = vmatpush.msrb.mxu3 %v1798_v49 }
0x1bae   :  { %1823 = vmatpush.msrb.mxu2 %v1795_v25  ;;  %1843 = vmatpush.msrb.mxu3 %v1796_v31 }
0x1bb0   :  { %1824 = vmatpush.msrb.mxu2 %v1793_v26  ;;  %1844 = vmatpush.msrb.mxu3 %v1794_v33 }
0x1bb2   :  { %1825 = vmatpush.msrb.mxu2 %v1791_v27  ;;  %1845 = vmatpush.msrb.mxu3 %v1792_v37 }
0x1bb4   :  { %1881 = vmatpush.msra.mxu2 %v1790_v28 }
0x1bb6   :  { %1882 = vmatpush.msra.mxu2 %v1788_v29 }
0x1bb8   :  { %1883 = vmatpush.msra.mxu2 %v1786_v2 }
0x1bba   :  { %1884 = vmatpush.msra.mxu2 %v1784_v35 }
0x1bbc   :  { %1885 = vmatpush.msra.mxu2 %v1782_v40 }
0x1bbe   :  { %1886 = vmatpush.msra.mxu2 %v1780_v41 }
0x1bc0   :  { %1887 = vmatpush.msra.mxu2 %v1778_v43 }
0x1bc2   :  { %1888 = vmatpush.msra.mxu2 %v1776_v47 }
0x1c26   :  { %v1772_v8 = vpop.f32.mrf.mxu3  ;;  %v1749_v51 = vpop.f32.mrf.mxu2 }
0x1c27   :  { %1991 = vmatmul.msk.f32.vlgmr.msrb.gmra.mxu2 %vm127_vm6, %v1772_v8  ;;  %1992 = vmatmul.msk.f32.vlgmr.msrb.gmra.mxu3 %vm127_vm6, %v1772_v8 }
0x1c28   :  { %1993 = vmatmul.msk.f32.vlgmr.msra.gmra.mxu0 %vm127_vm6, %v1749_v51 }
0x1c2f   :  { %1994 = vmatmul.msk.f32.vlgmr.msra.gmra.mxu2 %vm127_vm6, %v1749_v51 }
0x1ca5   :  { %v1870_v57 = vpop.f32.mrf.mxu0 }
0x1caa   :  { %v1827_v59 = vpop.f32.mrf.mxu2  ;;  %v1847_v63 = vpop.f32.mrf.mxu3 }
0x1cab   :  { %v1871_v60 = vadd.f32 %v1870_v57, %v1827_v59 }
0x1cad   :  { %v1900_v61 = vadd.f32 %v1896_v58, %v1871_v60 }
0x1caf   :  { %1902 = vst [vmem:[%s2662_s4] sm:$0xff] %v1900_v61 }
0x1cb2   :  { %v1890_v56 = vpop.f32.mrf.mxu2 }
0x1cb3   :  { %v1891_v38 = vadd.f32 %v1890_v56, %v1847_v63 }
0x1cb5   :  { %v1901_v46 = vadd.f32 %v1897_v62, %v1891_v38 }
0x1cb7   :  { %1903 = vst [vmem:[%s2662_s4 + $0x8] sm:$0xff] %v1901_v46 }
0x1cb8   :  { %1908 = vsyncpa [#allocation3], 1 }

</bundles_post_ra>
